<compile_context>
chip_gen: v7x
topology: tpu7x:2x2x1
jax: 0.10.0
libtpu: 0.0.40
codegen_flags: <defaults>
</compile_context>

<pallas_src>
import jax
import jax.numpy as jnp
from jax import lax
from jax.experimental import pallas as pl
from jax.experimental.pallas import tpu as pltpu

NEG_SLOPE = 0.01   # LeakyReLU default of the module
EPS = 1e-5         # BatchNorm default of the module


def _make_stacked_kernel(num_convs, hh, ww, chans, c_max):
    """Fused kernel for the whole stack. chans = (c_in, c_1, ..., c_{num_convs})."""
    hw = hh * ww

    def kernel(*refs):
        x_ref, m_left_ref, m_right_ref = refs[0], refs[1], refs[2]
        p_refs = refs[3:3 + 3 * num_convs]           # (w, scale, shift) per block
        o_ref = refs[3 + 3 * num_convs]
        buf = refs[4 + 3 * num_convs]                # (hw + 2*ww + 2, c_max) bf16

        # Zero only the padding rows of the reused scratch, every grid step.
        # (Not under pl.program_id(0)==0: with a "parallel" batch axis the grid
        # may be split across TensorCores and a core starting at a non-zero
        # program id would skip the init.)  The interior is fully overwritten
        # before every read, so it is never zeroed.
        zpad = jnp.zeros((ww + 1, c_max), dtype=jnp.bfloat16)
        buf[pl.ds(0, ww + 1), :] = zpad
        buf[pl.ds(ww + 1 + hw, ww + 1), :] = zpad

        # Column masks for the horizontal edge taps (precomputed in the
        # wrapper, broadcast over channels inside the kernel).
        m_left = m_left_ref[...]                     # (hw, 1) bf16: 0 where x == 0
        m_right = m_right_ref[...]                   # (hw, 1) bf16: 0 where x == W-1

        cur = x_ref[0]                               # (hw, c_in) bf16
        for blk in range(num_convs):
            cin, cout = chans[blk], chans[blk + 1]
            w_ref = p_refs[3 * blk + 0]              # (9*cin, cout) bf16
            s_ref = p_refs[3 * blk + 1]              # (1, cout) f32 folded BN scale
            b_ref = p_refs[3 * blk + 2]              # (1, cout) f32 folded bias+shift

            # Place this block's input in the interior of the padded buffer.
            buf[pl.ds(ww + 1, hw), :cin] = cur

            # im2col: tap (dy, dx) of the 3x3 "same" conv is the contiguous row
            # slice [dy*ww + dx, dy*ww + dx + hw) of the flattened padded
            # buffer.  Vertical zero padding comes from the zeroed pad rows;
            # the dx != 1 taps additionally zero the image-border column that
            # would otherwise read the neighbouring row's edge pixel.
            pieces = []
            for dy in range(3):
                for dx in range(3):
                    win = buf[pl.ds(dy * ww + dx, hw), :cin]   # (hw, cin) bf16
                    if dx == 0:
                        win = win * m_left
                    elif dx == 2:
                        win = win * m_right
                    pieces.append(win)
            patches = jnp.concatenate(pieces, axis=1)          # (hw, 9*cin) bf16

            # Single deep-K MXU matmul per block, f32 accumulation.
            y = jnp.dot(patches, w_ref[...], preferred_element_type=jnp.float32)

            # Dropout2d: identity in eval mode.
            # Folded (conv bias + inference BatchNorm) affine, then LeakyReLU.
            y = y * s_ref[...] + b_ref[...]
            y = jnp.where(y >= 0, y, NEG_SLOPE * y)
            cur = y.astype(jnp.bfloat16)

        o_ref[0] = cur.astype(o_ref.dtype)

    return kernel


def _fold_block_params(w_oihw, bias, gamma, beta, running_mean, running_var,
                       eps=EPS):
    """Fold conv bias + inference BatchNorm into a per-channel scale/shift and
    reshape the conv weight for the im2col matmul.

        bn(conv(x) + bias) = conv(x) * scale + shift
        scale = gamma / sqrt(var + eps)
        shift = beta + (bias - mean) * scale
    """
    scale = gamma / jnp.sqrt(running_var + eps)
    shift = beta + (bias - running_mean) * scale
    cout, cin = int(w_oihw.shape[0]), int(w_oihw.shape[1])
    # OIHW -> (KH, KW, I, O) -> (9*I, O); row order (dy, dx, ci) matches the
    # im2col patch column order built in the kernel.
    w9 = jnp.transpose(w_oihw, (2, 3, 1, 0)).reshape(9 * cin, cout)
    return (w9.astype(jnp.bfloat16),
            scale.reshape(1, cout).astype(jnp.float32),
            shift.reshape(1, cout).astype(jnp.float32))


def _pick_vmem_limit_bytes():
    """~100 MiB on 128 MiB parts (v5e/v6e); conservative 32 MiB otherwise."""
    try:
        cap = int(getattr(pltpu.get_tpu_info(), "vmem_capacity_bytes", 0))
    except Exception:
        cap = 0
    if cap >= 96 * 1024 * 1024:
        return 100 * 1024 * 1024
    return 32 * 1024 * 1024


def stacked_conv_layers_nhwc(x_nhwc, block_params):
    """Forward of nnUNet StackedConvLayers (eval mode), NHWC in / NHWC out (bf16).

    block_params: list of dicts (one per ConvDropoutNormNonlin block) with keys
      'w' (cout, cin, 3, 3), 'b', 'gamma', 'beta', 'mean', 'var'.
    """
    n, hh, ww, c_in = map(int, x_nhwc.shape)
    num_convs = len(block_params)
    chans = [c_in] + [int(p['w'].shape[0]) for p in block_params]
    c_out = chans[-1]
    c_max = max(chans[:-1])           # widest conv *input* in the stack
    hw = hh * ww
    rp = hw + 2 * ww + 2              # flattened rows + W pad rows + dx slack

    # (n, hh, ww, c) -> (n, hh*ww, c) is a free (metadata-only) reshape.
    x = x_nhwc.astype(jnp.bfloat16).reshape(n, hw, c_in)

    # Column masks for the horizontal edge taps, computed once on the host/XLA.
    xpos = jnp.arange(hw, dtype=jnp.int32).reshape(hw, 1) % ww
    not_x0 = (xpos != 0).astype(jnp.bfloat16)
    not_xl = (xpos != ww - 1).astype(jnp.bfloat16)

    flat_params = []
    in_specs = [
        pl.BlockSpec((1, hw, c_in), lambda b: (b, 0, 0)),
        pl.BlockSpec((hw, 1), lambda b: (0, 0)),
        pl.BlockSpec((hw, 1), lambda b: (0, 0)),
    ]
    for p in block_params:
        w9, scale, shift = _fold_block_params(
            p['w'], p['b'], p['gamma'], p['beta'], p['mean'], p['var'])
        flat_params += [w9, scale, shift]
        in_specs += [
            pl.BlockSpec(w9.shape, lambda b: (0, 0)),
            pl.BlockSpec(scale.shape, lambda b: (0, 0)),
            pl.BlockSpec(shift.shape, lambda b: (0, 0)),
        ]

    # Advisory cost: MXU + HBM bound (wrapper transposes are separate XLA ops).
    flops = 0
    for i in range(num_convs):
        flops += 2 * n * hw * 9 * chans[i] * chans[i + 1]
    param_bytes = sum(int(a.size) * a.dtype.itemsize for a in flat_params)
    bytes_accessed = n * hw * (c_in + c_out) * 2 + param_bytes
    cost = pl.CostEstimate(flops=flops, transcendentals=0,
                           bytes_accessed=bytes_accessed)

    out = pl.pallas_call(
        _make_stacked_kernel(num_convs, hh, ww, tuple(chans), c_max),
        out_shape=jax.ShapeDtypeStruct((n, hw, c_out), jnp.bfloat16),
        grid=(n,),
        in_specs=in_specs,
        out_specs=pl.BlockSpec((1, hw, c_out), lambda b: (b, 0, 0)),
        scratch_shapes=[pltpu.VMEM((rp, c_max), jnp.bfloat16)],
        compiler_params=pltpu.CompilerParams(
            dimension_semantics=("parallel",),
            vmem_limit_bytes=_pick_vmem_limit_bytes()),
        cost_estimate=cost,
    )(x, not_x0, not_xl, *flat_params)

    return out.reshape(n, hh, ww, c_out)


def stacked_conv_layers(x_nchw, block_params):
    """NCHW wrapper (PyTorch layout), NCHW in / NCHW out.

    The layout change is done in bf16 so the extra HBM pass moves half the
    bytes; prefer `stacked_conv_layers_nhwc` when the surrounding network is
    already channels-last.
    """
    x_nhwc = jnp.transpose(x_nchw.astype(jnp.bfloat16), (0, 2, 3, 1))
    out_nhwc = stacked_conv_layers_nhwc(x_nhwc, block_params)
    return jnp.transpose(out_nhwc, (0, 3, 1, 2)).astype(x_nchw.dtype)


if __name__ == "__main__":
    key = jax.random.PRNGKey(0)
    N, C_IN, C_OUT, H, W = 2, 4, 8, 16, 16
    NUM_CONVS = 2

    keys = jax.random.split(key, 1 + 6 * NUM_CONVS)
    x = jax.random.normal(keys[0], (N, C_IN, H, W), dtype=jnp.float32)

    params = []
    cin = C_IN
    ki = 1
    for _ in range(NUM_CONVS):
        w = 0.1 * jax.random.normal(keys[ki], (C_OUT, cin, 3, 3), jnp.float32); ki += 1
        b = 0.1 * jax.random.normal(keys[ki], (C_OUT,), jnp.float32); ki += 1
        gamma = 1.0 + 0.1 * jax.random.normal(keys[ki], (C_OUT,), jnp.float32); ki += 1
        beta = 0.1 * jax.random.normal(keys[ki], (C_OUT,), jnp.float32); ki += 1
        mean = 0.1 * jax.random.normal(keys[ki], (C_OUT,), jnp.float32); ki += 1
        var = jnp.abs(jax.random.normal(keys[ki], (C_OUT,), jnp.float32)) + 0.5; ki += 1
        params.append(dict(w=w, b=b, gamma=gamma, beta=beta, mean=mean, var=var))
        cin = C_OUT

    out = jax.jit(stacked_conv_layers)(x, params)
    out = jax.block_until_ready(out)

    # Pure-JAX f32 reference of the PyTorch eval-mode forward.
    def ref_block(xx, p):
        y = lax.conv_general_dilated(
            xx, p['w'], window_strides=(1, 1), padding='SAME',
            dimension_numbers=('NCHW', 'OIHW', 'NCHW'))
        y = y + p['b'][None, :, None, None]
        y = (y - p['mean'][None, :, None, None]) / jnp.sqrt(
            p['var'][None, :, None, None] + EPS)
        y = y * p['gamma'][None, :, None, None] + p['beta'][None, :, None, None]
        return jnp.where(y >= 0, y, NEG_SLOPE * y)

    ref = x
    for p in params:
        ref = ref_block(ref, p)

    assert out.shape == (N, C_OUT, H, W), out.shape
    assert out.dtype == x.dtype, out.dtype
    err = float(jnp.max(jnp.abs(out - ref)))
    # bf16 activations / weights inside the kernel (f32 accumulation), so the
    # tolerance vs. the pure-f32 reference is loosened accordingly.
    assert jnp.allclose(out, ref, atol=3e-2, rtol=3e-2), f"max abs err {err}"

    print("KERNEL_OK")
</pallas_src>

<mosaic_0001>
module attributes {stable_mosaic.version = 11 : i64} {
  func.func @kernel(%arg0: i32, %arg1: memref<1x256x4xbf16, #tpu.memory_space<vmem>>, %arg2: memref<256x1xbf16, #tpu.memory_space<vmem>>, %arg3: memref<256x1xbf16, #tpu.memory_space<vmem>>, %arg4: memref<36x8xbf16, #tpu.memory_space<vmem>>, %arg5: memref<1x8xf32, #tpu.memory_space<vmem>>, %arg6: memref<1x8xf32, #tpu.memory_space<vmem>>, %arg7: memref<72x8xbf16, #tpu.memory_space<vmem>>, %arg8: memref<1x8xf32, #tpu.memory_space<vmem>>, %arg9: memref<1x8xf32, #tpu.memory_space<vmem>>, %arg10: memref<1x256x8xbf16, #tpu.memory_space<vmem>>, %arg11: memref<290x8xbf16, #tpu.memory_space<vmem>>) attributes {dimension_semantics = [#tpu.dimension_semantics<parallel>], iteration_bounds = array<i64: 2>, scalar_prefetch = 0 : i64, scratch_operands = 1 : i64, tpu.core_type = #tpu.core_type<tc>, window_params = [{transform_indices = @transform_0, window_bounds = array<i64: 1, 256, 4>}, {pipeline_mode = #tpu.pipeline_mode<synchronous>, transform_indices = @transform_1, window_bounds = array<i64: 256, 1>}, {pipeline_mode = #tpu.pipeline_mode<synchronous>, transform_indices = @transform_2, window_bounds = array<i64: 256, 1>}, {pipeline_mode = #tpu.pipeline_mode<synchronous>, transform_indices = @transform_3, window_bounds = array<i64: 36, 8>}, {pipeline_mode = #tpu.pipeline_mode<synchronous>, transform_indices = @transform_4, window_bounds = array<i64: 1, 8>}, {pipeline_mode = #tpu.pipeline_mode<synchronous>, transform_indices = @transform_5, window_bounds = array<i64: 1, 8>}, {pipeline_mode = #tpu.pipeline_mode<synchronous>, transform_indices = @transform_6, window_bounds = array<i64: 72, 8>}, {pipeline_mode = #tpu.pipeline_mode<synchronous>, transform_indices = @transform_7, window_bounds = array<i64: 1, 8>}, {pipeline_mode = #tpu.pipeline_mode<synchronous>, transform_indices = @transform_8, window_bounds = array<i64: 1, 8>}, {transform_indices = @transform_9, window_bounds = array<i64: 1, 256, 8>}]} {
    %cst = arith.constant 0.000000e+00 : bf16
    %0 = vector.broadcast %cst : bf16 to vector<17x8xbf16>
    %c0 = arith.constant 0 : index
    %c0_0 = arith.constant 0 : index
    %1 = vector.load %arg11[%c0, %c0_0] : memref<290x8xbf16, #tpu.memory_space<vmem>>, vector<17x8xbf16>
    tpu.vector_store %arg11[%c0, %c0_0], %0 {strides = array<i32>} : memref<290x8xbf16, #tpu.memory_space<vmem>>, vector<17x8xbf16>,
    %c273 = arith.constant 273 : index
    %c0_1 = arith.constant 0 : index
    %2 = vector.load %arg11[%c273, %c0_1] : memref<290x8xbf16, #tpu.memory_space<vmem>>, vector<17x8xbf16>
    tpu.vector_store %arg11[%c273, %c0_1], %0 {strides = array<i32>} : memref<290x8xbf16, #tpu.memory_space<vmem>>, vector<17x8xbf16>,
    %c0_2 = arith.constant 0 : index
    %c0_3 = arith.constant 0 : index
    %3 = vector.load %arg2[%c0_2, %c0_3] : memref<256x1xbf16, #tpu.memory_space<vmem>>, vector<256x1xbf16>
    %c0_4 = arith.constant 0 : index
    %c0_5 = arith.constant 0 : index
    %4 = vector.load %arg3[%c0_4, %c0_5] : memref<256x1xbf16, #tpu.memory_space<vmem>>, vector<256x1xbf16>
    %c0_6 = arith.constant 0 : index
    %c0_7 = arith.constant 0 : index
    %c0_8 = arith.constant 0 : index
    %5 = vector.load %arg1[%c0_6, %c0_7, %c0_8] : memref<1x256x4xbf16, #tpu.memory_space<vmem>>, vector<1x256x4xbf16>
    %6 = vector.shape_cast %5 : vector<1x256x4xbf16> to vector<256x4xbf16>
    %c17 = arith.constant 17 : index
    %c0_9 = arith.constant 0 : index
    %7 = vector.load %arg11[%c17, %c0_9] : memref<290x8xbf16, #tpu.memory_space<vmem>>, vector<256x4xbf16>
    tpu.vector_store %arg11[%c17, %c0_9], %6 {strides = array<i32>} : memref<290x8xbf16, #tpu.memory_space<vmem>>, vector<256x4xbf16>,
    %c0_10 = arith.constant 0 : index
    %c0_11 = arith.constant 0 : index
    %8 = vector.load %arg11[%c0_10, %c0_11] : memref<290x8xbf16, #tpu.memory_space<vmem>>, vector<256x4xbf16>
    %9 = vector.broadcast %3 : vector<256x1xbf16> to vector<256x4xbf16>
    %10 = arith.mulf %8, %9 : vector<256x4xbf16>
    %c1 = arith.constant 1 : index
    %c0_12 = arith.constant 0 : index
    %11 = vector.load %arg11[%c1, %c0_12] : memref<290x8xbf16, #tpu.memory_space<vmem>>, vector<256x4xbf16>
    %c2 = arith.constant 2 : index
    %c0_13 = arith.constant 0 : index
    %12 = vector.load %arg11[%c2, %c0_13] : memref<290x8xbf16, #tpu.memory_space<vmem>>, vector<256x4xbf16>
    %13 = vector.broadcast %4 : vector<256x1xbf16> to vector<256x4xbf16>
    %14 = arith.mulf %12, %13 : vector<256x4xbf16>
    %c16 = arith.constant 16 : index
    %c0_14 = arith.constant 0 : index
    %15 = vector.load %arg11[%c16, %c0_14] : memref<290x8xbf16, #tpu.memory_space<vmem>>, vector<256x4xbf16>
    %16 = vector.broadcast %3 : vector<256x1xbf16> to vector<256x4xbf16>
    %17 = arith.mulf %15, %16 : vector<256x4xbf16>
    %c17_15 = arith.constant 17 : index
    %c0_16 = arith.constant 0 : index
    %18 = vector.load %arg11[%c17_15, %c0_16] : memref<290x8xbf16, #tpu.memory_space<vmem>>, vector<256x4xbf16>
    %c18 = arith.constant 18 : index
    %c0_17 = arith.constant 0 : index
    %19 = vector.load %arg11[%c18, %c0_17] : memref<290x8xbf16, #tpu.memory_space<vmem>>, vector<256x4xbf16>
    %20 = vector.broadcast %4 : vector<256x1xbf16> to vector<256x4xbf16>
    %21 = arith.mulf %19, %20 : vector<256x4xbf16>
    %c32 = arith.constant 32 : index
    %c0_18 = arith.constant 0 : index
    %22 = vector.load %arg11[%c32, %c0_18] : memref<290x8xbf16, #tpu.memory_space<vmem>>, vector<256x4xbf16>
    %23 = vector.broadcast %3 : vector<256x1xbf16> to vector<256x4xbf16>
    %24 = arith.mulf %22, %23 : vector<256x4xbf16>
    %c33 = arith.constant 33 : index
    %c0_19 = arith.constant 0 : index
    %25 = vector.load %arg11[%c33, %c0_19] : memref<290x8xbf16, #tpu.memory_space<vmem>>, vector<256x4xbf16>
    %c34 = arith.constant 34 : index
    %c0_20 = arith.constant 0 : index
    %26 = vector.load %arg11[%c34, %c0_20] : memref<290x8xbf16, #tpu.memory_space<vmem>>, vector<256x4xbf16>
    %27 = vector.broadcast %4 : vector<256x1xbf16> to vector<256x4xbf16>
    %28 = arith.mulf %26, %27 : vector<256x4xbf16>
    %29 = tpu.concatenate %10, %11, %14, %17, %18, %21, %24, %25, %28 in 1 : vector<256x4xbf16>, vector<256x4xbf16>, vector<256x4xbf16>, vector<256x4xbf16>, vector<256x4xbf16>, vector<256x4xbf16>, vector<256x4xbf16>, vector<256x4xbf16>, vector<256x4xbf16> -> vector<256x36xbf16>
    %c0_21 = arith.constant 0 : index
    %c0_22 = arith.constant 0 : index
    %30 = vector.load %arg4[%c0_21, %c0_22] : memref<36x8xbf16, #tpu.memory_space<vmem>>, vector<36x8xbf16>
    %cst_23 = arith.constant dense<0.000000e+00> : vector<256x8xf32>
    %31 = tpu.matmul %29, %30, %cst_23 {dimension_numbers = #tpu.dot_dimension_numbers<[1], [0], [0], [1], [0, 0, 1, 1], [], []>} : vector<256x36xbf16>, vector<36x8xbf16>, vector<256x8xf32> -> vector<256x8xf32>
    %c0_24 = arith.constant 0 : index
    %c0_25 = arith.constant 0 : index
    %32 = vector.load %arg5[%c0_24, %c0_25] : memref<1x8xf32, #tpu.memory_space<vmem>>, vector<1x8xf32>
    %33 = vector.broadcast %32 : vector<1x8xf32> to vector<256x8xf32>
    %34 = arith.mulf %31, %33 : vector<256x8xf32>
    %c0_26 = arith.constant 0 : index
    %c0_27 = arith.constant 0 : index
    %35 = vector.load %arg6[%c0_26, %c0_27] : memref<1x8xf32, #tpu.memory_space<vmem>>, vector<1x8xf32>
    %36 = vector.broadcast %35 : vector<1x8xf32> to vector<256x8xf32>
    %37 = arith.addf %34, %36 : vector<256x8xf32>
    %cst_28 = arith.constant 0.000000e+00 : f32
    %38 = vector.broadcast %cst_28 : f32 to vector<256x8xf32>
    %39 = arith.cmpf oge, %37, %38 : vector<256x8xf32>
    %cst_29 = arith.constant 0.00999999977 : f32
    %40 = vector.broadcast %cst_29 : f32 to vector<256x8xf32>
    %41 = arith.mulf %40, %37 : vector<256x8xf32>
    %42 = arith.select %39, %37, %41 : vector<256x8xi1>, vector<256x8xf32>
    %43 = arith.truncf %42 : vector<256x8xf32> to vector<256x8xbf16>
    %c17_30 = arith.constant 17 : index
    %c0_31 = arith.constant 0 : index
    %44 = vector.load %arg11[%c17_30, %c0_31] : memref<290x8xbf16, #tpu.memory_space<vmem>>, vector<256x8xbf16>
    tpu.vector_store %arg11[%c17_30, %c0_31], %43 {strides = array<i32>} : memref<290x8xbf16, #tpu.memory_space<vmem>>, vector<256x8xbf16>,
    %c0_32 = arith.constant 0 : index
    %c0_33 = arith.constant 0 : index
    %45 = vector.load %arg11[%c0_32, %c0_33] : memref<290x8xbf16, #tpu.memory_space<vmem>>, vector<256x8xbf16>
    %46 = vector.broadcast %3 : vector<256x1xbf16> to vector<256x8xbf16>
    %47 = arith.mulf %45, %46 : vector<256x8xbf16>
    %c1_34 = arith.constant 1 : index
    %c0_35 = arith.constant 0 : index
    %48 = vector.load %arg11[%c1_34, %c0_35] : memref<290x8xbf16, #tpu.memory_space<vmem>>, vector<256x8xbf16>
    %c2_36 = arith.constant 2 : index
    %c0_37 = arith.constant 0 : index
    %49 = vector.load %arg11[%c2_36, %c0_37] : memref<290x8xbf16, #tpu.memory_space<vmem>>, vector<256x8xbf16>
    %50 = vector.broadcast %4 : vector<256x1xbf16> to vector<256x8xbf16>
    %51 = arith.mulf %49, %50 : vector<256x8xbf16>
    %c16_38 = arith.constant 16 : index
    %c0_39 = arith.constant 0 : index
    %52 = vector.load %arg11[%c16_38, %c0_39] : memref<290x8xbf16, #tpu.memory_space<vmem>>, vector<256x8xbf16>
    %53 = vector.broadcast %3 : vector<256x1xbf16> to vector<256x8xbf16>
    %54 = arith.mulf %52, %53 : vector<256x8xbf16>
    %c17_40 = arith.constant 17 : index
    %c0_41 = arith.constant 0 : index
    %55 = vector.load %arg11[%c17_40, %c0_41] : memref<290x8xbf16, #tpu.memory_space<vmem>>, vector<256x8xbf16>
    %c18_42 = arith.constant 18 : index
    %c0_43 = arith.constant 0 : index
    %56 = vector.load %arg11[%c18_42, %c0_43] : memref<290x8xbf16, #tpu.memory_space<vmem>>, vector<256x8xbf16>
    %57 = vector.broadcast %4 : vector<256x1xbf16> to vector<256x8xbf16>
    %58 = arith.mulf %56, %57 : vector<256x8xbf16>
    %c32_44 = arith.constant 32 : index
    %c0_45 = arith.constant 0 : index
    %59 = vector.load %arg11[%c32_44, %c0_45] : memref<290x8xbf16, #tpu.memory_space<vmem>>, vector<256x8xbf16>
    %60 = vector.broadcast %3 : vector<256x1xbf16> to vector<256x8xbf16>
    %61 = arith.mulf %59, %60 : vector<256x8xbf16>
    %c33_46 = arith.constant 33 : index
    %c0_47 = arith.constant 0 : index
    %62 = vector.load %arg11[%c33_46, %c0_47] : memref<290x8xbf16, #tpu.memory_space<vmem>>, vector<256x8xbf16>
    %c34_48 = arith.constant 34 : index
    %c0_49 = arith.constant 0 : index
    %63 = vector.load %arg11[%c34_48, %c0_49] : memref<290x8xbf16, #tpu.memory_space<vmem>>, vector<256x8xbf16>
    %64 = vector.broadcast %4 : vector<256x1xbf16> to vector<256x8xbf16>
    %65 = arith.mulf %63, %64 : vector<256x8xbf16>
    %66 = tpu.concatenate %47, %48, %51, %54, %55, %58, %61, %62, %65 in 1 : vector<256x8xbf16>, vector<256x8xbf16>, vector<256x8xbf16>, vector<256x8xbf16>, vector<256x8xbf16>, vector<256x8xbf16>, vector<256x8xbf16>, vector<256x8xbf16>, vector<256x8xbf16> -> vector<256x72xbf16>
    %c0_50 = arith.constant 0 : index
    %c0_51 = arith.constant 0 : index
    %67 = vector.load %arg7[%c0_50, %c0_51] : memref<72x8xbf16, #tpu.memory_space<vmem>>, vector<72x8xbf16>
    %cst_52 = arith.constant dense<0.000000e+00> : vector<256x8xf32>
    %68 = tpu.matmul %66, %67, %cst_52 {dimension_numbers = #tpu.dot_dimension_numbers<[1], [0], [0], [1], [0, 0, 1, 1], [], []>} : vector<256x72xbf16>, vector<72x8xbf16>, vector<256x8xf32> -> vector<256x8xf32>
    %c0_53 = arith.constant 0 : index
    %c0_54 = arith.constant 0 : index
    %69 = vector.load %arg8[%c0_53, %c0_54] : memref<1x8xf32, #tpu.memory_space<vmem>>, vector<1x8xf32>
    %70 = vector.broadcast %69 : vector<1x8xf32> to vector<256x8xf32>
    %71 = arith.mulf %68, %70 : vector<256x8xf32>
    %c0_55 = arith.constant 0 : index
    %c0_56 = arith.constant 0 : index
    %72 = vector.load %arg9[%c0_55, %c0_56] : memref<1x8xf32, #tpu.memory_space<vmem>>, vector<1x8xf32>
    %73 = vector.broadcast %72 : vector<1x8xf32> to vector<256x8xf32>
    %74 = arith.addf %71, %73 : vector<256x8xf32>
    %cst_57 = arith.constant 0.000000e+00 : f32
    %75 = vector.broadcast %cst_57 : f32 to vector<256x8xf32>
    %76 = arith.cmpf oge, %74, %75 : vector<256x8xf32>
    %cst_58 = arith.constant 0.00999999977 : f32
    %77 = vector.broadcast %cst_58 : f32 to vector<256x8xf32>
    %78 = arith.mulf %77, %74 : vector<256x8xf32>
    %79 = arith.select %76, %74, %78 : vector<256x8xi1>, vector<256x8xf32>
    %80 = arith.truncf %79 : vector<256x8xf32> to vector<256x8xbf16>
    %c0_59 = arith.constant 0 : index
    %c0_60 = arith.constant 0 : index
    %c0_61 = arith.constant 0 : index
    %81 = vector.load %arg10[%c0_59, %c0_60, %c0_61] : memref<1x256x8xbf16, #tpu.memory_space<vmem>>, vector<1x256x8xbf16>
    %82 = vector.shape_cast %81 : vector<1x256x8xbf16> to vector<256x8xbf16>
    %83 = vector.shape_cast %80 : vector<256x8xbf16> to vector<1x256x8xbf16>
    tpu.vector_store %arg10[%c0_59, %c0_60, %c0_61], %83 {strides = array<i32>} : memref<1x256x8xbf16, #tpu.memory_space<vmem>>, vector<1x256x8xbf16>,
    return
  }
  func.func @transform_0(%arg0: i32) -> (i32, i32, i32) {
    %c0_i32 = arith.constant 0 : i32
    %c0_i32_0 = arith.constant 0 : i32
    %c0_i32_1 = arith.constant 0 : i32
    return %arg0, %c0_i32, %c0_i32_0 : i32, i32, i32
  }
  func.func @transform_1(%arg0: i32) -> (i32, i32) {
    %c0_i32 = arith.constant 0 : i32
    %c0_i32_0 = arith.constant 0 : i32
    %c0_i32_1 = arith.constant 0 : i32
    return %c0_i32, %c0_i32_0 : i32, i32
  }
  func.func @transform_2(%arg0: i32) -> (i32, i32) {
    %c0_i32 = arith.constant 0 : i32
    %c0_i32_0 = arith.constant 0 : i32
    %c0_i32_1 = arith.constant 0 : i32
    return %c0_i32, %c0_i32_0 : i32, i32
  }
  func.func @transform_3(%arg0: i32) -> (i32, i32) {
    %c0_i32 = arith.constant 0 : i32
    %c0_i32_0 = arith.constant 0 : i32
    %c0_i32_1 = arith.constant 0 : i32
    return %c0_i32, %c0_i32_0 : i32, i32
  }
  func.func @transform_4(%arg0: i32) -> (i32, i32) {
    %c0_i32 = arith.constant 0 : i32
    %c0_i32_0 = arith.constant 0 : i32
    %c0_i32_1 = arith.constant 0 : i32
    return %c0_i32, %c0_i32_0 : i32, i32
  }
  func.func @transform_5(%arg0: i32) -> (i32, i32) {
    %c0_i32 = arith.constant 0 : i32
    %c0_i32_0 = arith.constant 0 : i32
    %c0_i32_1 = arith.constant 0 : i32
    return %c0_i32, %c0_i32_0 : i32, i32
  }
  func.func @transform_6(%arg0: i32) -> (i32, i32) {
    %c0_i32 = arith.constant 0 : i32
    %c0_i32_0 = arith.constant 0 : i32
    %c0_i32_1 = arith.constant 0 : i32
    return %c0_i32, %c0_i32_0 : i32, i32
  }
  func.func @transform_7(%arg0: i32) -> (i32, i32) {
    %c0_i32 = arith.constant 0 : i32
    %c0_i32_0 = arith.constant 0 : i32
    %c0_i32_1 = arith.constant 0 : i32
    return %c0_i32, %c0_i32_0 : i32, i32
  }
  func.func @transform_8(%arg0: i32) -> (i32, i32) {
    %c0_i32 = arith.constant 0 : i32
    %c0_i32_0 = arith.constant 0 : i32
    %c0_i32_1 = arith.constant 0 : i32
    return %c0_i32, %c0_i32_0 : i32, i32
  }
  func.func @transform_9(%arg0: i32) -> (i32, i32, i32) {
    %c0_i32 = arith.constant 0 : i32
    %c0_i32_0 = arith.constant 0 : i32
    %c0_i32_1 = arith.constant 0 : i32
    return %arg0, %c0_i32, %c0_i32_0 : i32, i32, i32
  }
}

</mosaic_0001>

<bundles_post_ra>
// kernel: stacked_conv_layers.1
= control target key start
LH: loop header
LB: loop body
LE: loop exit
PB: predicated region body
PF: predicated region fallthrough
CT: control target
= control target key end

     0   :  { %s7422_s30 = smov 0   ;;  %s11306_s0 = inlined_call_operand.vmem [shape: bf16[2,256,4], index: 0, kind: input, shape index: {}]   ;;  %s11307_s1 = inlined_call_operand.vmem [shape: bf16[256,1], index: 1, kind: input, shape index: {}]   ;;  %s11308_s2 = inlined_call_operand.vmem [shape: bf16[256,1], index: 2, kind: input, shape index: {}]   ;;  %s11309_s3 = inlined_call_operand.vmem [shape: bf16[36,8], index: 3, kind: input, shape index: {}]   ;;  %s11310_s4 = inlined_call_operand.vmem [shape: f32[1,8], index: 4, kind: input, shape index: {}]   ;;  %s11311_s5 = inlined_call_operand.vmem [shape: f32[1,8], index: 5, kind: input, shape index: {}]   ;;  %s11312_s6 = inlined_call_operand.vmem [shape: bf16[72,8], index: 6, kind: input, shape index: {}]   ;;  %s11313_s7 = inlined_call_operand.vmem [shape: f32[1,8], index: 7, kind: input, shape index: {}]   ;;  %s11314_s8 = inlined_call_operand.vmem [shape: f32[1,8], index: 8, kind: input, shape index: {}]   ;;  %s11315_s9 = inlined_call_operand.vmem [shape: bf16[2,256,8], index: 9, kind: output, shape index: {}]  }
   0x1 LB: > { %s6700_s10 = sadd.s32 4294967295, %s7356_s30   ;;  %p6704_p0 = scmp.ge.s32.totalorder %s7356_s30, 1  ;;  %s7356_s30 = sphi %s7422_s30, %s19_s30  }
   0x2   : > { %p287_p1 = scmp.lt.s32.totalorder %s7356_s30, 3 }
   0x4   : > { %p288_p2 = pnand %p6704_p0, %p287_p1 }
   0x6   : > { %291 = sbr.rel (%p288_p2) target bundleno = 1176 (0x498), region = 56 }
   0xd   : > { %vm337_vm0 = vcmask 57344   ;;  %vm338_vm1 = vsmask.f32 256  ;;  %v340_v0 = vld [vmem:[#allocation2 + $0x8] sm:$0x1]  ;;  %v11475_v1 = vmov 0 }
   0xe   : > { %vm7431_vm2 = vmand %vm337_vm0, %vm338_vm1  ;;  %v7358_v2 = vmov 0   ;;  %p323_p3 = scmp.lt.s32.totalorder %s6700_s10, 1  ;;  %vm334_vm3 = vcmask 60416   ;;  %v346_v4 = vld [vmem:[#allocation2 + $0x88] sm:$0xf]  ;;  %v11478_v7 = vmov 0 }
   0xf   : > { %v11476_v1 = vsel %vm7431_vm2, 4294967295, %v11475_v1  ;;  %7285 = vset.pattern.permute.xlu1 %v7358_v2  ;;  %351 = vst.msk [vmem:[#allocation2 + $0x90] sm:$0x1] %vm337_vm0, %v7358_v2  ;;  %7284 = vset.pattern.permute.xlu0 %v7358_v2  ;;  %v341_v3 = vsel %vm7431_vm2, 0, %v340_v0  ;;  %v354_v5 = vld [vmem:[%s11307_s1 + $0x8] sm:$0xf] }
  0x10   : > { %11477 = vst [vmem:[#allocation3_spill] sm:$0xff] %v11476_v1  ;;  %342 = vst [vmem:[#allocation2 + $0x8] sm:$0x1] %v341_v3  ;;  %v352_v6 = vld [vmem:[%s11307_s1] sm:$0xf]  ;;  %s11736_s10 = smov (!%p323_p3, %s6700_s10), 1  ;;  %870 = vperm.xlu1 %7285, %v354_v5  }
  0x11   : > { %335 = vst.msk [vmem:[#allocation2] sm:$0xf] %vm334_vm3, %v7358_v2  ;;  %336 = vst.msk [vmem:[#allocation2 + $0x4] sm:$0xf] %vm334_vm3, %v7358_v2  ;;  %vm344_vm4 = vsmask.f32 7938  ;;  %846 = vperm.xlu0 %7284, %v352_v6  }
  0x12   : > { %349 = vst.msk [vmem:[#allocation2 + $0x8c] sm:$0xf] %vm334_vm3, %v7358_v2  ;;  %vm7450_vm5 = vmand %vm334_vm3, %vm344_vm4  ;;  %v355_v8 = vld [vmem:[%s11307_s1 + $0xc] sm:$0xf]  ;;  %v353_v9 = vld [vmem:[%s11307_s1 + $0x4] sm:$0xf] }
  0x13   : > { %v11479_v7 = vsel %vm7450_vm5, 4294967295, %v11478_v7  ;;  %vm448_vm6 = vsmask.f32 4368  ;;  %s7074_s19 = sshll.u32 %s11736_s10, 7  ;;  %v347_v10 = vsel %vm7450_vm5, 0, %v346_v4  ;;  %vm770_vm7 = vcmask 27648  }
  0x14   : > { %11480 = vst [vmem:[#allocation4_spill] sm:$0xff] %v11479_v7  ;;  %vm807_vm8 = vcmask 24576   ;;  %s7468_s22 = scalar_lea.vmem %s11306_s0, %s7074_s19  ;;  %348 = vst [vmem:[#allocation2 + $0x88] sm:$0xf] %v347_v10  ;;  %v357_v11 = vld [vmem:[%s11307_s1 + $0x14] sm:$0xf]  ;;  %882 = vperm.xlu1 %7285, %v355_v8  }
  0x15   : > { %v356_v12 = vld [vmem:[%s11307_s1 + $0x10] sm:$0xf]  ;;  %v416_v13 = vld [vmem:[%s7468_s22] sm:$0xf]  ;;  %v417_v14 = vld [vmem:[%s7468_s22 + $0x4] sm:$0xf]  ;;  %858 = vperm.xlu0 %7284, %v353_v9  }
  0x16   : > { %v445_v15 = vld [vmem:[%s7468_s22 + $0x74] sm:$0xf]  ;;  %v446_v16 = vld [vmem:[%s7468_s22 + $0x78] sm:$0xf]  ;;  %v447_v17 = vld [vmem:[%s7468_s22 + $0x7c] sm:$0xf] }
  0x17   : > { %v451_v18 = vshrl.u32 %v416_v13, 16  ;;  %v454_v19 = vshll.u32 %v416_v13, 16  ;;  %v459_v20 = vshrl.u32 %v417_v14, 16  ;;  %v462_v21 = vshll.u32 %v417_v14, 16  ;;  %vm7483_vm9 = vmand %vm770_vm7, %vm344_vm4  ;;  %v772_v29 = vld [vmem:[#allocation2 + $0x8] sm:$0xf] }
  0x18   : > { %v711_v22 = vshrl.u32 %v445_v15, 16  ;;  %v720_v23 = vshrl.u32 %v446_v16, 16  ;;  %v723_v25 = vshll.u32 %v446_v16, 16  ;;  %v729_v26 = vshrl.u32 %v447_v17, 16  ;;  %906 = vperm.xlu1 %7285, %v357_v11   ;;  %vm7493_vm10 = vmor %vm338_vm1, %vm448_vm6  ;;  %v384_v37 = vld [vmem:[%s11308_s2] sm:$0xf] }
  0x19   : > { %v453_v24 = vrot.slane %v451_v18, 7  ;;  %v732_v27 = vshll.u32 %v447_v17, 16  ;;  %v7487_v30 = vrot.slane %v459_v20, 7  ;;  %894 = vperm.xlu0 %7284, %v356_v12   ;;  %v11484_v33 = vmov 0  ;;  %v358_v38 = vld [vmem:[%s11307_s1 + $0x18] sm:$0xf]  ;;  %vm7505_vm11 = vmand %vm807_vm8, %vm338_vm1 }
  0x1a   : > { %v7489_v31 = vrot.slane %v711_v22, 7  ;;  %v722_v32 = vrot.slane %v720_v23, 7  ;;  %v11485_v33 = vsel %vm7493_vm10, 4294967295, %v11484_v33  ;;  %v731_v36 = vrot.slane %v729_v26, 7  ;;  %v386_v52 = vld [vmem:[%s11308_s2 + $0x8] sm:$0xf] }
  0x1b   : > { %11486 = vst [vmem:[#allocation6_spill] sm:$0xff] %v11485_v33  ;;  %v456_v34 = vor.u32 %v454_v19, %v453_v24  ;;  %v457_v35 = vrot.slane %v453_v24, 4  ;;  %v464_v40 = vor.u32 %v462_v21, %v7487_v30  ;;  %v809_v44 = vld [vmem:[#allocation2 + $0x88] sm:$0x1]  ;;  %v385_v53 = vld [vmem:[%s11308_s2 + $0x4] sm:$0xf] }
  0x1c   : > { %11483 = vst [vmem:[#allocation5_spill] sm:$0xff] %v7489_v31  ;;  %v718_v41 = vrot.slane %v7489_v31, 4  ;;  %v725_v42 = vor.u32 %v723_v25, %v722_v32  ;;  %v727_v43 = vrot.slane %v722_v32, 4  ;;  %v734_v45 = vor.u32 %v732_v27, %v731_v36  ;;  %1296 = vperm.xlu1 %7285, %v384_v37   ;;  %v388_v54 = vld [vmem:[%s11308_s2 + $0x10] sm:$0xf]  ;;  %s7360_s24 = smov 4  }
  0x1d   : > { %v736_v46 = vrot.slane %v731_v36, 4  ;;  %v773_v47 = vsel %vm7483_vm9, %v456_v34, %v772_v29  ;;  %v465_v48 = vsel %vm7493_vm10, %v457_v35, %v464_v40  ;;  %918 = vperm.xlu0 %7284, %v358_v38   ;;  %v387_v55 = vld [vmem:[%s11308_s2 + $0xc] sm:$0xf]  ;;  %v390_v56 = vld [vmem:[%s11308_s2 + $0x18] sm:$0xf]  ;;  %v466_v5 = vrot.slane %v7487_v30, 4 }
  0x1e   : > { %v726_v49 = vsel %vm7493_vm10, %v718_v41, %v725_v42  ;;  %774 = vst [vmem:[#allocation2 + $0x8] sm:$0xf] %v773_v47  ;;  %v735_v50 = vsel %vm7493_vm10, %v727_v43, %v734_v45  ;;  %776 = vst.msk [vmem:[#allocation2 + $0xc] sm:$0xf] %vm770_vm7, %v465_v48  ;;  %v389_v57 = vld [vmem:[%s11308_s2 + $0x14] sm:$0xf] }
  0x1f   : > { %v810_v51 = vsel %vm7505_vm11, %v736_v46, %v809_v44  ;;  %805 = vst.msk [vmem:[#allocation2 + $0x80] sm:$0xf] %vm770_vm7, %v726_v49  ;;  %806 = vst.msk [vmem:[#allocation2 + $0x84] sm:$0xf] %vm770_vm7, %v735_v50  ;;  %v392_v58 = vld [vmem:[%s11308_s2 + $0x20] sm:$0xf] }
  0x20   : > { %811 = vst [vmem:[#allocation2 + $0x88] sm:$0x1] %v810_v51  ;;  %1320 = vperm.xlu1 %7285, %v386_v52   ;;  %v391_v59 = vld [vmem:[%s11308_s2 + $0x1c] sm:$0xf]  ;;  %v418_v60 = vld [vmem:[%s7468_s22 + $0x8] sm:$0xf] }
  0x21   : > { %1308 = vperm.xlu0 %7284, %v385_v53   ;;  %v419_v61 = vld [vmem:[%s7468_s22 + $0xc] sm:$0xf]  ;;  %v468_v62 = vshrl.u32 %v418_v60, 16  ;;  %v471_v63 = vshll.u32 %v418_v60, 16  ;;  %v394_v3 = vld [vmem:[%s11308_s2 + $0x28] sm:$0xf] }
  0x22   : > { %v477_v0 = vshrl.u32 %v419_v61, 16  ;;  %v480_v2 = vshll.u32 %v419_v61, 16  ;;  %v393_v4 = vld [vmem:[%s11308_s2 + $0x24] sm:$0xf]  ;;  %v420_v9 = vld [vmem:[%s7468_s22 + $0x10] sm:$0xf] }
  0x23   : > { %v470_v6 = vrot.slane %v468_v62, 7  ;;  %v421_v10 = vld [vmem:[%s7468_s22 + $0x14] sm:$0xf]  ;;  %v486_v11 = vshrl.u32 %v420_v9, 16  ;;  %v489_v12 = vshll.u32 %v420_v9, 16  ;;  %s7361_s25 = smov 16  }
  0x24   : > { %1344 = vperm.xlu1 %7285, %v388_v54   ;;  %v479_v8 = vrot.slane %v477_v0, 7  ;;  %v495_v13 = vshrl.u32 %v421_v10, 16  ;;  %v498_v17 = vshll.u32 %v421_v10, 16  ;;  %v396_v18 = vld [vmem:[%s11308_s2 + $0x30] sm:$0xf]  ;;  %s7362_s26 = smov 12  }
  0x25   : > { %1332 = vperm.xlu0 %7284, %v387_v55   ;;  %v473_v14 = vor.u32 %v471_v63, %v470_v6  ;;  %v475_v15 = vrot.slane %v470_v6, 4  ;;  %v395_v19 = vld [vmem:[%s11308_s2 + $0x2c] sm:$0xf]  ;;  %v488_v23 = vrot.slane %v486_v11, 7  ;;  %v397_v25 = vld [vmem:[%s11308_s2 + $0x34] sm:$0xf] }
  0x26   : > { %v482_v16 = vor.u32 %v480_v2, %v479_v8  ;;  %v484_v20 = vrot.slane %v479_v8, 4  ;;  %v497_v24 = vrot.slane %v495_v13, 7  ;;  %v422_v29 = vld [vmem:[%s7468_s22 + $0x18] sm:$0xf]  ;;  %v359_v30 = vld [vmem:[%s11307_s1 + $0x1c] sm:$0xf] }
  0x27   : > { %v474_v21 = vsel %vm7493_vm10, %v466_v5, %v473_v14  ;;  %v491_v26 = vor.u32 %v489_v12, %v488_v23  ;;  %v493_v27 = vrot.slane %v488_v23, 4  ;;  %v423_v32 = vld [vmem:[%s7468_s22 + $0x1c] sm:$0xf]  ;;  %v424_v34 = vld [vmem:[%s7468_s22 + $0x20] sm:$0xf]  ;;  %v504_v38 = vshrl.u32 %v422_v29, 16 }
  0x28   : > { %1368 = vperm.xlu1 %7285, %v390_v56   ;;  %v483_v22 = vsel %vm7493_vm10, %v475_v15, %v482_v16  ;;  %777 = vst.msk [vmem:[#allocation2 + $0x10] sm:$0xf] %vm770_vm7, %v474_v21  ;;  %v500_v28 = vor.u32 %v498_v17, %v497_v24  ;;  %v425_v37 = vld [vmem:[%s7468_s22 + $0x24] sm:$0xf]  ;;  %v507_v39 = vshll.u32 %v422_v29, 16  ;;  %v513_v41 = vshrl.u32 %v423_v32, 16 }
  0x29   : > { %1356 = vperm.xlu0 %7284, %v389_v57   ;;  %778 = vst.msk [vmem:[#allocation2 + $0x14] sm:$0xf] %vm770_vm7, %v483_v22  ;;  %v492_v35 = vsel %vm7493_vm10, %v484_v20, %v491_v26  ;;  %v360_v40 = vld [vmem:[%s11307_s1 + $0x20] sm:$0xf]  ;;  %v522_v42 = vshrl.u32 %v424_v34, 16  ;;  %v502_v44 = vrot.slane %v497_v24, 4 }
  0x2a   : > { %v501_v36 = vsel %vm7493_vm10, %v493_v27, %v500_v28  ;;  %779 = vst.msk [vmem:[#allocation2 + $0x18] sm:$0xf] %vm770_vm7, %v492_v35  ;;  %v398_v43 = vld [vmem:[%s11308_s2 + $0x38] sm:$0xf]  ;;  %v506_v45 = vrot.slane %v504_v38, 7  ;;  %v516_v46 = vshll.u32 %v423_v32, 16 }
  0x2b   : > { %780 = vst.msk [vmem:[#allocation2 + $0x1c] sm:$0xf] %vm770_vm7, %v501_v36  ;;  %v531_v47 = vshrl.u32 %v425_v37, 16  ;;  %v525_v48 = vshll.u32 %v424_v34, 16  ;;  %v534_v49 = vshll.u32 %v425_v37, 16  ;;  %v515_v53 = vrot.slane %v513_v41, 7 }
  0x2c   : > { %1392 = vperm.xlu1 %7285, %v392_v58   ;;  %v426_v50 = vld [vmem:[%s7468_s22 + $0x28] sm:$0xf]  ;;  %v509_v51 = vor.u32 %v507_v39, %v506_v45  ;;  %v511_v52 = vrot.slane %v506_v45, 4  ;;  %v524_v54 = vrot.slane %v522_v42, 7  ;;  %v399_v56 = vld [vmem:[%s11308_s2 + $0x3c] sm:$0xf] }
  0x2d   : > { %1380 = vperm.xlu0 %7284, %v391_v59   ;;  %v533_v55 = vrot.slane %v531_v47, 7  ;;  %v361_v57 = vld [vmem:[%s11307_s1 + $0x24] sm:$0xf]  ;;  %v518_v59 = vor.u32 %v516_v46, %v515_v53  ;;  %v520_v60 = vrot.slane %v515_v53, 4  ;;  %v540_v61 = vshrl.u32 %v426_v50, 16  ;;  %s7363_s12 = smov 8  }
  0x2e   : > { %v510_v58 = vsel %vm7493_vm10, %v502_v44, %v509_v51  ;;  %v527_v62 = vor.u32 %v525_v48, %v524_v54  ;;  %v362_v0 = vld [vmem:[%s11307_s1 + $0x28] sm:$0xf]  ;;  %v529_v5 = vrot.slane %v524_v54, 4  ;;  %v427_v6 = vld [vmem:[%s7468_s22 + $0x2c] sm:$0xf]  ;;  %v543_v13 = vshll.u32 %v426_v50, 16 }
  0x2f   : > { %781 = vst.msk [vmem:[#allocation2 + $0x20] sm:$0xf] %vm770_vm7, %v510_v58  ;;  %v536_v63 = vor.u32 %v534_v49, %v533_v55  ;;  %v519_v2 = vsel %vm7493_vm10, %v511_v52, %v518_v59  ;;  %v542_v8 = vrot.slane %v540_v61, 7  ;;  %v428_v9 = vld [vmem:[%s7468_s22 + $0x30] sm:$0xf]  ;;  %v538_v12 = vrot.slane %v533_v55, 4 }
  0x30   : > { %1416 = vperm.xlu1 %7285, %v394_v3   ;;  %v400_v3 = vld [vmem:[%s11308_s2 + $0x40] sm:$0xf]  ;;  %782 = vst.msk [vmem:[#allocation2 + $0x24] sm:$0xf] %vm770_vm7, %v519_v2  ;;  %v429_v10 = vld [vmem:[%s7468_s22 + $0x34] sm:$0xf] }
  0x31   : > { %1404 = vperm.xlu0 %7284, %v393_v4   ;;  %v528_v4 = vsel %vm7493_vm10, %v520_v60, %v527_v62  ;;  %v537_v11 = vsel %vm7493_vm10, %v529_v5, %v536_v63  ;;  %v401_v14 = vld [vmem:[%s11308_s2 + $0x44] sm:$0xf]  ;;  %v549_v15 = vshrl.u32 %v427_v6, 16  ;;  %v552_v16 = vshll.u32 %v427_v6, 16  ;;  %v430_v17 = vld [vmem:[%s7468_s22 + $0x38] sm:$0xf] }
  0x32   : > { %783 = vst.msk [vmem:[#allocation2 + $0x28] sm:$0xf] %vm770_vm7, %v528_v4  ;;  %784 = vst.msk [vmem:[#allocation2 + $0x2c] sm:$0xf] %vm770_vm7, %v537_v11  ;;  %v561_v20 = vshll.u32 %v428_v9, 16  ;;  %v567_v21 = vshrl.u32 %v429_v10, 16 }
  0x33   : > { %v363_v22 = vld [vmem:[%s11307_s1 + $0x2c] sm:$0xf]  ;;  %v547_v23 = vrot.slane %v542_v8, 4  ;;  %v551_v24 = vrot.slane %v549_v15, 7  ;;  %v576_v29 = vshrl.u32 %v430_v17, 16  ;;  %v579_v37 = vshll.u32 %v430_v17, 16 }
  0x34   : > { %1440 = vperm.xlu1 %7285, %v396_v18   ;;  %v545_v18 = vor.u32 %v543_v13, %v542_v8  ;;  %v569_v28 = vrot.slane %v567_v21, 7  ;;  %v431_v36 = vld [vmem:[%s7468_s22 + $0x3c] sm:$0xf]  ;;  %v364_v38 = vld [vmem:[%s11307_s1 + $0x30] sm:$0xf]  ;;  %vm1710_vm13 = vcmask 1040384  }
  0x35   : > { %1428 = vperm.xlu0 %7284, %v395_v19   ;;  %v558_v19 = vshrl.u32 %v428_v9, 16  ;;  %v556_v32 = vrot.slane %v551_v24, 4  ;;  %v402_v39 = vld [vmem:[%s11308_s2 + $0x48] sm:$0xf]  ;;  %v578_v44 = vrot.slane %v576_v29, 7  ;;  %v585_v46 = vshrl.u32 %v431_v36, 16 }
  0x36   : > { %v546_v26 = vsel %vm7493_vm10, %v538_v12, %v545_v18  ;;  %v432_v47 = vld [vmem:[%s7468_s22 + $0x40] sm:$0xf]  ;;  %v403_v48 = vld [vmem:[%s11308_s2 + $0x4c] sm:$0xf]  ;;  %v365_v49 = vld [vmem:[%s11307_s1 + $0x34] sm:$0xf] }
  0x37   : > { %v560_v27 = vrot.slane %v558_v19, 7  ;;  %785 = vst.msk [vmem:[#allocation2 + $0x30] sm:$0xf] %vm770_vm7, %v546_v26  ;;  %v581_v50 = vor.u32 %v579_v37, %v578_v44  ;;  %v583_v51 = vrot.slane %v578_v44, 4  ;;  %v587_v52 = vrot.slane %v585_v46, 7  ;;  %s7364_s13 = smov 20  }
  0x38   : > { %1452 = vperm.xlu1 %7285, %v397_v25   ;;  %v570_v25 = vshll.u32 %v429_v10, 16  ;;  %v588_v53 = vshll.u32 %v431_v36, 16  ;;  %v594_v55 = vshrl.u32 %v432_v47, 16  ;;  %v597_v58 = vshll.u32 %v432_v47, 16  ;;  %v366_v62 = vld [vmem:[%s11307_s1 + $0x38] sm:$0xf] }
  0x39   : > { %930 = vperm.xlu0 %7284, %v359_v30   ;;  %v554_v30 = vor.u32 %v552_v16, %v551_v24  ;;  %v563_v34 = vor.u32 %v561_v20, %v560_v27  ;;  %v565_v35 = vrot.slane %v560_v27, 4  ;;  %v592_v59 = vrot.slane %v587_v52, 4  ;;  %v404_v63 = vld [vmem:[%s11308_s2 + $0x50] sm:$0xf]  ;;  %v434_v5 = vld [vmem:[%s7468_s22 + $0x48] sm:$0xf] }
  0x3a   : > { %v572_v41 = vor.u32 %v570_v25, %v569_v28  ;;  %v596_v60 = vrot.slane %v594_v55, 7  ;;  %v612_v10 = vshrl.u32 %v434_v5, 16  ;;  %v405_v11 = vld [vmem:[%s11308_s2 + $0x54] sm:$0xf]  ;;  %v367_v12 = vld [vmem:[%s11307_s1 + $0x3c] sm:$0xf] }
  0x3b   : > { %v564_v42 = vsel %vm7493_vm10, %v556_v32, %v563_v34  ;;  %v615_v15 = vshll.u32 %v434_v5, 16  ;;  %v435_v16 = vld [vmem:[%s7468_s22 + $0x4c] sm:$0xf]  ;;  %v368_v20 = vld [vmem:[%s11307_s1 + $0x40] sm:$0xf]  ;;  %vm1711_vm14 = vcmask 1044484  }
  0x3c   : > { %942 = vperm.xlu1 %7285, %v360_v40   ;;  %v555_v40 = vsel %vm7493_vm10, %v547_v23, %v554_v30  ;;  %v573_v45 = vsel %vm7493_vm10, %v565_v35, %v572_v41  ;;  %787 = vst.msk [vmem:[#allocation2 + $0x38] sm:$0xf] %vm770_vm7, %v564_v42  ;;  %v599_v2 = vor.u32 %v597_v58, %v596_v60  ;;  %v601_v8 = vrot.slane %v596_v60, 4  ;;  %v406_v21 = vld [vmem:[%s11308_s2 + $0x58] sm:$0xf]  ;;  %vm7884_vm15 = vmor %vm1710_vm13, %vm1711_vm14  ;;  %s7365_s14 = smov 24  }
  0x3d   : > { %1464 = vperm.xlu0 %7284, %v398_v43   ;;  %786 = vst.msk [vmem:[#allocation2 + $0x34] sm:$0xf] %vm770_vm7, %v555_v40  ;;  %v574_v43 = vrot.slane %v569_v28, 4  ;;  %788 = vst.msk [vmem:[#allocation2 + $0x3c] sm:$0xf] %vm770_vm7, %v573_v45  ;;  %v621_v19 = vshrl.u32 %v435_v16, 16 }
  0x3e   : > { %v600_v6 = vsel %vm7493_vm10, %v592_v59, %v599_v2  ;;  %v624_v24 = vshll.u32 %v435_v16, 16  ;;  %v407_v27 = vld [vmem:[%s11308_s2 + $0x5c] sm:$0xf]  ;;  %v369_v28 = vld [vmem:[%s11307_s1 + $0x44] sm:$0xf]  ;;  %vm2453_vm0 = vcmask 1046528  }
  0x3f   : > { %v582_v54 = vsel %vm7493_vm10, %v574_v43, %v581_v50  ;;  %791 = vst.msk [vmem:[#allocation2 + $0x48] sm:$0xf] %vm770_vm7, %v600_v6  ;;  %v623_v23 = vrot.slane %v621_v19, 7  ;;  %v436_v30 = vld [vmem:[%s7468_s22 + $0x50] sm:$0xf]  ;;  %s7366_s15 = smov 28  }
  0x40   : > { %1476 = vperm.xlu1 %7285, %v399_v56   ;;  %v590_v56 = vor.u32 %v588_v53, %v587_v52  ;;  %789 = vst.msk [vmem:[#allocation2 + $0x40] sm:$0xf] %vm770_vm7, %v582_v54  ;;  %v630_v32 = vshrl.u32 %v436_v30, 16  ;;  %v370_v34 = vld [vmem:[%s11307_s1 + $0x48] sm:$0xf]  ;;  %v633_v37 = vshll.u32 %v436_v30, 16 }
  0x41   : > { %954 = vperm.xlu0 %7284, %v361_v57   ;;  %v433_v57 = vld [vmem:[%s7468_s22 + $0x44] sm:$0xf]  ;;  %v626_v26 = vor.u32 %v624_v24, %v623_v23  ;;  %v408_v35 = vld [vmem:[%s11308_s2 + $0x60] sm:$0xf]  ;;  %v371_v43 = vld [vmem:[%s11307_s1 + $0x4c] sm:$0xf] }
  0x42   : > { %v603_v61 = vshrl.u32 %v433_v57, 16  ;;  %v606_v4 = vshll.u32 %v433_v57, 16  ;;  %v632_v36 = vrot.slane %v630_v32, 7  ;;  %v409_v42 = vld [vmem:[%s11308_s2 + $0x64] sm:$0xf]  ;;  %s7367_s16 = smov 32  }
  0x43   : > { %v410_v50 = vld [vmem:[%s11308_s2 + $0x68] sm:$0xf]  ;;  %v411_v52 = vld [vmem:[%s11308_s2 + $0x6c] sm:$0xf]  ;;  %v373_v53 = vld [vmem:[%s11307_s1 + $0x54] sm:$0xf] }
  0x44   : > { %966 = vperm.xlu1 %7285, %v362_v0   ;;  %v591_v0 = vsel %vm7493_vm10, %v583_v51, %v590_v56  ;;  %v635_v40 = vor.u32 %v633_v37, %v632_v36  ;;  %v637_v47 = vrot.slane %v632_v36, 4  ;;  %v374_v54 = vld [vmem:[%s11307_s1 + $0x58] sm:$0xf]  ;;  %v412_v55 = vld [vmem:[%s11308_s2 + $0x70] sm:$0xf]  ;;  %vm3672_vm1 = vcmask 1041408  }
  0x45   : > { %1488 = vperm.xlu0 %7284, %v400_v3   ;;  %790 = vst.msk [vmem:[#allocation2 + $0x44] sm:$0xf] %vm770_vm7, %v591_v0  ;;  %v605_v3 = vrot.slane %v603_v61, 7  ;;  %v413_v56 = vld [vmem:[%s11308_s2 + $0x74] sm:$0xf]  ;;  %vm3339_vm4 = vcmask 31744  }
  0x46   : > { %v375_v57 = vld [vmem:[%s11307_s1 + $0x5c] sm:$0xf]  ;;  %v7746_v58 = vld [vmem:[#allocation2 + $0x8] sm:$0xf]  ;;  %v7748_v59 = vld [vmem:[#allocation2 + $0xc] sm:$0xf] }
  0x47   : > { %v608_v9 = vor.u32 %v606_v4, %v605_v3  ;;  %v610_v17 = vrot.slane %v605_v3, 4  ;;  %v1260_v60 = vld [vmem:[#allocation2] sm:$0xf]  ;;  %v7750_v61 = vld [vmem:[#allocation2 + $0x4] sm:$0xf]  ;;  %v6726_v3 = vcombine.low %v7746_v58, %v7748_v59  ;;  %vm3388_vm6 = vcmask 64512  }
  0x48   : > { %1500 = vperm.xlu1 %7285, %v401_v14   ;;  %v614_v14 = vrot.slane %v612_v10, 7  ;;  %v378_v0 = vld [vmem:[%s11307_s1 + $0x68] sm:$0xf]  ;;  %v377_v2 = vld [vmem:[%s11307_s1 + $0x64] sm:$0xf]  ;;  %v6725_v4 = vcombine.low %v1260_v60, %v7750_v61  ;;  %vm3454_vm8 = vcmask 130048  }
  0x49   : > { %978 = vperm.xlu0 %7284, %v363_v22   ;;  %v609_v13 = vsel %vm7493_vm10, %v601_v8, %v608_v9  ;;  %v7767_v5 = vld [vmem:[#allocation2 + $0x10] sm:$0xf]  ;;  %v7769_v6 = vld [vmem:[#allocation2 + $0x8] sm:$0xf]  ;;  %v7771_v8 = vld [vmem:[#allocation2 + $0xc] sm:$0xf] }
  0x4a   : > { %792 = vst.msk [vmem:[#allocation2 + $0x4c] sm:$0xf] %vm770_vm7, %v609_v13  ;;  %v617_v18 = vor.u32 %v615_v15, %v614_v14  ;;  %v619_v25 = vrot.slane %v614_v14, 4  ;;  %v7773_v9 = vld [vmem:[#allocation2 + $0x14] sm:$0xf]  ;;  %v2209_v13 = vshll.u32 %v6725_v4, 16  ;;  %v6775_v16 = vcombine.low %v7769_v6, %v7771_v8 }
  0x4b   : > { %v7775_v10 = vld [vmem:[#allocation2 + $0x10] sm:$0xf]  ;;  %v7781_v14 = vcombine.low %v7767_v5, %v7773_v9  ;;  %v7793_v19 = vld [vmem:[#allocation2 + $0x18] sm:$0xf]  ;;  %v7359_v32 = vmov 839922192  }
  0x4c   : > { %990 = vperm.xlu1 %7285, %v364_v38   ;;  %v618_v22 = vsel %vm7493_vm10, %v610_v17, %v617_v18  ;;  %v627_v29 = vsel %vm7493_vm10, %v619_v25, %v626_v26  ;;  %v437_v38 = vld [vmem:[%s7468_s22 + $0x54] sm:$0xf]  ;;  %v415_v17 = vld [vmem:[%s11308_s2 + $0x7c] sm:$0xf]  ;;  %v379_v18 = vld [vmem:[%s11307_s1 + $0x6c] sm:$0xf] }
  0x4d   : > { %1512 = vperm.xlu0 %7284, %v402_v39   ;;  %793 = vst.msk [vmem:[#allocation2 + $0x50] sm:$0xf] %vm770_vm7, %v618_v22  ;;  %794 = vst.msk [vmem:[#allocation2 + $0x54] sm:$0xf] %vm770_vm7, %v627_v29  ;;  %v628_v39 = vrot.slane %v623_v23, 4  ;;  %v639_v41 = vshrl.u32 %v437_v38, 16 }
  0x4e   : > { %v642_v46 = vshll.u32 %v437_v38, 16  ;;  %v2218_v22 = vshrl.u32 %v6726_v3, 16  ;;  %v2207_v23 = vshrl.u32 %v6725_v4, 16  ;;  %v2211_v24 = vrot.slane %v2209_v13, 1  ;;  %v380_v29 = vld [vmem:[%s11307_s1 + $0x70] sm:$0xf] }
  0x4f   : > { %v636_v44 = vsel %vm7493_vm10, %v628_v39, %v635_v40  ;;  %v7715_v45 = vrot.slane %v639_v41, 7  ;;  %v2222_v25 = vshll.u32 %v7781_v14, 16  ;;  %vm2205_vm12 = vsmask.f32 7424  ;;  %v438_v36 = vld [vmem:[%s7468_s22 + $0x58] sm:$0xf] }
  0x50   : > { %1524 = vperm.xlu1 %7285, %v403_v48   ;;  %795 = vst.msk [vmem:[#allocation2 + $0x58] sm:$0xf] %vm770_vm7, %v636_v44  ;;  %v2212_v38 = vor.u32 %v2211_v24, %v2207_v23  ;;  %v2715_v39 = vshrl.u32 %v6775_v16, 16  ;;  %v648_v40 = vshrl.u32 %v438_v36, 16  ;;  %v383_v41 = vld [vmem:[%s11307_s1 + $0x7c] sm:$0xf] }
  0x51   : > { %1002 = vperm.xlu0 %7284, %v365_v49   ;;  %v644_v48 = vor.u32 %v642_v46, %v7715_v45  ;;  %v372_v49 = vld [vmem:[%s11307_s1 + $0x50] sm:$0xf]  ;;  %vm3487_vm9 = vcmask 162816   ;;  %vm3520_vm11 = vcmask 195584   ;;  %vm3553_vm13 = vcmask 228352  }
  0x52   : > { %vm3586_vm14 = vcmask 261120  }
  0x53   : > { %v645_v51 = vsel %vm7493_vm10, %v637_v47, %v644_v48  ;;  %v382_v47 = vld [vmem:[%s11307_s1 + $0x78] sm:$0xf] }
  0x54   : > { %1014 = vperm.xlu1 %7285, %v366_v62   ;;  %796 = vst.msk [vmem:[#allocation2 + $0x5c] sm:$0xf] %vm770_vm7, %v645_v51  ;;  %v376_v62 = vld [vmem:[%s11307_s1 + $0x60] sm:$0xf] }
  0x55   : > { %1536 = vperm.xlu0 %7284, %v404_v63   ;;  %v414_v63 = vld [vmem:[%s11308_s2 + $0x78] sm:$0xf] }
  0x58   : > { %1548 = vperm.xlu1 %7285, %v405_v11   ;;  %v7777_v11 = vld [vmem:[#allocation2 + $0x14] sm:$0xf] }
  0x59   : > { %1026 = vperm.xlu0 %7284, %v367_v12   ;;  %v2214_v12 = vshll.u32 %v6726_v3, 16  ;;  %v6776_v15 = vcombine.low %v7775_v10, %v7777_v11 }
  0x5b   : > { %v2722_v26 = vshll.u32 %v6776_v15, 16  ;;  %v2726_v44 = vshrl.u32 %v6776_v15, 16 }
  0x5c   : > { %1038 = vperm.xlu1 %7285, %v368_v20   ;;  %v7795_v20 = vld [vmem:[#allocation2 + $0x1c] sm:$0xf] }
  0x5d   : > { %1560 = vperm.xlu0 %7284, %v406_v21   ;;  %v2216_v21 = vrot.slane %v2214_v12, 1  ;;  %v7806_v30 = vcombine.low %v7793_v19, %v7795_v20 }
  0x5f   : > { %v2220_v37 = vor.u32 %v2218_v22, %v2216_v21  ;;  %v2730_v48 = vshll.u32 %v7806_v30, 16 }
  0x60   : > { %1572 = vperm.xlu1 %7285, %v407_v27   ;;  %v2717_v27 = vshll.u32 %v6775_v16, 16 }
  0x61   : > { %1050 = vperm.xlu0 %7284, %v369_v28   ;;  %v381_v28 = vld [vmem:[%s11307_s1 + $0x74] sm:$0xf] }
  0x62   : > { %v2719_v46 = vrot.slane %v2717_v27, 1 }
  0x64   : > { %1062 = vperm.xlu1 %7285, %v370_v34   ;;  %v850_v34 = vunpack.c.l.s4 %v7359_v32 }
  0x65   : > { %1584 = vperm.xlu0 %7284, %v408_v35   ;;  %v852_v35 = vlaneseq }
  0x66   : > { %v851_v51 = vunpack.c.0.s8 %v850_v34 }
  0x68   : > { %1596 = vperm.xlu1 %7285, %v409_v42   ;;  %v7812_v42 = vrot.slane %v2222_v25, 1 }
  0x69   : > { %1074 = vperm.xlu0 %7284, %v371_v43   ;;  %v2724_v43 = vrot.slane %v2722_v26, 1 }
  0x6a   : > { %v2225_v60 = vsel %vm2205_vm12, %v2220_v37, %v7812_v42  ;;  %v441_v37 = vld [vmem:[%s7468_s22 + $0x64] sm:$0xf] }
  0x6c   : > { %1086 = vperm.xlu1 %7285, %v372_v49   ;;  %v650_v49 = vrot.slane %v648_v40, 7 }
  0x6d   : > { %1608 = vperm.xlu0 %7284, %v410_v50   ;;  %v651_v50 = vshll.u32 %v438_v36, 16 }
  0x6e   : > { %v655_v16 = vrot.slane %v650_v49, 4 }
  0x70   : > { %1620 = vperm.xlu1 %7285, %v411_v52   ;;  %v853_v52 = vshrl.u32 %v852_v35, 7 }
  0x71   : > { %1098 = vperm.xlu0 %7284, %v373_v53   ;;  %v439_v53 = vld [vmem:[%s7468_s22 + $0x5c] sm:$0xf] }
  0x72   : > { %v660_v4 = vshll.u32 %v439_v53, 16  ;;  %v7827_v12 = vsub.s32 %v851_v51, %v853_v52  ;;  %v678_v51 = vshll.u32 %v441_v37, 16 }
  0x74   : > { %1110 = vperm.xlu1 %7285, %v374_v54   ;;  %v2217_v54 = vsel %vm2205_vm12, %v2212_v38, %v2216_v21 }
  0x75   : > { %1632 = vperm.xlu0 %7284, %v412_v55   ;;  %v646_v55 = vrot.slane %v7715_v45, 4  ;;  %v440_v45 = vld [vmem:[%s7468_s22 + $0x60] sm:$0xf] }
  0x76   : > { %v669_v25 = vshll.u32 %v440_v45, 16 }
  0x78   : > { %1644 = vperm.xlu1 %7285, %v413_v56   ;;  %v653_v56 = vor.u32 %v651_v50, %v650_v49  ;;  %v675_v49 = vshrl.u32 %v441_v37, 16 }
  0x79   : > { %1122 = vperm.xlu0 %7284, %v375_v57   ;;  %v657_v57 = vshrl.u32 %v439_v53, 16 }
  0x7a   : > { %v7877_v53 = vrot.slane %v675_v49, 7 }
  0x7b   : > { %v659_v3 = vrot.slane %v657_v57, 7 }
  0x7c   : > { %1134 = vperm.xlu1 %7285, %v376_v62   ;;  %v2728_v62 = vor.u32 %v2726_v44, %v2724_v43 }
  0x7d   : > { %1656 = vperm.xlu0 %7284, %v414_v63   ;;  %v2720_v63 = vor.u32 %v2719_v46, %v2715_v39  ;;  %v664_v35 = vrot.slane %v659_v3, 4 }
  0x7f   : > { %v2725_v21 = vsel %vm2205_vm12, %v2720_v63, %v2724_v43 }
  0x80   : > { %1158 = vperm.xlu1 %7285, %v378_v0   ;;  %v7823_v0 = vrot.slane %v2730_v48, 1 }
  0x81   : > { %1146 = vperm.xlu0 %7284, %v377_v2   ;;  %v654_v2 = vsel %vm7493_vm10, %v646_v55, %v653_v56 }
  0x82   : > { %797 = vst.msk [vmem:[#allocation2 + $0x60] sm:$0xf] %vm770_vm7, %v654_v2  ;;  %v7836_v22 = vsel %vm2205_vm12, %v2728_v62, %v7823_v0 }
  0x84   : > { %1668 = vperm.xlu1 %7285, %v415_v17   ;;  %v662_v17 = vor.u32 %v660_v4, %v659_v3 }
  0x85   : > { %1170 = vperm.xlu0 %7284, %v379_v18   ;;  %v666_v18 = vshrl.u32 %v440_v45, 16 }
  0x86   : > { %v663_v23 = vsel %vm7493_vm10, %v655_v16, %v662_v17 }
  0x87   : > { %v668_v24 = vrot.slane %v666_v18, 7  ;;  %798 = vst.msk [vmem:[#allocation2 + $0x64] sm:$0xf] %vm770_vm7, %v663_v23 }
  0x88   : > { %1194 = vperm.xlu1 %7285, %v381_v28  }
  0x89   : > { %1182 = vperm.xlu0 %7284, %v380_v29   ;;  %v671_v36 = vor.u32 %v669_v25, %v668_v24  ;;  %v673_v57 = vrot.slane %v668_v24, 4  ;;  %v1293_v25 = vld [vmem:[#allocation2] sm:$0xe] }
  0x8b   : > { %v672_v46 = vsel %vm7493_vm10, %v664_v35, %v671_v36 }
  0x8c   : > { %1218 = vperm.xlu1 %7285, %v383_v41   ;;  %799 = vst.msk [vmem:[#allocation2 + $0x68] sm:$0xf] %vm770_vm7, %v672_v46 }
  0x8d   : > { %1206 = vperm.xlu0 %7284, %v382_v47  }
  0x8f   : > { %v871_v13 = vpop.permute.xlu1 %870 }
  0x90   : > { %v847_v15 = vpop.permute.xlu0 %846  ;;  %2340 = vrot.lane.b32.xlu1 %v2225_v60, %s7360_s24  ;;  %v7841_v26 = vrot.slane %v871_v13, %v7827_v12  ;;  %v680_v60 = vor.u32 %v678_v51, %v7877_v53 }
  0x91   : > { %2338 = vrot.lane.b32.xlu0 %v2217_v54, %s7360_s24  ;;  %v7844_v27 = vrot.slane %v847_v15, %v7827_v12 }
  0x92   : > { %11489 = vst [vmem:[#allocation7_spill] sm:$0xff] %v7841_v26  ;;  %v1908_v38 = vmul.bf16 %v7775_v10, %v7841_v26  ;;  %v681_v16 = vsel %vm7493_vm10, %v673_v57, %v680_v60 }
  0x93   : > { %11490 = vst [vmem:[#allocation8_spill] sm:$0xff] %v7844_v27  ;;  %v883_v28 = vpop.permute.xlu1 %882  ;;  %v1906_v40 = vmul.bf16 %v7769_v6, %v7844_v27  ;;  %800 = vst.msk [vmem:[#allocation2 + $0x6c] sm:$0xf] %vm770_vm7, %v681_v16 }
  0x94   : > { %v859_v29 = vpop.permute.xlu0 %858  ;;  %v7848_v32 = vrot.slane %v883_v28, %v7827_v12  ;;  %2848 = vrot.lane.b32.xlu1 %v7836_v22, %s7361_s25 }
  0x95   : > { %v7851_v34 = vrot.slane %v859_v29, %v7827_v12  ;;  %2846 = vrot.lane.b32.xlu0 %v2725_v21, %s7361_s25 }
  0x96   : > { %11491 = vst [vmem:[#allocation9_spill] sm:$0xff] %v7848_v32  ;;  %v1909_v39 = vmul.bf16 %v7777_v11, %v7848_v32 }
  0x97   : > { %11492 = vst [vmem:[#allocation10_spill] sm:$0xff] %v7851_v34  ;;  %v1907_v41 = vmul.bf16 %v7771_v8, %v7851_v34  ;;  %v7865_v43 = vpop.permute.xlu1 %906 }
  0x98   : > { %v7867_v44 = vpop.permute.xlu0 %894  ;;  %v6760_v47 = vcombine.low %v1908_v38, %v1909_v39 }
  0x99   : > { %v6759_v48 = vcombine.low %v1906_v40, %v1907_v41 }
  0x9a   : > { %2601 = vrot.lane.b32.xlu1 %v6760_v47, %s7362_s26  ;;  %v1939_v47 = vld [vmem:[#allocation2 + $0x8] sm:$0xe] }
  0x9b   : > { %2599 = vrot.lane.b32.xlu0 %v6759_v48, %s7362_s26  ;;  %v1297_v6 = vpop.permute.xlu1 %1296 }
  0x9c   : > { %v7874_v50 = vpop.permute.xlu0 %918  ;;  %v1305_v52 = vrot.slane %v1297_v6, %v7827_v12 }
  0x9e   : > { %v7879_v54 = vrot.slane %v1305_v52, 7 }
  0x9f   : > { %v1321_v55 = vpop.permute.xlu1 %1320 }
  0xa0   : > { %11493 = vst [vmem:[#allocation11_spill] sm:$0xff] %v7879_v54  ;;  %v1309_v56 = vpop.permute.xlu0 %1308  ;;  %v1329_v62 = vrot.slane %v1321_v55, %v7827_v12  ;;  %v1714_v3 = vrot.slane %v7879_v54, 4  ;;  %v1841_v46 = vmul.bf16 %v7879_v54, %v1293_v25 }
  0xa1   : > { %v1317_v63 = vrot.slane %v1309_v56, %v7827_v12 }
  0xa2   : > { %v1718_v45 = vrot.slane %v1329_v62, 7 }
  0xa3   : > { %v1715_v4 = vrot.slane %v1317_v63, 7  ;;  %v1345_v13 = vpop.permute.xlu1 %1344 }
  0xa4   : > { %v1333_v15 = vpop.permute.xlu0 %1332  ;;  %v1353_v21 = vrot.slane %v1345_v13, %v7827_v12  ;;  %v1720_v28 = vrot.slane %v1718_v45, 4  ;;  %v7307_v13 = vld [vmem:[%s11309_s3] sm:$0xff]  }
  0xa5   : > { %v7893_v17 = vsel %vm7884_vm15, %v1714_v3, %v1715_v4  ;;  %v1717_v18 = vrot.slane %v1715_v4, 4  ;;  %v1341_v23 = vrot.slane %v1333_v15, %v7827_v12  ;;  %7180 = vmatprep.subr.bf16.mxu0 %v7307_v13 }
  0xa6   : > { %11496 = vst [vmem:[#allocation12_spill] sm:$0xff] %v7893_v17  ;;  %v1724_v24 = vrot.slane %v1353_v21, 7  ;;  %v1842_v37 = vmul.bf16 %v7893_v17, %v7750_v61  ;;  %v1941_v48 = vmul.bf16 %v7771_v8, %v7893_v17  ;;  %7181 = vmatpush3.bf16.msra.mxu0 %v7307_v13  ;;  %v7993_v13 = vld [vmem:[#allocation2 + $0x20] sm:$0xf] }
  0xa7   : > { %v1721_v29 = vrot.slane %v1341_v23, 7  ;;  %v7898_v35 = vpop.permute.xlu1 %1368  ;;  %v7904_v38 = vsel %vm7884_vm15, %v1717_v18, %v1718_v45  ;;  %v7940_v45 = vld [vmem:[#allocation2 + $0x1c] sm:$0xf]  ;;  %v2734_v18 = vshrl.u32 %v7806_v30, 16 }
  0xa8   : > { %v1357_v36 = vpop.permute.xlu0 %1356  ;;  %11497 = vst [vmem:[#allocation13_spill] sm:$0xff] %v7904_v38  ;;  %v1726_v49 = vrot.slane %v1724_v24, 4  ;;  %v1843_v57 = vmul.bf16 %v7904_v38, %v7746_v58  ;;  %v6742_v60 = vcombine.low %v1841_v46, %v1842_v37  ;;  %v1942_v62 = vmul.bf16 %v7775_v10, %v7904_v38  ;;  %v7938_v58 = vld [vmem:[#allocation2 + $0x18] sm:$0xf] }
  0xa9   : > { %v1365_v39 = vrot.slane %v1357_v36, %v7827_v12  ;;  %v7909_v40 = vsel %vm7884_vm15, %v1720_v28, %v1721_v29  ;;  %v1723_v41 = vrot.slane %v1721_v29, 4  ;;  %v7948_v21 = vcombine.low %v7938_v58, %v7940_v45  ;;  %v7956_v29 = vld [vmem:[#allocation2 + $0x20] sm:$0xf]  ;;  %v7958_v36 = vld [vmem:[#allocation2 + $0x24] sm:$0xf] }
  0xaa   : > { %11498 = vst [vmem:[#allocation14_spill] sm:$0xff] %v7909_v40  ;;  %v1844_v61 = vmul.bf16 %v7909_v40, %v7748_v59  ;;  %v1943_v51 = vmul.bf16 %v7777_v11, %v7909_v40  ;;  %v1940_v59 = vmul.bf16 %v1939_v47, %v7879_v54  ;;  %v1377_v30 = vrot.slane %v7898_v35, %v7827_v12 }
  0xab   : > { %v7914_v6 = vrot.slane %v1365_v39, 7  ;;  %v7922_v52 = vsel %vm7884_vm15, %v1723_v41, %v1724_v24  ;;  %v1393_v55 = vpop.permute.xlu1 %1392  ;;  %v7966_v39 = vcombine.low %v7956_v29, %v7958_v36 }
  0xac   : > { %11499 = vst [vmem:[#allocation15_spill] sm:$0xff] %v7922_v52  ;;  %v1381_v56 = vpop.permute.xlu0 %1380  ;;  %v6743_v63 = vcombine.low %v1843_v57, %v1844_v61  ;;  %v1845_v3 = vmul.bf16 %v7922_v52, %v7767_v5  ;;  %v6792_v15 = vcombine.low %v1940_v59, %v1941_v48  ;;  %v6793_v16 = vcombine.low %v1942_v62, %v1943_v51  ;;  %v7308_v48 = vld [vmem:[%s11309_s3 + $0x8] sm:$0xff]  }
  0xad   : > { %v7929_v8 = vsel %vm7884_vm15, %v1726_v49, %v7914_v6  ;;  %v1944_v37 = vmul.bf16 %v7793_v19, %v7922_v52  ;;  %v1401_v49 = vrot.slane %v1393_v55, %v7827_v12  ;;  %v1389_v35 = vrot.slane %v1381_v56, %v7827_v12  ;;  %7182 = vmatprep.subr.bf16.mxu0 %v7308_v48 }
  0xae   : > { %11500 = vst [vmem:[#allocation16_spill] sm:$0xff] %v7929_v8  ;;  %v1846_v4 = vmul.bf16 %v7929_v8, %v7773_v9  ;;  %v2454_v9 = vrot.slane %v6742_v60, 1  ;;  %v2455_v24 = vrot.slane %v6743_v63, 1  ;;  %v1945_v28 = vmul.bf16 %v7795_v20, %v7929_v8  ;;  %7183 = vmatpush3.bf16.msra.mxu0 %v7308_v48 }
  0xaf   : > { %v7950_v5 = vpop.permute.xlu1 %1416  ;;  %v2962_v47 = vrot.slane %v6793_v16, 1  ;;  %v2736_v51 = vor.u32 %v2734_v18, %v7823_v0  ;;  %v2961_v62 = vrot.slane %v6792_v15, 1  ;;  %v2226_v55 = vshrl.u32 %v7781_v14, 16  ;;  %v7995_v16 = vld [vmem:[#allocation2 + $0x24] sm:$0xf] }
  0xb0   : > { %v1405_v23 = vpop.permute.xlu0 %1404  ;;  %v7952_v25 = vcombine.low %v1845_v3, %v1846_v4  ;;  %v2456_v41 = vsel %vm2453_vm0, %v2454_v9, %v2455_v24  ;;  %v7976_v61 = vcombine.low %v1944_v37, %v1945_v28  ;;  %v2230_v56 = vshll.u32 %v7948_v21, 16  ;;  %v2008_v37 = vld [vmem:[#allocation2 + $0x10] sm:$0xe] }
  0xb1   : > { %2487 = vrot.lane.b32.xlu0 %v2456_v41, %s7363_s12  ;;  %v1730_v63 = vrot.slane %v1377_v30, 7  ;;  %v1413_v3 = vrot.slane %v1405_v23, %v7827_v12  ;;  %v1976_v0 = vmul.bf16 %v7777_v11, %v7851_v34  ;;  %v2738_v4 = vshll.u32 %v7966_v39, 16 }
  0xb2   : > { %v11316_v46 = vrot.slane %v7952_v25, 1  ;;  %v2963_v14 = vsel %vm2453_vm0, %v2961_v62, %v2962_v47  ;;  %v11320_v15 = vrot.slane %v7976_v61, 1  ;;  %v2012_v18 = vmul.bf16 %v7795_v20, %v7909_v40 }
  0xb3   : > { %v7979_v57 = vpop.permute.xlu1 %1440  ;;  %v8003_v23 = vcombine.low %v7993_v13, %v7995_v16  ;;  %v1736_v9 = vrot.slane %v1401_v49, 7  ;;  %v1975_v28 = vmul.bf16 %v7775_v10, %v7844_v27  ;;  %v1978_v30 = vmul.bf16 %v7795_v20, %v7848_v32 }
  0xb4   : > { %v7981_v60 = vpop.permute.xlu0 %1428  ;;  %v2458_v59 = vsel %vm2453_vm0, %v2455_v24, %v11316_v46  ;;  %v1733_v24 = vrot.slane %v1389_v35, 7  ;;  %v1977_v49 = vmul.bf16 %v7793_v19, %v7841_v26  ;;  %v2010_v35 = vmul.bf16 %v7777_v11, %v7893_v17 }
  0xb5   : > { %2489 = vrot.lane.b32.xlu1 %v2458_v59, %s7363_s12  ;;  %2994 = vrot.lane.b32.xlu0 %v2963_v14, %s7364_s13  ;;  %v2965_v59 = vsel %vm2453_vm0, %v2962_v47, %v11320_v15  ;;  %v2011_v10 = vmul.bf16 %v7793_v19, %v7904_v38  ;;  %v1732_v62 = vrot.slane %v1730_v63, 4  ;;  %v1729_v14 = vrot.slane %v7914_v6, 4 }
  0xb6   : > { %v8024_v46 = vrot.slane %v1413_v3, 7  ;;  %v6809_v1 = vcombine.low %v1975_v28, %v1976_v0  ;;  %v8027_v40 = vrot.slane %v2738_v4, 1  ;;  %v2009_v47 = vmul.bf16 %v2008_v37, %v7879_v54 }
  0xb7   : > { %v8010_v41 = vpop.permute.xlu1 %1452  ;;  %v6828_v15 = vcombine.low %v2011_v10, %v2012_v18  ;;  %v2014_v7 = vmul.bf16 %v7958_v36, %v7929_v8  ;;  %v1738_v11 = vrot.slane %v1736_v9, 4  ;;  %v8034_v38 = vsel %vm7884_vm15, %v1732_v62, %v1733_v24 }
  0xb8   : > { %v8012_v48 = vpop.permute.xlu0 %930  ;;  %11501 = vst [vmem:[#allocation17_spill] sm:$0xff] %v8034_v38  ;;  %v1735_v17 = vrot.slane %v1733_v24, 4  ;;  %v6810_v6 = vcombine.low %v1977_v49, %v1978_v30  ;;  %v6827_v4 = vcombine.low %v2009_v47, %v2010_v35  ;;  %v2228_v18 = vor.u32 %v2226_v55, %v7812_v42 }
  0xb9   : > { %2996 = vrot.lane.b32.xlu1 %v2965_v59, %s7364_s13  ;;  %3106 = vrot.lane.b32.xlu0 %v6809_v1, %s7365_s14  ;;  %v2232_v28 = vrot.slane %v2230_v56, 1  ;;  %v2013_v37 = vmul.bf16 %v7956_v29, %v7922_v52  ;;  %v8046_v59 = vsel %vm7884_vm15, %v1729_v14, %v1730_v63  ;;  %v8051_v1 = vsel %vm7884_vm15, %v1738_v11, %v8024_v46 }
  0xba   : > { %11502 = vst [vmem:[#allocation18_spill] sm:$0xff] %v8046_v59  ;;  %11503 = vst [vmem:[#allocation19_spill] sm:$0xff] %v8051_v1  ;;  %v2234_v24 = vshrl.u32 %v7948_v21, 16  ;;  %v2238_v30 = vshll.u32 %v8003_v23, 16  ;;  %v8058_v42 = vsel %vm2205_vm12, %v2736_v51, %v8027_v40  ;;  %v3275_v55 = vrot.slane %v6828_v15, 1 }
  0xbb   : > { %v8037_v3 = vpop.permute.xlu1 %942  ;;  %v8060_v56 = vcombine.low %v2013_v37, %v2014_v7  ;;  %v1848_v63 = vmul.bf16 %v8034_v38, %v7940_v45  ;;  %v8066_v49 = vsel %vm7884_vm15, %v1735_v17, %v1736_v9  ;;  %v3274_v51 = vrot.slane %v6827_v4, 1  ;;  %v8105_v4 = vld [vmem:[#allocation2 + $0x2c] sm:$0xf] }
  0xbc   : > { %v8039_v0 = vpop.permute.xlu0 %1464  ;;  %11504 = vst [vmem:[#allocation20_spill] sm:$0xff] %v8066_v49  ;;  %v1847_v7 = vmul.bf16 %v8046_v59, %v7938_v58  ;;  %v1850_v15 = vmul.bf16 %v8051_v1, %v7995_v16  ;;  %v2233_v17 = vsel %vm2205_vm12, %v2228_v18, %v2232_v28  ;;  %v2236_v45 = vor.u32 %v2234_v24, %v2232_v28 }
  0xbd   : > { %3108 = vrot.lane.b32.xlu1 %v6810_v6, %s7365_s14  ;;  %3159 = vrot.lane.b32.xlu0 %v7836_v22, %s7366_s15  ;;  %v8081_v9 = vrot.slane %v2238_v30, 1  ;;  %v3276_v22 = vsel %vm2453_vm0, %v3274_v51, %v3275_v55  ;;  %v11326_v10 = vrot.slane %v8060_v56, 1  ;;  %v1849_v14 = vmul.bf16 %v8066_v49, %v7993_v13  ;;  %v8103_v13 = vld [vmem:[#allocation2 + $0x28] sm:$0xf] }
  0xbe   : > { %v6745_v62 = vcombine.low %v1847_v7, %v1848_v63  ;;  %v8096_v11 = vrot.slane %v7865_v43, %v7827_v12  ;;  %v8100_v6 = vrot.slane %v7867_v44, %v7827_v12  ;;  %v8114_v43 = vcombine.low %v8103_v13, %v8105_v4 }
  0xbf   : > { %v8070_v21 = vpop.permute.xlu1 %1476  ;;  %v8092_v47 = vcombine.low %v1849_v14, %v1850_v15  ;;  %v3278_v18 = vsel %vm2453_vm0, %v3275_v55, %v11326_v10  ;;  %v2241_v28 = vsel %vm2205_vm12, %v2236_v45, %v8081_v9  ;;  %v8118_v44 = vrot.slane %v8012_v48, %v7827_v12 }
  0xc0   : > { %v8072_v35 = vpop.permute.xlu0 %954  ;;  %11505 = vst [vmem:[#allocation21_spill] sm:$0xff] %v8096_v11  ;;  %11506 = vst [vmem:[#allocation22_spill] sm:$0xff] %v8100_v6  ;;  %v2459_v37 = vrot.slane %v6745_v62, 1  ;;  %v8128_v63 = vrot.slane %v7874_v50, %v7827_v12  ;;  %v1910_v51 = vmul.bf16 %v7793_v19, %v8100_v6  ;;  %v1911_v48 = vmul.bf16 %v7795_v20, %v8096_v11 }
  0xc1   : > { %3161 = vrot.lane.b32.xlu1 %v8058_v42, %s7366_s15  ;;  %3307 = vrot.lane.b32.xlu0 %v3276_v22, %s7367_s16  ;;  %11507 = vst [vmem:[#allocation23_spill] sm:$0xff] %v8118_v44  ;;  %v11327_v55 = vrot.slane %v8092_v47, 1  ;;  %v11509_v7 = vrot.slane %v7952_v25, 1  ;;  %v2746_v45 = vshll.u32 %v8114_v43, 16  ;;  %v1947_v50 = vmul.bf16 %v7958_v36, %v8034_v38 }
  0xc2   : > { %11508 = vst [vmem:[#allocation24_spill] sm:$0xff] %v8128_v63  ;;  %v1913_v22 = vmul.bf16 %v7958_v36, %v8118_v44  ;;  %v1946_v25 = vmul.bf16 %v7956_v29, %v8046_v59  ;;  %v6761_v14 = vcombine.low %v1910_v51, %v1911_v48  ;;  %v1948_v10 = vmul.bf16 %v8103_v13, %v8066_v49  ;;  %v8174_v48 = vld [vmem:[#allocation2 + $0x34] sm:$0xf] }
  0xc3   : > { %v8088_v58 = vpop.permute.xlu1 %966  ;;  %v2460_v15 = vsel %vm2453_vm0, %v11509_v7, %v2459_v37  ;;  %v2462_v20 = vsel %vm2453_vm0, %v2459_v37, %v11327_v55  ;;  %v2748_v7 = vrot.slane %v2746_v45, 1  ;;  %v1425_v51 = vrot.slane %v7950_v5, %v7827_v12 }
  0xc4   : > { %v8090_v16 = vpop.permute.xlu0 %1488  ;;  %v1449_v5 = vrot.slane %v7979_v57, %v7827_v12  ;;  %v1980_v57 = vmul.bf16 %v7958_v36, %v8096_v11  ;;  %v2242_v36 = vshrl.u32 %v8003_v23, 16  ;;  %v1981_v32 = vmul.bf16 %v8103_v13, %v8128_v63 }
  0xc5   : > { %2342 = vrot.lane.b32.xlu1 %v2233_v17, %s7360_s24  ;;  %3309 = vrot.lane.b32.xlu0 %v3278_v18, %s7367_s16  ;;  %v2742_v17 = vshrl.u32 %v7966_v39, 16  ;;  %v1949_v39 = vmul.bf16 %v8105_v4, %v8051_v1  ;;  %v1912_v18 = vmul.bf16 %v7956_v29, %v8128_v63 }
  0xc6   : > { %v1748_v11 = vrot.slane %v1449_v5, 7  ;;  %v2015_v5 = vmul.bf16 %v8103_v13, %v8046_v59 }
  0xc7   : > { %v8121_v24 = vpop.permute.xlu1 %1500  ;;  %v6762_v37 = vcombine.low %v1912_v18, %v1913_v22  ;;  %v8167_v8 = vcombine.low %v1948_v10, %v1949_v39  ;;  %v8183_v22 = vld [vmem:[#allocation2 + $0x28] sm:$0xf]  ;;  %v8185_v10 = vld [vmem:[#allocation2 + $0x2c] sm:$0xf] }
  0xc8   : > { %v8123_v30 = vpop.permute.xlu0 %978 }
  0xc9   : > { %2344 = vrot.lane.b32.xlu1 %v2241_v28, %s7360_s24  ;;  %2491 = vrot.lane.b32.xlu0 %v2460_v15, %s7363_s12  ;;  %v2744_v28 = vor.u32 %v2742_v17, %v8027_v40  ;;  %v6795_v15 = vcombine.low %v1946_v25, %v1947_v50  ;;  %v8172_v40 = vld [vmem:[#allocation2 + $0x30] sm:$0xf]  ;;  %v8195_v25 = vcombine.low %v8183_v22, %v8185_v10  ;;  %v11511_v26 = vrot.slane %v8167_v8, 1 }
  0xca   : > { %v8181_v50 = vcombine.low %v8172_v40, %v8174_v48 }
  0xcb   : > { %v8145_v19 = vpop.permute.xlu1 %990  ;;  %v8177_v17 = vsel %vm2205_vm12, %v2744_v28, %v2748_v7  ;;  %v2966_v45 = vrot.slane %v6795_v15, 1  ;;  %v1979_v28 = vmul.bf16 %v7956_v29, %v8100_v6  ;;  %v2750_v15 = vshrl.u32 %v8114_v43, 16 }
  0xcc   : > { %v8147_v62 = vpop.permute.xlu0 %1512  ;;  %v2754_v18 = vshll.u32 %v8181_v50, 16  ;;  %v2016_v29 = vmul.bf16 %v8105_v4, %v8034_v38  ;;  %v2246_v43 = vshll.u32 %v8195_v25, 16 }
  0xcd   : > { %2493 = vrot.lane.b32.xlu1 %v2462_v20, %s7363_s12  ;;  %2603 = vrot.lane.b32.xlu0 %v6761_v14, %s7362_s26  ;;  %v1437_v20 = vrot.slane %v7981_v60, %v7827_v12  ;;  %v1742_v60 = vrot.slane %v1425_v51, 7  ;;  %v1272_v51 = vld [vmem:[#allocation2 + $0x30] sm:$0xf]  ;;  %v2969_v38 = vsel %vm2453_vm0, %v2966_v45, %v11511_v26  ;;  %v6811_v23 = vcombine.low %v1979_v28, %v1980_v57 }
  0xce   : > { %v2752_v31 = vor.u32 %v2750_v15, %v2748_v7  ;;  %v8239_v33 = vrot.slane %v2754_v18, 1  ;;  %v6830_v26 = vcombine.low %v2015_v5, %v2016_v29  ;;  %v1750_v28 = vrot.slane %v1748_v11, 4 }
  0xcf   : > { %v8163_v55 = vpop.permute.xlu1 %1524  ;;  %v1745_v6 = vrot.slane %v1437_v20, 7  ;;  %v2244_v7 = vor.u32 %v2242_v36, %v8081_v9  ;;  %v2248_v18 = vrot.slane %v2246_v43, 1  ;;  %v2017_v15 = vmul.bf16 %v8172_v40, %v8066_v49 }
  0xd0   : > { %v8165_v52 = vpop.permute.xlu0 %1002  ;;  %v8269_v9 = vsel %vm2205_vm12, %v2752_v31, %v8239_v33  ;;  %v3279_v36 = vrot.slane %v6830_v26, 1  ;;  %v11516_v26 = vrot.slane %v8060_v56, 1  ;;  %v8310_v56 = vld [vmem:[#allocation2 + $0x38] sm:$0xf] }
  0xd1   : > { %2605 = vrot.lane.b32.xlu1 %v6762_v37, %s7362_s26  ;;  %2850 = vrot.lane.b32.xlu0 %v8058_v42, %s7361_s25  ;;  %v1461_v42 = vrot.slane %v8010_v41, %v7827_v12  ;;  %v11510_v37 = vrot.slane %v7976_v61, 1  ;;  %v1982_v41 = vmul.bf16 %v8105_v4, %v8118_v44  ;;  %v1273_v61 = vld [vmem:[#allocation2 + $0x34] sm:$0xf]  ;;  %v1741_v44 = vrot.slane %v8024_v46, 4 }
  0xd2   : > { %v8231_v20 = vcombine.low %v1272_v51, %v1273_v61  ;;  %v1747_v46 = vrot.slane %v1745_v6, 4 }
  0xd3   : > { %v8197_v39 = vpop.permute.xlu1 %1014  ;;  %v2967_v54 = vsel %vm2453_vm0, %v11510_v37, %v2966_v45  ;;  %v8234_v34 = vrot.slane %v1461_v42, 7  ;;  %v2018_v45 = vmul.bf16 %v8174_v48, %v8051_v1  ;;  %v6812_v42 = vcombine.low %v1981_v32, %v1982_v41 }
  0xd4   : > { %v8199_v14 = vpop.permute.xlu0 %1536  ;;  %v8257_v29 = vsel %vm7884_vm15, %v1741_v44, %v1742_v60  ;;  %v2250_v32 = vshrl.u32 %v8195_v25, 16  ;;  %v2254_v41 = vshll.u32 %v8231_v20, 16 }
  0xd5   : > { %2852 = vrot.lane.b32.xlu1 %v8177_v17, %s7361_s25  ;;  %2998 = vrot.lane.b32.xlu0 %v2967_v54, %s7364_s13  ;;  %v1744_v54 = vrot.slane %v1742_v60, 4  ;;  %11513 = vst [vmem:[#allocation26_spill] sm:$0xff] %v8257_v29  ;;  %v8271_v43 = vcombine.low %v2017_v15, %v2018_v45  ;;  %v8277_v60 = vsel %vm7884_vm15, %v1747_v46, %v1748_v11 }
  0xd6   : > { %11515 = vst [vmem:[#allocation28_spill] sm:$0xff] %v8277_v60  ;;  %v1851_v31 = vmul.bf16 %v8257_v29, %v8183_v22  ;;  %v8291_v11 = vrot.slane %v2254_v41, 1  ;;  %v1853_v46 = vmul.bf16 %v8277_v60, %v1272_v51 }
  0xd7   : > { %v8222_v27 = vpop.permute.xlu1 %1548  ;;  %v8245_v57 = vsel %vm7884_vm15, %v1744_v54, %v1745_v6  ;;  %v8262_v6 = vsel %vm7884_vm15, %v1750_v28, %v8234_v34  ;;  %v2252_v54 = vor.u32 %v2250_v32, %v2248_v18  ;;  %v11355_v45 = vrot.slane %v8271_v43, 1 }
  0xd8   : > { %v8224_v37 = vpop.permute.xlu0 %1026  ;;  %11512 = vst [vmem:[#allocation25_spill] sm:$0xff] %v8245_v57  ;;  %11514 = vst [vmem:[#allocation27_spill] sm:$0xff] %v8262_v6  ;;  %v1852_v44 = vmul.bf16 %v8245_v57, %v8185_v10  ;;  %v1854_v5 = vmul.bf16 %v8262_v6, %v1273_v61  ;;  %v2249_v10 = vsel %vm2205_vm12, %v2244_v7, %v2248_v18  ;;  %v8312_v18 = vld [vmem:[#allocation2 + $0x3c] sm:$0xf] }
  0xd9   : > { %3000 = vrot.lane.b32.xlu1 %v2969_v38, %s7364_s13  ;;  %3110 = vrot.lane.b32.xlu0 %v6811_v23, %s7365_s14  ;;  %v8307_v7 = vrot.slane %v8072_v35, %v7827_v12  ;;  %v3282_v51 = vsel %vm2453_vm0, %v3279_v36, %v11355_v45  ;;  %v2257_v15 = vsel %vm2205_vm12, %v2252_v54, %v8291_v11 }
  0xda   : > { %v6747_v28 = vcombine.low %v1851_v31, %v1852_v44  ;;  %v8321_v41 = vcombine.low %v8310_v56, %v8312_v18  ;;  %v8325_v35 = vrot.slane %v8037_v3, %v7827_v12  ;;  %v8329_v44 = vrot.slane %v8123_v30, %v7827_v12 }
  0xdb   : > { %v8248_v38 = vpop.permute.xlu1 %1038  ;;  %11517 = vst [vmem:[#allocation29_spill] sm:$0xff] %v8307_v7  ;;  %v1915_v3 = vmul.bf16 %v8105_v4, %v8307_v7  ;;  %v11521_v30 = vrot.slane %v8092_v47, 1 }
  0xdc   : > { %v8250_v59 = vpop.permute.xlu0 %1560  ;;  %v2463_v32 = vrot.slane %v6747_v28, 1  ;;  %11518 = vst [vmem:[#allocation30_spill] sm:$0xff] %v8325_v35  ;;  %11519 = vst [vmem:[#allocation31_spill] sm:$0xff] %v8329_v44  ;;  %v1951_v28 = vmul.bf16 %v8174_v48, %v8245_v57 }
  0xdd   : > { %3112 = vrot.lane.b32.xlu1 %v6812_v42, %s7365_s14  ;;  %3163 = vrot.lane.b32.xlu0 %v8177_v17, %s7366_s15  ;;  %v3280_v17 = vsel %vm2453_vm0, %v11516_v26, %v3279_v36  ;;  %v8303_v42 = vcombine.low %v1853_v46, %v1854_v5  ;;  %v2758_v26 = vshrl.u32 %v8181_v50, 16  ;;  %v1917_v46 = vmul.bf16 %v8174_v48, %v8329_v44 }
  0xde   : > { %v2464_v54 = vsel %vm2453_vm0, %v11521_v30, %v2463_v32 }
  0xdf   : > { %v8281_v25 = vpop.permute.xlu1 %1572  ;;  %v11358_v5 = vrot.slane %v8303_v42, 1  ;;  %v2760_v45 = vor.u32 %v2758_v26, %v8239_v33  ;;  %v1473_v33 = vrot.slane %v8039_v0, %v7827_v12  ;;  %v8389_v26 = vld [vmem:[#allocation2 + $0x44] sm:$0xf]  ;;  %v1497_v0 = vrot.slane %v8090_v16, %v7827_v12 }
  0xe0   : > { %v8283_v23 = vpop.permute.xlu0 %1050 }
  0xe1   : > { %3165 = vrot.lane.b32.xlu1 %v8269_v9, %s7366_s15  ;;  %3311 = vrot.lane.b32.xlu0 %v3280_v17, %s7367_s16  ;;  %v2762_v17 = vshll.u32 %v8321_v41, 16  ;;  %v2466_v50 = vsel %vm2453_vm0, %v2463_v32, %v11358_v5  ;;  %v1952_v5 = vmul.bf16 %v8310_v56, %v8277_v60  ;;  %v1754_v16 = vrot.slane %v1473_v33, 7 }
  0xe3   : > { %v8299_v22 = vpop.permute.xlu1 %1062  ;;  %v2764_v1 = vrot.slane %v2762_v17, 1 }
  0xe4   : > { %v8301_v61 = vpop.permute.xlu0 %1584 }
  0xe5   : > { %2346 = vrot.lane.b32.xlu1 %v2249_v10, %s7360_s24  ;;  %3313 = vrot.lane.b32.xlu0 %v3282_v51, %s7367_s16  ;;  %v8339_v10 = vrot.slane %v8088_v58, %v7827_v12  ;;  %v1914_v58 = vmul.bf16 %v8103_v13, %v8325_v35  ;;  %v1950_v51 = vmul.bf16 %v8172_v40, %v8257_v29  ;;  %v7309_v13 = vld [vmem:[%s11309_s3 + $0x10] ss:$0 sps:$4 sm:$0x33]  }
  0xe6   : > { %7260 = vmatprep.subr.msk.bf16.mxu0 %vm3672_vm1, %v7309_v13  ;;  %v8392_v17 = vsel %vm2205_vm12, %v2760_v45, %v2764_v1 }
  0xe7   : > { %v8332_v31 = vpop.permute.xlu1 %1596  ;;  %11520 = vst [vmem:[#allocation32_spill] sm:$0xff] %v8339_v10  ;;  %v6763_v30 = vcombine.low %v1914_v58, %v1915_v3  ;;  %v6797_v32 = vcombine.low %v1950_v51, %v1951_v28  ;;  %v8387_v3 = vld [vmem:[#allocation2 + $0x40] sm:$0xf] }
  0xe8   : > { %v8334_v36 = vpop.permute.xlu0 %1074  ;;  %v8396_v58 = vcombine.low %v8387_v3, %v8389_v26 }
  0xe9   : > { %2348 = vrot.lane.b32.xlu1 %v2257_v15, %s7360_s24  ;;  %2495 = vrot.lane.b32.xlu0 %v2464_v54, %s7363_s12  ;;  %v1953_v15 = vmul.bf16 %v8312_v18, %v8262_v6  ;;  %v1916_v54 = vmul.bf16 %v8172_v40, %v8339_v10  ;;  %v2970_v28 = vrot.slane %v6797_v32, 1  ;;  %v2766_v32 = vshrl.u32 %v8321_v41, 16 }
  0xea   : > { %v1986_v41 = vmul.bf16 %v8312_v18, %v8329_v44 }
  0xeb   : > { %v8356_v4 = vpop.permute.xlu1 %1086  ;;  %v6764_v49 = vcombine.low %v1916_v54, %v1917_v46  ;;  %v8406_v46 = vld [vmem:[#allocation2 + $0x3c] sm:$0xf]  ;;  %v1984_v54 = vmul.bf16 %v8174_v48, %v8307_v7  ;;  %v1983_v48 = vmul.bf16 %v8172_v40, %v8325_v35  ;;  %v1756_v40 = vrot.slane %v1754_v16, 4 }
  0xec   : > { %11522 = vst [vmem:[#allocation33_spill] sm:$0xff] %v8356_v4  ;;  %v8358_v47 = vpop.permute.xlu0 %1608 }
  0xed   : > { %11523 = vst [vmem:[#allocation34_spill] sm:$0xff] %v8358_v47  ;;  %2497 = vrot.lane.b32.xlu1 %v2466_v50, %s7363_s12  ;;  %2607 = vrot.lane.b32.xlu0 %v6763_v30, %s7362_s26  ;;  %v8381_v50 = vcombine.low %v1952_v5, %v1953_v15  ;;  %v1485_v5 = vrot.slane %v8070_v21, %v7827_v12  ;;  %v3674_v21 = vsel %vm3672_vm1, %v7309_v13, 0  ;;  %v11528_v15 = vrot.slane %v8167_v8, 1  ;;  %v1276_v8 = vld [vmem:[#allocation2 + $0x40] sm:$0xf] }
  0xee   : > { %7185 = vmatpush3.bf16.msra.mxu0 %v3674_v21  ;;  %v2020_v13 = vmul.bf16 %v8312_v18, %v8245_v57  ;;  %v1277_v21 = vld [vmem:[#allocation2 + $0x44] sm:$0xf]  ;;  %v6813_v44 = vcombine.low %v1983_v48, %v1984_v54  ;;  %vm3639_vm1 = vcmask 293888  }
  0xef   : > { %v8377_v63 = vpop.permute.xlu1 %1620  ;;  %v1757_v33 = vrot.slane %v1485_v5, 7  ;;  %v11531_v57 = vrot.slane %v8381_v50, 1  ;;  %v2019_v5 = vmul.bf16 %v8310_v56, %v8257_v29  ;;  %v1753_v29 = vrot.slane %v8234_v34, 4 }
  0xf0   : > { %11524 = vst [vmem:[#allocation35_spill] sm:$0xff] %v8377_v63  ;;  %v8379_v4 = vpop.permute.xlu0 %1098  ;;  %v1760_v63 = vrot.slane %v1497_v0, 7 }
  0xf1   : > { %11525 = vst [vmem:[#allocation36_spill] sm:$0xff] %v8379_v4  ;;  %2609 = vrot.lane.b32.xlu1 %v6764_v49, %s7362_s26  ;;  %2854 = vrot.lane.b32.xlu0 %v8269_v9, %s7361_s25  ;;  %v8404_v49 = vld [vmem:[#allocation2 + $0x38] sm:$0xf]  ;;  %v1509_v9 = vrot.slane %v8121_v24, %v7827_v12  ;;  %v2258_v24 = vshrl.u32 %v8231_v20, 16  ;;  %v2973_v20 = vsel %vm2453_vm0, %v2970_v28, %v11531_v57 }
  0xf2   : > { %v8415_v30 = vcombine.low %v8404_v49, %v8406_v46  ;;  %v6832_v57 = vcombine.low %v2019_v5, %v2020_v13  ;;  %v8461_v47 = vsel %vm7884_vm15, %v1756_v40, %v1757_v33  ;;  %v8475_v13 = vsel %vm7884_vm15, %v1753_v29, %v1754_v16  ;;  %v8504_v40 = vld [vmem:[#allocation2 + $0x48] sm:$0xf] }
  0xf3   : > { %v8408_v45 = vpop.permute.xlu1 %1110  ;;  %v8449_v35 = vrot.slane %v1509_v9, 7  ;;  %11532 = vst [vmem:[#allocation41_spill] sm:$0xff] %v8461_v47  ;;  %v1762_v9 = vrot.slane %v1760_v63, 4  ;;  %11533 = vst [vmem:[#allocation42_spill] sm:$0xff] %v8475_v13  ;;  %v1759_v5 = vrot.slane %v1757_v33, 4  ;;  %v1856_v29 = vmul.bf16 %v8461_v47, %v8406_v46 }
  0xf4   : > { %11526 = vst [vmem:[#allocation37_spill] sm:$0xff] %v8408_v45  ;;  %v8410_v51 = vpop.permute.xlu0 %1632  ;;  %v2971_v45 = vsel %vm2453_vm0, %v11528_v15, %v2970_v28  ;;  %v2262_v0 = vshll.u32 %v8415_v30, 16  ;;  %v2022_v28 = vmul.bf16 %v8389_v26, %v8262_v6 }
  0xf5   : > { %11527 = vst [vmem:[#allocation38_spill] sm:$0xff] %v8410_v51  ;;  %2856 = vrot.lane.b32.xlu1 %v8392_v17, %s7361_s25  ;;  %v2770_v51 = vshll.u32 %v8396_v58, 16  ;;  %3002 = vrot.lane.b32.xlu0 %v2971_v45, %s7364_s13  ;;  %v8447_v45 = vcombine.low %v1276_v8, %v1277_v21  ;;  %v8493_v16 = vsel %vm7884_vm15, %v1759_v5, %v1760_v63  ;;  %v8521_v5 = vld [vmem:[#allocation2 + $0x50] sm:$0xf] }
  0xf6   : > { %11535 = vst [vmem:[#allocation44_spill] sm:$0xff] %v8493_v16 }
  0xf7   : > { %v8437_v15 = vpop.permute.xlu1 %1644  ;;  %v8454_v4 = vrot.slane %v2770_v51, 1  ;;  %v2021_v51 = vmul.bf16 %v8387_v3, %v8277_v60  ;;  %v2270_v34 = vshll.u32 %v8447_v45, 16 }
  0xf8   : > { %11529 = vst [vmem:[#allocation39_spill] sm:$0xff] %v8437_v15  ;;  %v8439_v7 = vpop.permute.xlu0 %1122  ;;  %v1985_v15 = vmul.bf16 %v8310_v56, %v8339_v10 }
  0xf9   : > { %11530 = vst [vmem:[#allocation40_spill] sm:$0xff] %v8439_v7  ;;  %3004 = vrot.lane.b32.xlu1 %v2973_v20, %s7364_s13  ;;  %v2768_v7 = vor.u32 %v2766_v32, %v2764_v1  ;;  %3114 = vrot.lane.b32.xlu0 %v6813_v44, %s7365_s14  ;;  %v2260_v1 = vor.u32 %v2258_v24, %v8291_v11  ;;  %v2266_v32 = vshrl.u32 %v8415_v30, 16  ;;  %v2264_v11 = vrot.slane %v2262_v0, 1 }
  0xfa   : > { %v6814_v54 = vcombine.low %v1985_v15, %v1986_v41  ;;  %v8480_v44 = vsel %vm7884_vm15, %v1762_v9, %v8449_v35  ;;  %v3283_v30 = vrot.slane %v6832_v57, 1  ;;  %v8487_v41 = vcombine.low %v2021_v51, %v2022_v28  ;;  %v8506_v57 = vld [vmem:[#allocation2 + $0x4c] sm:$0xf] }
  0xfb   : > { %v8464_v48 = vpop.permute.xlu1 %1134  ;;  %11534 = vst [vmem:[#allocation43_spill] sm:$0xff] %v8480_v44  ;;  %v8485_v24 = vsel %vm2205_vm12, %v2768_v7, %v8454_v4  ;;  %v1855_v7 = vmul.bf16 %v8475_v13, %v8404_v49  ;;  %v1858_v0 = vmul.bf16 %v8480_v44, %v1277_v21  ;;  %v2265_v63 = vsel %vm2205_vm12, %v2260_v1, %v2264_v11  ;;  %v8523_v1 = vld [vmem:[#allocation2 + $0x54] sm:$0xf] }
  0xfc   : > { %v8466_v20 = vpop.permute.xlu0 %1656  ;;  %v2268_v46 = vor.u32 %v2266_v32, %v2264_v11  ;;  %v6783_v28 = vcombine.low %v8504_v40, %v8506_v57  ;;  %v11537_v9 = vrot.slane %v8271_v43, 1  ;;  %v11375_v21 = vrot.slane %v8487_v41, 1 }
  0xfd   : > { %3116 = vrot.lane.b32.xlu1 %v6814_v54, %s7365_s14  ;;  %3167 = vrot.lane.b32.xlu0 %v8392_v17, %s7366_s15  ;;  %v8511_v17 = vrot.slane %v2270_v34, 1  ;;  %v6749_v54 = vcombine.low %v1855_v7, %v1856_v29  ;;  %v1857_v51 = vmul.bf16 %v8493_v16, %v1276_v8  ;;  %v8531_v43 = vcombine.low %v8521_v5, %v8523_v1 }
  0xfe   : > { %v3284_v49 = vsel %vm2453_vm0, %v11537_v9, %v3283_v30  ;;  %v8535_v11 = vrot.slane %v8165_v52, %v7827_v12  ;;  %v2778_v8 = vshll.u32 %v6783_v28, 16  ;;  %v3286_v7 = vsel %vm2453_vm0, %v3283_v30, %v11375_v21 }
  0xff   : > { %v8497_v33 = vpop.permute.xlu1 %1158  ;;  %v8527_v34 = vcombine.low %v1857_v51, %v1858_v0  ;;  %v2273_v0 = vsel %vm2205_vm12, %v2268_v46, %v8511_v17  ;;  %v2467_v9 = vrot.slane %v6749_v54, 1  ;;  %v8548_v51 = vrot.slane %v8145_v19, %v7827_v12 }
 0x100   : > { %11536 = vst [vmem:[#allocation45_spill] sm:$0xff] %v8497_v33  ;;  %v8499_v15 = vpop.permute.xlu0 %1146  ;;  %11538 = vst [vmem:[#allocation46_spill] sm:$0xff] %v8535_v11  ;;  %v8552_v52 = vrot.slane %v8224_v37, %v7827_v12  ;;  %v2786_v30 = vshll.u32 %v8531_v43, 16  ;;  %v1521_v46 = vrot.slane %v8147_v62, %v7827_v12  ;;  %v1919_v37 = vmul.bf16 %v8312_v18, %v8535_v11 }
 0x101   : > { %3169 = vrot.lane.b32.xlu1 %v8485_v24, %s7366_s15  ;;  %3315 = vrot.lane.b32.xlu0 %v3284_v49, %s7367_s16  ;;  %v2774_v49 = vshrl.u32 %v8396_v58, 16  ;;  %11540 = vst [vmem:[#allocation48_spill] sm:$0xff] %v8548_v51  ;;  %v8561_v58 = vrot.slane %v8197_v39, %v7827_v12  ;;  %v2780_v54 = vrot.slane %v2778_v8, 1  ;;  %v1955_v62 = vmul.bf16 %v8389_v26, %v8461_v47 }
 0x102   : > { %11541 = vst [vmem:[#allocation49_spill] sm:$0xff] %v8552_v52  ;;  %v1533_v39 = vrot.slane %v8163_v55, %v7827_v12  ;;  %v1918_v18 = vmul.bf16 %v8310_v56, %v8548_v51  ;;  %v1957_v55 = vmul.bf16 %v8506_v57, %v8480_v44  ;;  %v1545_v56 = vrot.slane %v8199_v14, %v7827_v12 }
 0x103   : > { %v8537_v29 = vpop.permute.xlu1 %1668  ;;  %11542 = vst [vmem:[#allocation50_spill] sm:$0xff] %v8561_v58  ;;  %v2776_v21 = vor.u32 %v2774_v49, %v8454_v4  ;;  %v1954_v49 = vmul.bf16 %v8387_v3, %v8475_v13  ;;  %v1920_v60 = vmul.bf16 %v8387_v3, %v8561_v58  ;;  %v1987_v10 = vmul.bf16 %v8387_v3, %v8548_v51  ;;  %v1281_v51 = vld [vmem:[#allocation2 + $0x54] sm:$0xf] }
 0x104   : > { %v8525_v32 = vpop.permute.xlu0 %1170  ;;  %11539 = vst [vmem:[#allocation47_spill] sm:$0xff] %v8537_v29 }
 0x105   : > { %2350 = vrot.lane.b32.xlu1 %v2265_v63, %s7360_s24  ;;  %3317 = vrot.lane.b32.xlu0 %v3286_v7, %s7367_s16  ;;  %v2782_v63 = vshrl.u32 %v6783_v28, 16  ;;  %v11544_v28 = vrot.slane %v8303_v42, 1  ;;  %v1921_v42 = vmul.bf16 %v8389_v26, %v8552_v52  ;;  %v8606_v14 = vsel %vm2205_vm12, %v2776_v21, %v2780_v54  ;;  %v8625_v21 = vld [vmem:[#allocation2 + $0x4c] sm:$0xf] }
 0x107   : > { %v2468_v7 = vsel %vm2453_vm0, %v11544_v28, %v2467_v9  ;;  %v8576_v6 = vpop.permute.xlu1 %1194  ;;  %v2784_v8 = vor.u32 %v2782_v63, %v2780_v54  ;;  %v8590_v28 = vrot.slane %v2786_v30, 1  ;;  %v6765_v63 = vcombine.low %v1918_v18, %v1919_v37  ;;  %v443_v18 = vld [vmem:[%s7468_s22 + $0x6c] sm:$0xf] }
 0x108   : > { %v8563_v19 = vpop.permute.xlu0 %1182  ;;  %11545 = vst [vmem:[#allocation52_spill] sm:$0xff] %v8576_v6  ;;  %v6766_v30 = vcombine.low %v1920_v60, %v1921_v42  ;;  %v1557_v60 = vrot.slane %v8222_v27, %v7827_v12 }
 0x109   : > { %11543 = vst [vmem:[#allocation51_spill] sm:$0xff] %v8563_v19  ;;  %2352 = vrot.lane.b32.xlu1 %v2273_v0, %s7360_s24  ;;  %2499 = vrot.lane.b32.xlu0 %v2468_v7, %s7363_s12  ;;  %v11546_v0 = vrot.slane %v8527_v34, 1  ;;  %v1766_v7 = vrot.slane %v1521_v46, 7  ;;  %v8599_v19 = vrot.slane %v1533_v39, 7  ;;  %v442_v46 = vld [vmem:[%s7468_s22 + $0x68] sm:$0xf]  ;;  %v8612_v37 = vsel %vm2205_vm12, %v2784_v8, %v8590_v28 }
 0x10a   : > { %v1765_v39 = vrot.slane %v8449_v35, 4 }
 0x10b   : > { %v2470_v4 = vsel %vm2453_vm0, %v2467_v9, %v11546_v0  ;;  %v6799_v9 = vcombine.low %v1954_v49, %v1955_v62  ;;  %v1956_v0 = vmul.bf16 %v8504_v40, %v8493_v16  ;;  %v8614_v62 = vld [vmem:[#allocation2 + $0x48] sm:$0xf]  ;;  %v1768_v49 = vrot.slane %v1766_v7, 4  ;;  %v8622_v42 = vpop.permute.xlu1 %1218 }
 0x10c   : > { %v8601_v6 = vpop.permute.xlu0 %1206  ;;  %11548 = vst [vmem:[#allocation54_spill] sm:$0xff] %v8622_v42  ;;  %v8629_v8 = vcombine.low %v8614_v62, %v8625_v21  ;;  %v8633_v35 = vsel %vm7884_vm15, %v1765_v39, %v1766_v7  ;;  %v8647_v39 = vrot.slane %v1557_v60, 7 }
 0x10d   : > { %2501 = vrot.lane.b32.xlu1 %v2470_v4, %s7363_s12  ;;  %11547 = vst [vmem:[#allocation53_spill] sm:$0xff] %v8601_v6  ;;  %2611 = vrot.lane.b32.xlu0 %v6765_v63, %s7362_s26  ;;  %v8608_v4 = vcombine.low %v1956_v0, %v1957_v55  ;;  %v8618_v6 = vrot.slane %v1545_v56, 7  ;;  %v2974_v54 = vrot.slane %v6799_v9, 1  ;;  %v684_v55 = vshrl.u32 %v442_v46, 16  ;;  %11549 = vst [vmem:[#allocation55_spill] sm:$0xff] %v8633_v35 }
 0x10e   : > { %v687_v63 = vshll.u32 %v442_v46, 16  ;;  %v8638_v27 = vsel %vm7884_vm15, %v1768_v49, %v8599_v19  ;;  %v693_v56 = vshrl.u32 %v443_v18, 16  ;;  %v696_v9 = vshll.u32 %v443_v18, 16 }
 0x10f   : > { %11550 = vst [vmem:[#allocation56_spill] sm:$0xff] %v8638_v27  ;;  %v682_v46 = vrot.slane %v7877_v53, 4  ;;  %v686_v42 = vrot.slane %v684_v55, 7  ;;  %v1774_v7 = vrot.slane %v8618_v6, 4  ;;  %v11551_v0 = vrot.slane %v8381_v50, 1  ;;  %v8660_v60 = vpop.permute.xlu1 %2340 }
 0x110   : > { %v8649_v49 = vpop.permute.xlu0 %2338  ;;  %v695_v18 = vrot.slane %v693_v56, 7  ;;  %v2023_v53 = vmul.bf16 %v8504_v40, %v8475_v13  ;;  %v1990_v50 = vmul.bf16 %v8506_v57, %v8552_v52  ;;  %v2274_v13 = vshrl.u32 %v8447_v45, 16  ;;  %v1280_v52 = vld [vmem:[#allocation2 + $0x50] sm:$0xf] }
 0x111   : > { %2613 = vrot.lane.b32.xlu1 %v6766_v30, %s7362_s26  ;;  %2858 = vrot.lane.b32.xlu0 %v8485_v24, %s7361_s25  ;;  %v2024_v30 = vmul.bf16 %v8506_v57, %v8461_v47  ;;  %v1988_v24 = vmul.bf16 %v8389_v26, %v8535_v11  ;;  %v2975_v47 = vsel %vm2453_vm0, %v11551_v0, %v2974_v54  ;;  %v691_v29 = vrot.slane %v686_v42, 4  ;;  %v444_v0 = vld [vmem:[%s7468_s22 + $0x70] sm:$0xf] }
 0x112   : > { %v689_v55 = vor.u32 %v687_v63, %v686_v42  ;;  %v1989_v26 = vmul.bf16 %v8504_v40, %v8561_v58  ;;  %v698_v56 = vor.u32 %v696_v9, %v695_v18  ;;  %v11552_v11 = vrot.slane %v8608_v4, 1 }
 0x113   : > { %v8673_v42 = vcombine.low %v2023_v53, %v2024_v30  ;;  %v6815_v3 = vcombine.low %v1987_v10, %v1988_v24  ;;  %v2278_v58 = vshll.u32 %v8629_v8, 16  ;;  %v2026_v9 = vmul.bf16 %v8523_v1, %v8480_v44 }
 0x114   : > { %v2977_v63 = vsel %vm2453_vm0, %v2974_v54, %v11552_v11  ;;  %v690_v33 = vsel %vm7493_vm10, %v682_v46, %v689_v55  ;;  %v699_v11 = vsel %vm7493_vm10, %v691_v29, %v698_v56  ;;  %v1771_v45 = vrot.slane %v8599_v19, 4  ;;  %v8694_v24 = vpop.permute.xlu0 %2846  ;;  %v7344_v19 = vld [vmem:[%s7468_s22 + $0x74] sm:$0xf] }
 0x115   : > { %2860 = vrot.lane.b32.xlu1 %v8606_v14, %s7361_s25  ;;  %3006 = vrot.lane.b32.xlu0 %v2975_v47, %s7364_s13  ;;  %801 = vst.msk [vmem:[#allocation2 + $0x70] sm:$0xf] %vm770_vm7, %v690_v33  ;;  %v8686_v54 = vcombine.low %v1280_v52, %v1281_v51  ;;  %802 = vst.msk [vmem:[#allocation2 + $0x74] sm:$0xf] %vm770_vm7, %v699_v11  ;;  %v702_v10 = vshrl.u32 %v444_v0, 16  ;;  %v705_v30 = vshll.u32 %v444_v0, 16  ;;  %v8702_v11 = vpop.permute.xlu1 %2848 }
 0x116   : > { %v8692_v46 = vsel %vm7884_vm15, %v1774_v7, %v8647_v39  ;;  %v6816_v29 = vcombine.low %v1989_v26, %v1990_v50  ;;  %v2025_v33 = vmul.bf16 %v8521_v5, %v8493_v16  ;;  %v714_v53 = vshll.u32 %v7344_v19, 16  ;;  %v11555_v50 = vld [vmem:[#allocation5_spill] sm:$0xff]  ;;  %v815_v16 = vld [vmem:[#allocation2 + $0xc] sm:$0xf] }
 0x117   : > { %11554 = vst [vmem:[#allocation57_spill] sm:$0xff] %v8692_v46  ;;  %v3287_v55 = vrot.slane %v8673_v42, 1  ;;  %v2276_v56 = vor.u32 %v2274_v13, %v8511_v17  ;;  %v700_v0 = vrot.slane %v695_v18, 4  ;;  %v2280_v7 = vrot.slane %v2278_v58, 1 }
 0x118   : > { %v8705_v44 = vcombine.low %v2025_v33, %v2026_v9  ;;  %v1860_v26 = vmul.bf16 %v8638_v27, %v8625_v21  ;;  %v2282_v19 = vshrl.u32 %v8629_v8, 16  ;;  %v2286_v42 = vshll.u32 %v8686_v54, 16  ;;  %v813_v21 = vld [vmem:[#allocation2 + $0x4] sm:$0xf]  ;;  %v814_v33 = vld [vmem:[#allocation2 + $0x8] sm:$0xf] }
 0x119   : > { %3008 = vrot.lane.b32.xlu1 %v2977_v63, %s7364_s13  ;;  %3118 = vrot.lane.b32.xlu0 %v6815_v3, %s7365_s14  ;;  %v704_v63 = vrot.slane %v702_v10, 7  ;;  %v716_v3 = vor.u32 %v714_v53, %v11555_v50  ;;  %v8715_v18 = vsel %vm7884_vm15, %v1771_v45, %v8618_v6  ;;  %v1859_v58 = vmul.bf16 %v8633_v35, %v8614_v62  ;;  %v8727_v6 = vpop.permute.xlu0 %2599  ;;  %v812_v53 = vld [vmem:[#allocation2] sm:$0xf] }
 0x11a   : > { %11556 = vst [vmem:[#allocation5_spill] sm:$0xff] %v8715_v18  ;;  %v1862_v9 = vmul.bf16 %v8692_v46, %v1281_v51  ;;  %v2281_v51 = vsel %vm2205_vm12, %v2276_v56, %v2280_v7  ;;  %v1861_v50 = vmul.bf16 %v8715_v18, %v1280_v52  ;;  %v1569_v56 = vrot.slane %v8250_v59, %v7827_v12  ;;  %v8760_v59 = vld [vmem:[#allocation2 + $0x58] sm:$0xf] }
 0x11b   : > { %v707_v13 = vor.u32 %v705_v30, %v704_v63  ;;  %v709_v17 = vrot.slane %v704_v63, 4  ;;  %v11557_v30 = vld [vmem:[#allocation9_spill] sm:$0xff]  ;;  %v6751_v45 = vcombine.low %v1859_v58, %v1860_v26  ;;  %v8738_v63 = vrot.slane %v2286_v42, 1 }
 0x11c   : > { %v8749_v26 = vrot.slane %v8283_v23, %v7827_v12  ;;  %v8756_v52 = vrot.slane %v8248_v38, %v7827_v12 }
 0x11d   : > { %3120 = vrot.lane.b32.xlu1 %v6816_v29, %s7365_s14  ;;  %3171 = vrot.lane.b32.xlu0 %v8606_v14, %s7366_s15  ;;  %v708_v8 = vsel %vm7493_vm10, %v700_v0, %v707_v13  ;;  %v717_v10 = vsel %vm7493_vm10, %v709_v17, %v716_v3  ;;  %v1231_v29 = vmul.bf16 %v11557_v30, %v815_v16  ;;  %v11558_v14 = vrot.slane %v8487_v41, 1  ;;  %v11559_v3 = vld [vmem:[#allocation10_spill] sm:$0xff]  ;;  %v8742_v41 = vpop.permute.xlu1 %2601  ;;  %v11561_v17 = vld [vmem:[#allocation7_spill] sm:$0xff] }
 0x11e   : > { %803 = vst.msk [vmem:[#allocation2 + $0x78] sm:$0xf] %vm770_vm7, %v708_v8  ;;  %804 = vst.msk [vmem:[#allocation2 + $0x7c] sm:$0xf] %vm770_vm7, %v717_v10  ;;  %v11397_v16 = vrot.slane %v8705_v44, 1  ;;  %v2284_v0 = vor.u32 %v2282_v19, %v2280_v7  ;;  %v1229_v13 = vmul.bf16 %v11559_v3, %v813_v21  ;;  %v1230_v58 = vmul.bf16 %v11561_v17, %v814_v33  ;;  %v11563_v19 = vld [vmem:[#allocation8_spill] sm:$0xff] }
 0x11f   : > { %v3288_v62 = vsel %vm2453_vm0, %v11558_v14, %v3287_v55  ;;  %11560 = vst [vmem:[#allocation58_spill] sm:$0xff] %v8749_v26  ;;  %v8752_v7 = vcombine.low %v1861_v50, %v1862_v9  ;;  %11562 = vst [vmem:[#allocation59_spill] sm:$0xff] %v8756_v52  ;;  %v1228_v42 = vmul.bf16 %v11563_v19, %v812_v53  ;;  %v2471_v8 = vrot.slane %v6751_v45, 1  ;;  %v8762_v10 = vld [vmem:[#allocation2 + $0x5c] sm:$0xf] }
 0x120   : > { %v6710_v23 = vcombine.low %v1230_v58, %v1231_v29  ;;  %v3290_v9 = vsel %vm2453_vm0, %v3287_v55, %v11397_v16  ;;  %v2289_v38 = vsel %vm2205_vm12, %v2284_v0, %v8738_v63  ;;  %v8771_v33 = vcombine.low %v8760_v59, %v8762_v10  ;;  %v8834_v16 = vld [vmem:[#allocation2 + $0x60] sm:$0xf] }
 0x121   : > { %3173 = vrot.lane.b32.xlu1 %v8612_v37, %s7366_s15  ;;  %3319 = vrot.lane.b32.xlu0 %v3288_v62, %s7367_s16  ;;  %v1581_v14 = vrot.slane %v8281_v25, %v7827_v12  ;;  %v8777_v62 = vrot.slane %v8334_v36, %v7827_v12  ;;  %v8780_v55 = vrot.slane %v1569_v56, 7  ;;  %vm3421_vm7 = vcmask 97280   ;;  %v1284_v3 = vld [vmem:[#allocation2 + $0x60] sm:$0xf] }
 0x122   : > { %v11396_v45 = vrot.slane %v8752_v7, 1  ;;  %v1923_v53 = vmul.bf16 %v8506_v57, %v8749_v26  ;;  %v8787_v25 = vrot.slane %v8299_v22, %v7827_v12  ;;  %v11566_v50 = vrot.slane %v8527_v34, 1 }
 0x123   : > { %v2488_v21 = vpop.permute.xlu0 %2487  ;;  %11564 = vst [vmem:[#allocation60_spill] sm:$0xff] %v8777_v62  ;;  %v1922_v56 = vmul.bf16 %v8504_v40, %v8756_v52  ;;  %v2790_v57 = vshrl.u32 %v8531_v43, 16  ;;  %v2794_v22 = vshll.u32 %v8771_v33, 16  ;;  %v1961_v40 = vmul.bf16 %v8762_v10, %v8692_v46 }
 0x124   : > { %11565 = vst [vmem:[#allocation61_spill] sm:$0xff] %v8787_v25  ;;  %v1593_v43 = vrot.slane %v8301_v61, %v7827_v12  ;;  %v1924_v61 = vmul.bf16 %v8521_v5, %v8787_v25 }
 0x125   : > { %2354 = vrot.lane.b32.xlu1 %v2281_v51, %s7360_s24  ;;  %v6709_v51 = vcombine.low %v1228_v42, %v1229_v13  ;;  %3321 = vrot.lane.b32.xlu0 %v3290_v9, %s7367_s16  ;;  %v2472_v13 = vsel %vm2453_vm0, %v11566_v50, %v2471_v8  ;;  %v1959_v42 = vmul.bf16 %v8523_v1, %v8638_v27 }
 0x126   : > { %v1925_v9 = vmul.bf16 %v8523_v1, %v8777_v62  ;;  %v8837_v17 = vrot.slane %v1593_v43, 7 }
 0x127   : > { %v2490_v29 = vpop.permute.xlu1 %2489  ;;  %v3342_v36 = vsel %vm3339_vm4, %v6709_v51, %v8649_v49  ;;  %v2995_v0 = vpop.permute.xlu0 %2994  ;;  %v8802_v49 = vrot.slane %v1581_v14, 7  ;;  %v1958_v14 = vmul.bf16 %v8521_v5, %v8633_v35  ;;  %v3345_v51 = vsel %vm3339_vm4, %v6710_v23, %v8660_v60 }
 0x128   : > { %v3390_v58 = vsel %vm3388_vm6, %v3342_v36, %v2488_v21  ;;  %v2474_v21 = vsel %vm2453_vm0, %v2471_v8, %v11396_v45  ;;  %v3392_v8 = vsel %vm3388_vm6, %v3345_v51, %v2490_v29  ;;  %v1780_v23 = vrot.slane %v8780_v55, 4  ;;  %v8841_v29 = vld [vmem:[#allocation2 + $0x64] sm:$0xf] }
 0x129   : > { %2356 = vrot.lane.b32.xlu1 %v2289_v38, %s7360_s24  ;;  %2503 = vrot.lane.b32.xlu0 %v2472_v13, %s7363_s12  ;;  %v6767_v38 = vcombine.low %v1922_v56, %v1923_v53  ;;  %v3423_v36 = vsel %vm3421_vm7, %v3390_v58, %v8727_v6  ;;  %v1960_v13 = vmul.bf16 %v8760_v59, %v8715_v18  ;;  %v2796_v56 = vrot.slane %v2794_v22, 1 }
 0x12a   : > { %v2792_v53 = vor.u32 %v2790_v57, %v8590_v28  ;;  %v6801_v45 = vcombine.low %v1958_v14, %v1959_v42  ;;  %v6768_v58 = vcombine.low %v1924_v61, %v1925_v9  ;;  %v3456_v28 = vsel %vm3454_vm8, %v3423_v36, %v8694_v24  ;;  %v8867_v36 = vld [vmem:[#allocation2 + $0x58] sm:$0xf] }
 0x12b   : > { %v8805_v34 = vpop.permute.xlu1 %2996  ;;  %v3107_v50 = vpop.permute.xlu0 %3106  ;;  %v1605_v57 = vrot.slane %v8332_v31, %v7827_v12  ;;  %v3425_v22 = vsel %vm3421_vm7, %v3392_v8, %v8742_v41  ;;  %v8850_v9 = vcombine.low %v8834_v16, %v8841_v29  ;;  %v3489_v43 = vsel %vm3487_vm9, %v3456_v28, %v2995_v0 }
 0x12c   : > { %v8853_v24 = vsel %vm2205_vm12, %v2792_v53, %v2796_v56  ;;  %v3458_v14 = vsel %vm3454_vm8, %v3425_v22, %v8702_v11  ;;  %v3522_v51 = vsel %vm3520_vm11, %v3489_v43, %v3107_v50  ;;  %v2798_v0 = vshrl.u32 %v8771_v33, 16 }
 0x12d   : > { %2505 = vrot.lane.b32.xlu1 %v2474_v21, %s7363_s12  ;;  %2615 = vrot.lane.b32.xlu0 %v6767_v38, %s7362_s26  ;;  %v8832_v21 = vcombine.low %v1960_v13, %v1961_v40  ;;  %v2978_v40 = vrot.slane %v6801_v45, 1  ;;  %v1991_v38 = vmul.bf16 %v8521_v5, %v8756_v52  ;;  %v1992_v45 = vmul.bf16 %v8523_v1, %v8749_v26 }
 0x12e   : > { %v2802_v5 = vshll.u32 %v8850_v9, 16  ;;  %v2028_v11 = vmul.bf16 %v8762_v10, %v8638_v27  ;;  %v11567_v33 = vrot.slane %v8608_v4, 1  ;;  %v1993_v53 = vmul.bf16 %v8760_v59, %v8787_v25 }
 0x12f   : > { %v3109_v6 = vpop.permute.xlu1 %3108  ;;  %v3160_v42 = vpop.permute.xlu0 %3159  ;;  %v11398_v41 = vrot.slane %v8832_v21, 1  ;;  %v8887_v28 = vrot.slane %v1605_v57, 7  ;;  %v3491_v22 = vsel %vm3487_vm9, %v3458_v14, %v8805_v34  ;;  %v2027_v43 = vmul.bf16 %v8760_v59, %v8633_v35 }
 0x130   : > { %v3555_v61 = vsel %vm3553_vm13, %v3522_v51, %v3160_v42  ;;  %v2979_v50 = vsel %vm2453_vm0, %v11567_v33, %v2978_v40  ;;  %v3524_v51 = vsel %vm3520_vm11, %v3491_v22, %v3109_v6  ;;  %v6817_v57 = vcombine.low %v1991_v38, %v1992_v45 }
 0x131   : > { %2617 = vrot.lane.b32.xlu1 %v6768_v58, %s7362_s26  ;;  %2862 = vrot.lane.b32.xlu0 %v8612_v37, %s7361_s25  ;;  %v8869_v37 = vld [vmem:[#allocation2 + $0x5c] sm:$0xf]  ;;  %v1994_v58 = vmul.bf16 %v8762_v10, %v8777_v62  ;;  %v2981_v42 = vsel %vm2453_vm0, %v2978_v40, %v11398_v41  ;;  %v8904_v33 = vrot.slane %v2802_v5, 1  ;;  %v1285_v40 = vld [vmem:[#allocation2 + $0x64] sm:$0xf]  ;;  %v1786_v41 = vrot.slane %v8837_v17, 4 }
 0x132   : > { %v6736_v1 = vcombine.low %v8867_v36, %v8869_v37  ;;  %v8910_v6 = vcombine.low %v1284_v3, %v1285_v40  ;;  %v11569_v45 = vrot.slane %v8647_v39, 4  ;;  %v11571_v5 = vrot.slane %v8802_v49, 4 }
 0x133   : > { %v3162_v31 = vpop.permute.xlu1 %3161  ;;  %v3308_v13 = vpop.permute.xlu0 %3307  ;;  %v6818_v38 = vcombine.low %v1993_v53, %v1994_v58  ;;  %v1789_v52 = vrot.slane %v8887_v28, 4 }
 0x134   : > { %v3588_v8 = vsel %vm3586_vm14, %v3555_v61, %v3308_v13  ;;  %v2800_v61 = vor.u32 %v2798_v0, %v2796_v56  ;;  %v2290_v13 = vshrl.u32 %v8686_v54, 16  ;;  %v3557_v34 = vsel %vm3553_vm13, %v3524_v51, %v3162_v31 }
 0x135   : > { %2864 = vrot.lane.b32.xlu1 %v8853_v24, %s7361_s25  ;;  %3010 = vrot.lane.b32.xlu0 %v2979_v50, %s7364_s13  ;;  %v6836_v50 = vcombine.low %v2027_v43, %v2028_v11  ;;  %v2030_v56 = vmul.bf16 %v8841_v29, %v8692_v46  ;;  %v8917_v54 = vsel %vm7884_vm15, %v1780_v23, %v8802_v49  ;;  %v2298_v22 = vshrl.u32 %v6736_v1, 16 }
 0x136   : > { %7186 = vmatprep.mubr.msk.bf16.mxu0 %vm3639_vm1, %v3588_v8  ;;  %v2294_v8 = vshll.u32 %v6736_v1, 16  ;;  %11568 = vst [vmem:[#allocation62_spill] sm:$0xff] %v8917_v54  ;;  %v8928_v0 = vsel %vm7884_vm15, %v11569_v45, %v8780_v55  ;;  %v8935_v23 = vsel %vm7884_vm15, %v11571_v5, %v8837_v17  ;;  %v2029_v11 = vmul.bf16 %v8834_v16, %v8715_v18  ;;  %v11576_v45 = vld [vmem:[#allocation36_spill] sm:$0xff]  ;;  %v11577_v5 = vld [vmem:[#allocation22_spill] sm:$0xff]  ;;  %v11584_v18 = vld [vmem:[#allocation37_spill] sm:$0xff] }
 0x137   : > { %v8893_v4 = vpop.permute.xlu1 %2342  ;;  %v3310_v14 = vpop.permute.xlu0 %3309  ;;  %11570 = vst [vmem:[#allocation63_spill] sm:$0xff] %v8928_v0  ;;  %11572 = vst [vmem:[#allocation64_spill] sm:$0xff] %v8935_v23  ;;  %v8949_v55 = vsel %vm2205_vm12, %v2800_v61, %v8904_v33  ;;  %v3291_v49 = vrot.slane %v6836_v50, 1  ;;  %v2292_v17 = vor.u32 %v2290_v13, %v8738_v63  ;;  %v1863_v51 = vmul.bf16 %v8928_v0, %v8867_v36  ;;  %v816_v13 = vld [vmem:[#allocation2 + $0x10] sm:$0xf] }
 0x138   : > { %v3590_v60 = vsel %vm3586_vm14, %v3557_v34, %v3310_v14  ;;  %v2296_v53 = vrot.slane %v2294_v8, 1  ;;  %v8952_v58 = vcombine.low %v2029_v11, %v2030_v56  ;;  %v11574_v1 = vrot.slane %v8705_v44, 1  ;;  %v11575_v44 = vld [vmem:[#allocation34_spill] sm:$0xff] }
 0x139   : > { %3012 = vrot.lane.b32.xlu1 %v2981_v42, %s7364_s13  ;;  %3122 = vrot.lane.b32.xlu0 %v6817_v57, %s7365_s14  ;;  %v1864_v42 = vmul.bf16 %v8917_v54, %v8869_v37  ;;  %v1232_v11 = vmul.bf16 %v11577_v5, %v816_v13  ;;  %v11580_v13 = vld [vmem:[#allocation40_spill] sm:$0xff]  ;;  %v1963_v46 = vmul.bf16 %v8841_v29, %v8917_v54 }
 0x13a   : > { %7187 = vmatmul.mubr.msk.bf16.vlgmr.msra.gmra.mrb[0].mxu0 %vm3639_vm1, %v3590_v60  ;;  %v8940_v60 = vsel %vm7884_vm15, %v1786_v41, %v8887_v28  ;;  %v2302_v41 = vshll.u32 %v8910_v6, 16  ;;  %v3292_v61 = vsel %vm2453_vm0, %v11574_v1, %v3291_v49  ;;  %v2297_v37 = vsel %vm2205_vm12, %v2292_v17, %v2296_v53  ;;  %v11578_v1 = vld [vmem:[#allocation33_spill] sm:$0xff] }
 0x13b   : > { %v8921_v31 = vpop.permute.xlu1 %2344  ;;  %11573 = vst [vmem:[#allocation65_spill] sm:$0xff] %v8940_v60  ;;  %v8944_v39 = vpop.permute.xlu0 %2491  ;;  %v1866_v57 = vmul.bf16 %v8940_v60, %v1285_v40  ;;  %v11399_v34 = vrot.slane %v8952_v58, 1  ;;  %v2300_v14 = vor.u32 %v2298_v22, %v2296_v53  ;;  %v6753_v50 = vcombine.low %v1863_v51, %v1864_v42  ;;  %v817_v40 = vld [vmem:[#allocation2 + $0x14] sm:$0xf]  ;;  %v8991_v53 = vld [vmem:[#allocation2 + $0x68] sm:$0xf] }
 0x13c   : > { %v8974_v36 = vrot.slane %v2302_v41, 1  ;;  %v8993_v22 = vld [vmem:[#allocation2 + $0x6c] sm:$0xf]  ;;  %v1964_v62 = vmul.bf16 %v8991_v53, %v8935_v23 }
 0x13d   : > { %3124 = vrot.lane.b32.xlu1 %v6818_v38, %s7365_s14  ;;  %3175 = vrot.lane.b32.xlu0 %v8853_v24, %s7366_s15  ;;  %v1865_v24 = vmul.bf16 %v8935_v23, %v1284_v3  ;;  %v1617_v38 = vrot.slane %v11575_v44, %v7827_v12  ;;  %v8985_v3 = vrot.slane %v11576_v45, %v7827_v12  ;;  %v2475_v51 = vrot.slane %v6753_v50, 1  ;;  %v11583_v50 = vld [vmem:[#allocation38_spill] sm:$0xff] }
 0x13e   : > { %v3294_v41 = vsel %vm2453_vm0, %v3291_v49, %v11399_v34  ;;  %v2305_v42 = vsel %vm2205_vm12, %v2300_v14, %v8974_v36  ;;  %v9012_v44 = vrot.slane %v11580_v13, %v7827_v12  ;;  %v11582_v49 = vld [vmem:[#allocation21_spill] sm:$0xff]  ;;  %v1641_v34 = vrot.slane %v11583_v50, %v7827_v12 }
 0x13f   : > { %v8959_v43 = vpop.permute.xlu1 %2493  ;;  %v8964_v63 = vpop.permute.xlu0 %2603  ;;  %v8979_v56 = vcombine.low %v1865_v24, %v1866_v57  ;;  %v9002_v57 = vcombine.low %v8991_v53, %v8993_v22  ;;  %v1233_v45 = vmul.bf16 %v11582_v49, %v817_v40  ;;  %v1927_v40 = vmul.bf16 %v8762_v10, %v8985_v3 }
 0x140   : > { %11581 = vst [vmem:[#allocation34_spill] sm:$0xff] %v9012_v44  ;;  %v11586_v13 = vrot.slane %v8752_v7, 1  ;;  %v2806_v50 = vshrl.u32 %v8850_v9, 16  ;;  %v1929_v7 = vmul.bf16 %v8841_v29, %v9012_v44  ;;  %v818_v9 = vld [vmem:[#allocation2 + $0x18] sm:$0xf] }
 0x141   : > { %3177 = vrot.lane.b32.xlu1 %v8949_v55, %s7366_s15  ;;  %3323 = vrot.lane.b32.xlu0 %v3292_v61, %s7367_s16  ;;  %v9006_v61 = vrot.slane %v11578_v1, %v7827_v12  ;;  %v9021_v1 = vrot.slane %v1617_v38, 7  ;;  %v2810_v38 = vshll.u32 %v9002_v57, 16  ;;  %v6711_v49 = vcombine.low %v1232_v11, %v1233_v45  ;;  %v11588_v45 = vld [vmem:[#allocation23_spill] sm:$0xff] }
 0x142   : > { %v2476_v35 = vsel %vm2453_vm0, %v11586_v13, %v2475_v51  ;;  %v9046_v13 = vrot.slane %v1641_v34, 7  ;;  %v11587_v5 = vrot.slane %v8979_v56, 1  ;;  %v1962_v11 = vmul.bf16 %v8834_v16, %v8928_v0 }
 0x143   : > { %v8977_v8 = vpop.permute.xlu1 %2605  ;;  %v8988_v17 = vpop.permute.xlu0 %2850  ;;  %v1926_v10 = vmul.bf16 %v8760_v59, %v9006_v61  ;;  %v2808_v25 = vor.u32 %v2806_v50, %v8904_v33  ;;  %v3348_v26 = vsel %vm3339_vm4, %v6711_v49, %v8893_v4  ;;  %v11591_v4 = vld [vmem:[#allocation39_spill] sm:$0xff] }
 0x144   : > { %v2478_v19 = vsel %vm2453_vm0, %v2475_v51, %v11587_v5  ;;  %v2812_v5 = vrot.slane %v2810_v38, 1  ;;  %v6803_v51 = vcombine.low %v1962_v11, %v1963_v46  ;;  %v1798_v46 = vrot.slane %v9046_v13, 4  ;;  %v9085_v11 = vld [vmem:[#allocation2 + $0x70] sm:$0xf] }
 0x145   : > { %2358 = vrot.lane.b32.xlu1 %v2297_v37, %s7360_s24  ;;  %v11579_v37 = vld [vmem:[#allocation35_spill] sm:$0xff]  ;;  %3325 = vrot.lane.b32.xlu0 %v3294_v41, %s7367_s16  ;;  %v819_v41 = vld [vmem:[#allocation2 + $0x1c] sm:$0xf]  ;;  %v6769_v34 = vcombine.low %v1926_v10, %v1927_v40  ;;  %v3394_v50 = vsel %vm3388_vm6, %v3348_v26, %v8944_v39  ;;  %v1653_v49 = vrot.slane %v11591_v4, %v7827_v12 }
 0x146   : > { %v1629_v24 = vrot.slane %v11579_v37, %v7827_v12  ;;  %v9025_v37 = vrot.slane %v11584_v18, %v7827_v12  ;;  %v1235_v59 = vmul.bf16 %v11588_v45, %v819_v41  ;;  %v11589_v41 = vld [vmem:[#allocation24_spill] sm:$0xff]  ;;  %v2982_v39 = vrot.slane %v6803_v51, 1 }
 0x147   : > { %v9016_v14 = vpop.permute.xlu1 %2852  ;;  %v2999_v27 = vpop.permute.xlu0 %2998  ;;  %v1234_v45 = vmul.bf16 %v11589_v41, %v818_v9  ;;  %v3427_v9 = vsel %vm3421_vm7, %v3394_v50, %v8964_v63 }
 0x148   : > { %11585 = vst [vmem:[#allocation36_spill] sm:$0xff] %v9025_v37  ;;  %v9037_v18 = vrot.slane %v1629_v24, 7  ;;  %v1792_v24 = vrot.slane %v9021_v1, 4  ;;  %v1928_v47 = vmul.bf16 %v8834_v16, %v9025_v37  ;;  %v3460_v26 = vsel %vm3454_vm8, %v3427_v9, %v8988_v17 }
 0x149   : > { %2360 = vrot.lane.b32.xlu1 %v2305_v42, %s7360_s24  ;;  %2507 = vrot.lane.b32.xlu0 %v2476_v35, %s7363_s12  ;;  %v1965_v35 = vmul.bf16 %v8993_v22, %v8940_v60  ;;  %v6712_v10 = vcombine.low %v1234_v45, %v1235_v59  ;;  %v1996_v17 = vmul.bf16 %v8841_v29, %v8985_v3 }
 0x14a   : > { %v6770_v40 = vcombine.low %v1928_v47, %v1929_v7  ;;  %v9071_v33 = vsel %vm7884_vm15, %v1792_v24, %v9037_v18  ;;  %v1995_v7 = vmul.bf16 %v8834_v16, %v9006_v61  ;;  %v9087_v24 = vld [vmem:[#allocation2 + $0x74] sm:$0xf]  ;;  %v3493_v16 = vsel %vm3487_vm9, %v3460_v26, %v2999_v27  ;;  %v9112_v27 = vld [vmem:[#allocation2 + $0x68] sm:$0xf] }
 0x14b   : > { %v9040_v42 = vpop.permute.xlu1 %3000  ;;  %v3111_v30 = vpop.permute.xlu0 %3110  ;;  %11590 = vst [vmem:[#allocation33_spill] sm:$0xff] %v9071_v33  ;;  %v9076_v38 = vcombine.low %v1964_v62, %v1965_v35  ;;  %v9092_v62 = vsel %vm2205_vm12, %v2808_v25, %v2812_v5  ;;  %v9096_v63 = vcombine.low %v9085_v11, %v9087_v24  ;;  %v3351_v35 = vsel %vm3339_vm4, %v6712_v10, %v8921_v31 }
 0x14c   : > { %v1997_v25 = vmul.bf16 %v8991_v53, %v9025_v37  ;;  %v3396_v59 = vsel %vm3388_vm6, %v3351_v35, %v8959_v43  ;;  %v2814_v31 = vshrl.u32 %v9002_v57, 16  ;;  %v2032_v43 = vmul.bf16 %v8993_v22, %v8917_v54  ;;  %v9294_v54 = vld [vmem:[#allocation2 + $0x84] sm:$0xf] }
 0x14d   : > { %2509 = vrot.lane.b32.xlu1 %v2478_v19, %s7363_s12  ;;  %2619 = vrot.lane.b32.xlu0 %v6769_v34, %s7362_s26  ;;  %v3526_v34 = vsel %vm3520_vm11, %v3493_v16, %v3111_v30  ;;  %v11418_v51 = vrot.slane %v9076_v38, 1  ;;  %v11592_v10 = vrot.slane %v8832_v21, 1  ;;  %v2818_v9 = vshll.u32 %v9096_v63, 16 }
 0x14e   : > { %v2031_v21 = vmul.bf16 %v8991_v53, %v8928_v0 }
 0x14f   : > { %v3113_v19 = vpop.permute.xlu1 %3112  ;;  %v3164_v47 = vpop.permute.xlu0 %3163 }
 0x150   : > { %v3559_v29 = vsel %vm3553_vm13, %v3526_v34, %v3164_v47  ;;  %v9129_v47 = vrot.slane %v1653_v49, 7  ;;  %v2985_v49 = vsel %vm2453_vm0, %v2982_v39, %v11418_v51  ;;  %v11605_v51 = vld [vmem:[#allocation31_spill] sm:$0xff] }
 0x151   : > { %2621 = vrot.lane.b32.xlu1 %v6770_v40, %s7362_s26  ;;  %2866 = vrot.lane.b32.xlu0 %v8949_v55, %s7361_s25  ;;  %v1287_v40 = vld [vmem:[#allocation2 + $0x6c] sm:$0xf]  ;;  %v3429_v55 = vsel %vm3421_vm7, %v3396_v59, %v8977_v8  ;;  %v2983_v8 = vsel %vm2453_vm0, %v11592_v10, %v2982_v39  ;;  %v6819_v59 = vcombine.low %v1995_v7, %v1996_v17  ;;  %v1289_v10 = vld [vmem:[#allocation2 + $0x74] sm:$0xf]  ;;  %v1795_v17 = vrot.slane %v9037_v18, 4 }
 0x152   : > { %v6738_v30 = vcombine.low %v9112_v27, %v1287_v40  ;;  %v3462_v57 = vsel %vm3454_vm8, %v3429_v55, %v9016_v14  ;;  %v1998_v14 = vmul.bf16 %v8993_v22, %v9012_v44  ;;  %v2034_v39 = vmul.bf16 %v9087_v24, %v8940_v60 }
 0x153   : > { %v3166_v45 = vpop.permute.xlu1 %3165  ;;  %v3312_v50 = vpop.permute.xlu0 %3311  ;;  %v3495_v26 = vsel %vm3487_vm9, %v3462_v57, %v9040_v42  ;;  %v2306_v42 = vshrl.u32 %v8910_v6, 16  ;;  %v1868_v18 = vmul.bf16 %v9071_v33, %v1287_v40 }
 0x154   : > { %v3592_v4 = vsel %vm3586_vm14, %v3559_v29, %v3312_v50  ;;  %v3528_v16 = vsel %vm3520_vm11, %v3495_v26, %v3113_v19  ;;  %v2816_v29 = vor.u32 %v2814_v31, %v2812_v5  ;;  %v6838_v50 = vcombine.low %v2031_v21, %v2032_v43 }
 0x155   : > { %2868 = vrot.lane.b32.xlu1 %v9092_v62, %s7361_s25  ;;  %3014 = vrot.lane.b32.xlu0 %v2983_v8, %s7364_s13  ;;  %v3561_v34 = vsel %vm3553_vm13, %v3528_v16, %v3166_v45  ;;  %v2310_v57 = vshll.u32 %v6738_v30, 16  ;;  %v9149_v19 = vrot.slane %v2818_v9, 1  ;;  %v6820_v5 = vcombine.low %v1997_v25, %v1998_v14 }
 0x156   : > { %7190 = vmatprep.mubr.msk.bf16.mxu0 %vm3639_vm1, %v3592_v4  ;;  %v1288_v4 = vld [vmem:[#allocation2 + $0x70] sm:$0xf]  ;;  %v9164_v45 = vsel %vm7884_vm15, %v1789_v52, %v9021_v1  ;;  %v9172_v31 = vsel %vm7884_vm15, %v1798_v46, %v9129_v47  ;;  %v2033_v43 = vmul.bf16 %v9085_v11, %v8935_v23  ;;  %v3295_v28 = vrot.slane %v6838_v50, 1 }
 0x157   : > { %v9135_v35 = vpop.permute.xlu1 %2346  ;;  %v3314_v55 = vpop.permute.xlu0 %3313  ;;  %v9153_v7 = vcombine.low %v1288_v4, %v1289_v10  ;;  %11593 = vst [vmem:[#allocation35_spill] sm:$0xff] %v9164_v45  ;;  %11594 = vst [vmem:[#allocation40_spill] sm:$0xff] %v9172_v31  ;;  %v2308_v52 = vor.u32 %v2306_v42, %v8974_v36  ;;  %v2312_v1 = vrot.slane %v2310_v57, 1  ;;  %v9183_v9 = vsel %vm2205_vm12, %v2816_v29, %v9149_v19  ;;  %v821_v57 = vld [vmem:[#allocation2 + $0x24] sm:$0xf] }
 0x158   : > { %v3594_v8 = vsel %vm3586_vm14, %v3561_v34, %v3314_v55  ;;  %v9185_v26 = vcombine.low %v2033_v43, %v2034_v39  ;;  %v2314_v46 = vshrl.u32 %v6738_v30, 16  ;;  %v9191_v21 = vsel %vm7884_vm15, %v1795_v17, %v9046_v13  ;;  %v9226_v39 = vld [vmem:[#allocation2 + $0x7c] sm:$0xf] }
 0x159   : > { %3016 = vrot.lane.b32.xlu1 %v2985_v49, %s7364_s13  ;;  %3126 = vrot.lane.b32.xlu0 %v6819_v59, %s7365_s14  ;;  %v2318_v14 = vshll.u32 %v9153_v7, 16  ;;  %11595 = vst [vmem:[#allocation38_spill] sm:$0xff] %v9191_v21  ;;  %v1867_v40 = vmul.bf16 %v9164_v45, %v9112_v27  ;;  %v1870_v16 = vmul.bf16 %v9172_v31, %v1289_v10  ;;  %v11596_v30 = vrot.slane %v8952_v58, 1 }
 0x15a   : > { %7191 = vmatmul.mubr.msk.bf16.gmra.mrb[4].mxu0 %vm3639_vm1, %v3594_v8  ;;  %v2313_v59 = vsel %vm2205_vm12, %v2308_v52, %v2312_v1  ;;  %v2316_v34 = vor.u32 %v2314_v46, %v2312_v1  ;;  %v1869_v27 = vmul.bf16 %v9191_v21, %v1288_v4  ;;  %v9219_v58 = vrot.slane %v8499_v15, %v7827_v12  ;;  %v9224_v8 = vld [vmem:[#allocation2 + $0x78] sm:$0xf]  ;;  %v820_v1 = vld [vmem:[#allocation2 + $0x20] sm:$0xf]  ;;  %v11600_v46 = vld [vmem:[#allocation29_spill] sm:$0xff] }
 0x15b   : > { %v9157_v6 = vpop.permute.xlu1 %2348  ;;  %v9176_v25 = vpop.permute.xlu0 %2495  ;;  %v3296_v13 = vsel %vm2453_vm0, %v11596_v30, %v3295_v28  ;;  %v6755_v42 = vcombine.low %v1867_v40, %v1868_v18  ;;  %v9209_v55 = vrot.slane %v2318_v14, 1  ;;  %v9235_v15 = vcombine.low %v9224_v8, %v9226_v39 }
 0x15c   : > { %v9215_v50 = vcombine.low %v1869_v27, %v1870_v16  ;;  %11597 = vst [vmem:[#allocation37_spill] sm:$0xff] %v9219_v58  ;;  %v9239_v43 = vrot.slane %v8464_v48, %v7827_v12  ;;  %v9243_v52 = vrot.slane %v8525_v32, %v7827_v12  ;;  %v1665_v18 = vrot.slane %v8466_v20, %v7827_v12  ;;  %v11601_v16 = vld [vmem:[#allocation45_spill] sm:$0xff]  ;;  %v823_v20 = vld [vmem:[#allocation2 + $0x2c] sm:$0xf] }
 0x15d   : > { %3128 = vrot.lane.b32.xlu1 %v6820_v5, %s7365_s14  ;;  %3179 = vrot.lane.b32.xlu0 %v9092_v62, %s7366_s15  ;;  %v11417_v62 = vrot.slane %v9185_v26, 1  ;;  %v2321_v5 = vsel %vm2205_vm12, %v2316_v34, %v9209_v55  ;;  %v2479_v17 = vrot.slane %v6755_v42, 1  ;;  %v1237_v14 = vmul.bf16 %v11600_v46, %v821_v57 }
 0x15e   : > { %11598 = vst [vmem:[#allocation24_spill] sm:$0xff] %v9239_v43  ;;  %11599 = vst [vmem:[#allocation39_spill] sm:$0xff] %v9243_v52  ;;  %v11425_v40 = vrot.slane %v9215_v50, 1  ;;  %v9254_v48 = vrot.slane %v11601_v16, %v7827_v12  ;;  %v1931_v32 = vmul.bf16 %v8993_v22, %v9219_v58  ;;  %v11604_v34 = vrot.slane %v8979_v56, 1 }
 0x15f   : > { %v9195_v36 = vpop.permute.xlu1 %2497  ;;  %v9200_v49 = vpop.permute.xlu0 %2607  ;;  %v3298_v4 = vsel %vm2453_vm0, %v3295_v28, %v11417_v62  ;;  %v2822_v57 = vshrl.u32 %v9096_v63, 16  ;;  %v1930_v22 = vmul.bf16 %v8991_v53, %v9239_v43  ;;  %v1933_v16 = vmul.bf16 %v9087_v24, %v9243_v52  ;;  %v822_v62 = vld [vmem:[#allocation2 + $0x28] sm:$0xf] }
 0x160   : > { %11602 = vst [vmem:[#allocation45_spill] sm:$0xff] %v9254_v48  ;;  %v2480_v27 = vsel %vm2453_vm0, %v11604_v34, %v2479_v17  ;;  %v9276_v56 = vrot.slane %v1665_v18, 7  ;;  %v2482_v63 = vsel %vm2453_vm0, %v2479_v17, %v11425_v40  ;;  %v1239_v60 = vmul.bf16 %v11605_v51, %v823_v20  ;;  %v9292_v40 = vld [vmem:[#allocation2 + $0x80] sm:$0xf] }
 0x161   : > { %3181 = vrot.lane.b32.xlu1 %v9183_v9, %s7366_s15  ;;  %3327 = vrot.lane.b32.xlu0 %v3296_v13, %s7367_s16  ;;  %v1967_v13 = vmul.bf16 %v9087_v24, %v9071_v33  ;;  %v6771_v23 = vcombine.low %v1930_v22, %v1931_v32  ;;  %v1932_v0 = vmul.bf16 %v9085_v11, %v9254_v48 }
 0x162   : > { %v1968_v17 = vmul.bf16 %v9224_v8, %v9191_v21  ;;  %v1804_v46 = vrot.slane %v9276_v56, 4 }
 0x163   : > { %v9213_v29 = vpop.permute.xlu1 %2609  ;;  %v9221_v10 = vpop.permute.xlu0 %2854 }
 0x165   : > { %2362 = vrot.lane.b32.xlu1 %v2313_v59, %s7360_s24  ;;  %3329 = vrot.lane.b32.xlu0 %v3298_v4, %s7367_s16  ;;  %v11603_v59 = vld [vmem:[#allocation30_spill] sm:$0xff]  ;;  %v2826_v4 = vshll.u32 %v9235_v15, 16 }
 0x166   : > { %v1236_v42 = vmul.bf16 %v11603_v59, %v820_v1  ;;  %v1966_v1 = vmul.bf16 %v9085_v11, %v9164_v45 }
 0x167   : > { %v9246_v28 = vpop.permute.xlu1 %2856  ;;  %v3003_v30 = vpop.permute.xlu0 %3002 }
 0x168   : > { %v6713_v34 = vcombine.low %v1236_v42, %v1237_v14  ;;  %v6805_v18 = vcombine.low %v1966_v1, %v1967_v13  ;;  %v2824_v14 = vor.u32 %v2822_v57, %v9149_v19  ;;  %v9288_v42 = vrot.slane %v2826_v4, 1 }
 0x169   : > { %2364 = vrot.lane.b32.xlu1 %v2321_v5, %s7360_s24  ;;  %2511 = vrot.lane.b32.xlu0 %v2480_v27, %s7363_s12  ;;  %v1969_v27 = vmul.bf16 %v9226_v39, %v9172_v31  ;;  %v6772_v13 = vcombine.low %v1932_v0, %v1933_v16  ;;  %v9302_v19 = vcombine.low %v9292_v40, %v9294_v54  ;;  %v11607_v16 = vld [vmem:[#allocation47_spill] sm:$0xff] }
 0x16a   : > { %v3354_v20 = vsel %vm3339_vm4, %v6713_v34, %v9135_v35  ;;  %v2986_v0 = vrot.slane %v6805_v18, 1  ;;  %v1677_v34 = vrot.slane %v11607_v16, %v7827_v12 }
 0x16b   : > { %v9268_v5 = vpop.permute.xlu1 %3004  ;;  %v3115_v53 = vpop.permute.xlu0 %3114  ;;  %v3398_v4 = vsel %vm3388_vm6, %v3354_v20, %v9176_v25  ;;  %v9307_v1 = vcombine.low %v1968_v17, %v1969_v27  ;;  %v9319_v25 = vsel %vm2205_vm12, %v2824_v14, %v9288_v42  ;;  %v1999_v17 = vmul.bf16 %v9085_v11, %v9239_v43 }
 0x16c   : > { %v11608_v11 = vrot.slane %v9076_v38, 1 }
 0x16d   : > { %2513 = vrot.lane.b32.xlu1 %v2482_v63, %s7363_s12  ;;  %v11606_v63 = vld [vmem:[#allocation32_spill] sm:$0xff]  ;;  %2623 = vrot.lane.b32.xlu0 %v6771_v23, %s7362_s26 }
 0x16e   : > { %v1238_v32 = vmul.bf16 %v11606_v63, %v822_v62  ;;  %v3431_v62 = vsel %vm3421_vm7, %v3398_v4, %v9200_v49  ;;  %v1291_v4 = vld [vmem:[#allocation2 + $0x7c] sm:$0xf] }
 0x16f   : > { %v3117_v22 = vpop.permute.xlu1 %3116  ;;  %v3168_v23 = vpop.permute.xlu0 %3167  ;;  %v3464_v57 = vsel %vm3454_vm8, %v3431_v62, %v9221_v10  ;;  %v2834_v10 = vshll.u32 %v9302_v19, 16 }
 0x170   : > { %v6714_v35 = vcombine.low %v1238_v32, %v1239_v60  ;;  %v2038_v60 = vmul.bf16 %v9294_v54, %v9172_v31  ;;  %v3497_v27 = vsel %vm3487_vm9, %v3464_v57, %v3003_v30  ;;  %v11429_v32 = vrot.slane %v9307_v1, 1  ;;  %v1290_v57 = vld [vmem:[#allocation2 + $0x78] sm:$0xf] }
 0x171   : > { %2625 = vrot.lane.b32.xlu1 %v6772_v13, %s7362_s26  ;;  %2870 = vrot.lane.b32.xlu0 %v9183_v9, %s7361_s25  ;;  %v3530_v20 = vsel %vm3520_vm11, %v3497_v27, %v3115_v53  ;;  %v2036_v53 = vmul.bf16 %v9226_v39, %v9071_v33  ;;  %v6740_v62 = vcombine.low %v1290_v57, %v1291_v4  ;;  %v1292_v27 = vld [vmem:[#allocation2 + $0x80] sm:$0x1] }
 0x172   : > { %v3357_v49 = vsel %vm3339_vm4, %v6714_v35, %v9157_v6  ;;  %v2000_v6 = vmul.bf16 %v9087_v24, %v9219_v58  ;;  %v3563_v9 = vsel %vm3553_vm13, %v3530_v20, %v3168_v23  ;;  %v2830_v35 = vshrl.u32 %v9235_v15, 16 }
 0x173   : > { %v3170_v18 = vpop.permute.xlu1 %3169  ;;  %v3400_v14 = vsel %vm3388_vm6, %v3357_v49, %v9195_v36  ;;  %v3316_v13 = vpop.permute.xlu0 %3315  ;;  %v2987_v36 = vsel %vm2453_vm0, %v11608_v11, %v2986_v0  ;;  %v1805_v23 = vrot.slane %v1677_v34, 7  ;;  %v2002_v49 = vmul.bf16 %v9226_v39, %v9243_v52 }
 0x174   : > { %v3433_v30 = vsel %vm3421_vm7, %v3400_v14, %v9213_v29  ;;  %v3596_v29 = vsel %vm3586_vm14, %v3563_v9, %v3316_v13  ;;  %v2989_v34 = vsel %vm2453_vm0, %v2986_v0, %v11429_v32  ;;  %v6741_v14 = vcombine.low %v1292_v27, %v1292_v27 }
 0x175   : > { %2872 = vrot.lane.b32.xlu1 %v9319_v25, %s7361_s25  ;;  %v3466_v24 = vsel %vm3454_vm8, %v3433_v30, %v9246_v28  ;;  %3018 = vrot.lane.b32.xlu0 %v2987_v36, %s7364_s13  ;;  %v2035_v28 = vmul.bf16 %v9224_v8, %v9164_v45  ;;  %v2001_v9 = vmul.bf16 %v9224_v8, %v9254_v48  ;;  %v2322_v11 = vshrl.u32 %v9153_v7, 16  ;;  %v11626_v45 = vld [vmem:[#allocation50_spill] sm:$0xff] }
 0x176   : > { %v3499_v16 = vsel %vm3487_vm9, %v3466_v24, %v9268_v5  ;;  %7194 = vmatprep.mubr.msk.bf16.mxu0 %vm3639_vm1, %v3596_v29  ;;  %v6821_v5 = vcombine.low %v1999_v17, %v2000_v6  ;;  %v9372_v24 = vrot.slane %v2834_v10, 1  ;;  %v2326_v0 = vshll.u32 %v6740_v62, 16 }
 0x177   : > { %v9355_v38 = vpop.permute.xlu1 %2350  ;;  %v3532_v15 = vsel %vm3520_vm11, %v3499_v16, %v3117_v22  ;;  %v3318_v30 = vpop.permute.xlu0 %3317  ;;  %v6840_v13 = vcombine.low %v2035_v28, %v2036_v53  ;;  %v2832_v22 = vor.u32 %v2830_v35, %v9288_v42  ;;  %v9376_v17 = vsel %vm7884_vm15, %v1804_v46, %v1805_v23 }
 0x178   : > { %v3565_v20 = vsel %vm3553_vm13, %v3532_v15, %v3170_v18  ;;  %11609 = vst [vmem:[#allocation30_spill] sm:$0xff] %v9376_v17  ;;  %v6822_v6 = vcombine.low %v2001_v9, %v2002_v49  ;;  %v2037_v7 = vmul.bf16 %v9292_v40, %v9191_v21  ;;  %v11610_v42 = vrot.slane %v9129_v47, 4 }
 0x179   : > { %3020 = vrot.lane.b32.xlu1 %v2989_v34, %s7364_s13  ;;  %v3598_v36 = vsel %vm3586_vm14, %v3565_v20, %v3318_v30  ;;  %3130 = vrot.lane.b32.xlu0 %v6821_v5, %s7365_s14  ;;  %v9391_v53 = vrot.slane %v1805_v23, 4  ;;  %v3299_v29 = vrot.slane %v6840_v13, 1  ;;  %v2324_v35 = vor.u32 %v2322_v11, %v9209_v55  ;;  %v11614_v30 = vld [vmem:[#allocation52_spill] sm:$0xff] }
 0x17a   : > { %7195 = vmatmul.mubr.msk.bf16.gmra.mrb[8].mxu0 %vm3639_vm1, %v3598_v36  ;;  %v9389_v10 = vsel %vm7884_vm15, %v11610_v42, %v9276_v56  ;;  %v9397_v16 = vcombine.low %v2037_v7, %v2038_v60  ;;  %v2330_v49 = vshrl.u32 %v6740_v62, 16  ;;  %v9401_v28 = vsel %vm2205_vm12, %v2832_v22, %v9372_v24  ;;  %v1938_v36 = vld [vmem:[#allocation2 + $0x88] sm:$0x1]  ;;  %v825_v22 = vld [vmem:[#allocation2 + $0x34] sm:$0xf] }
 0x17b   : > { %v9380_v18 = vpop.permute.xlu1 %2352  ;;  %11611 = vst [vmem:[#allocation31_spill] sm:$0xff] %v9389_v10  ;;  %11612 = vst [vmem:[#allocation32_spill] sm:$0xff] %v9391_v53  ;;  %v9393_v46 = vpop.permute.xlu0 %2499  ;;  %v2328_v47 = vrot.slane %v2326_v0, 1  ;;  %v2334_v2 = vshll.u32 %v6741_v14, 16  ;;  %v1872_v56 = vmul.bf16 %v9376_v17, %v1291_v4  ;;  %v1871_v15 = vmul.bf16 %v9389_v10, %v1290_v57 }
 0x17c   : > { %v1873_v55 = vmul.bf16 %v9391_v53, %v1292_v27  ;;  %v11613_v62 = vrot.slane %v9185_v26, 1  ;;  %v11428_v4 = vrot.slane %v9397_v16, 1  ;;  %v9424_v9 = vrot.slane %v11614_v30, %v7827_v12  ;;  %v11616_v26 = vld [vmem:[#allocation51_spill] sm:$0xff] }
 0x17d   : > { %3132 = vrot.lane.b32.xlu1 %v6822_v6, %s7365_s14  ;;  %3183 = vrot.lane.b32.xlu0 %v9319_v25, %s7366_s15  ;;  %v2329_v5 = vsel %vm2205_vm12, %v2324_v35, %v2328_v47  ;;  %v2332_v25 = vor.u32 %v2330_v49, %v2328_v47  ;;  %v2336_v14 = vrot.slane %v2334_v2, 1  ;;  %v6757_v20 = vcombine.low %v1871_v15, %v1872_v56  ;;  %v11618_v35 = vld [vmem:[#allocation54_spill] sm:$0xff]  ;;  %v11620_v47 = vld [vmem:[#allocation53_spill] sm:$0xff] }
 0x17e   : > { %v3300_v34 = vsel %vm2453_vm0, %v11613_v62, %v3299_v29  ;;  %v6758_v27 = vcombine.low %v1873_v55, %v1873_v55  ;;  %11615 = vst [vmem:[#allocation47_spill] sm:$0xff] %v9424_v9  ;;  %v9428_v13 = vrot.slane %v11616_v26, %v7827_v12  ;;  %v3302_v0 = vsel %vm2453_vm0, %v3299_v29, %v11428_v4  ;;  %v824_v15 = vld [vmem:[#allocation2 + $0x30] sm:$0xf] }
 0x17f   : > { %v9406_v23 = vpop.permute.xlu1 %2501  ;;  %v9410_v60 = vpop.permute.xlu0 %2611  ;;  %v2337_v6 = vsel %vm2205_vm12, %v2332_v25, %v2336_v14  ;;  %v2483_v7 = vrot.slane %v6757_v20, 1  ;;  %v6791_v42 = vcombine.low %v1938_v36, %v1938_v36  ;;  %v9437_v49 = vrot.slane %v11618_v35, %v7827_v12  ;;  %v11622_v62 = vld [vmem:[#allocation46_spill] sm:$0xff]  ;;  %v827_v14 = vld [vmem:[#allocation2 + $0x3c] sm:$0xf] }
 0x180   : > { %11617 = vst [vmem:[#allocation52_spill] sm:$0xff] %v9428_v13  ;;  %v9441_v2 = vrot.slane %v11620_v47, %v7827_v12  ;;  %v2485_v55 = vrot.slane %v6758_v27, 1  ;;  %v1241_v29 = vmul.bf16 %v11622_v62, %v825_v22  ;;  %v1935_v25 = vmul.bf16 %v9226_v39, %v9424_v9  ;;  %v11624_v22 = vld [vmem:[#allocation48_spill] sm:$0xff] }
 0x181   : > { %3185 = vrot.lane.b32.xlu1 %v9401_v28, %s7366_s15  ;;  %3331 = vrot.lane.b32.xlu0 %v3300_v34, %s7367_s16  ;;  %11619 = vst [vmem:[#allocation51_spill] sm:$0xff] %v9437_v49  ;;  %v1971_v12 = vmul.bf16 %v9294_v54, %v9376_v17  ;;  %v11623_v20 = vrot.slane %v9215_v50, 1  ;;  %v2838_v27 = vshrl.u32 %v9302_v19, 16  ;;  %v2842_v26 = vshll.u32 %v6791_v42, 16  ;;  %v826_v50 = vld [vmem:[#allocation2 + $0x38] sm:$0xf] }
 0x182   : > { %11621 = vst [vmem:[#allocation54_spill] sm:$0xff] %v9441_v2  ;;  %v1937_v39 = vmul.bf16 %v9294_v54, %v9437_v49  ;;  %v1970_v35 = vmul.bf16 %v9292_v40, %v9389_v10  ;;  %v2486_v47 = vsel %vm2453_vm0, %v2483_v7, %v2485_v55  ;;  %v1972_v19 = vmul.bf16 %v1938_v36, %v9391_v53  ;;  %v1973_v55 = vld [vmem:[#allocation2 + $0x88] sm:$0xf] }
 0x183   : > { %v9420_v57 = vpop.permute.xlu1 %2613  ;;  %v2859_v11 = vpop.permute.xlu0 %2858  ;;  %v2484_v30 = vsel %vm2453_vm0, %v11623_v20, %v2483_v7  ;;  %v11625_v20 = vld [vmem:[#allocation49_spill] sm:$0xff]  ;;  %v9471_v21 = vor.u32 %v2838_v27, %v9372_v24  ;;  %v2844_v31 = vrot.slane %v2842_v26, 1  ;;  %v1242_v62 = vmul.bf16 %v11626_v45, %v826_v50  ;;  %v2007_v26 = vld [vmem:[#allocation2 + $0x90] sm:$0x1] }
 0x184   : > { %v6807_v32 = vcombine.low %v1970_v35, %v1971_v12 }
 0x185   : > { %2366 = vrot.lane.b32.xlu1 %v2329_v5, %s7360_s24  ;;  %3333 = vrot.lane.b32.xlu0 %v3302_v0, %s7367_s16  ;;  %v1934_v5 = vmul.bf16 %v9224_v8, %v9428_v13  ;;  %v1240_v0 = vmul.bf16 %v11624_v22, %v824_v15  ;;  %v1936_v8 = vmul.bf16 %v9292_v40, %v9441_v2 }
 0x186   : > { %v1243_v15 = vmul.bf16 %v11625_v20, %v827_v14 }
 0x187   : > { %v9444_v56 = vpop.permute.xlu1 %2860  ;;  %v3007_v34 = vpop.permute.xlu0 %3006  ;;  %v6715_v42 = vcombine.low %v1240_v0, %v1241_v29  ;;  %v6774_v7 = vcombine.low %v1936_v8, %v1937_v39  ;;  %v1974_v29 = vld [vmem:[#allocation2 + $0x8c] sm:$0xf]  ;;  %v2845_v8 = vsel %vm2205_vm12, %v9471_v21, %v2844_v31  ;;  %v2003_v39 = vmul.bf16 %v9292_v40, %v9428_v13 }
 0x188   : > { %v6716_v12 = vcombine.low %v1242_v62, %v1243_v15  ;;  %v2040_v15 = vmul.bf16 %v1974_v29, %v9376_v17 }
 0x189   : > { %2368 = vrot.lane.b32.xlu1 %v2337_v6, %s7360_s24  ;;  %2515 = vrot.lane.b32.xlu0 %v2484_v30, %s7363_s12  ;;  %v6773_v30 = vcombine.low %v1934_v5, %v1935_v25  ;;  %v3360_v33 = vsel %vm3339_vm4, %v6715_v42, %v9355_v38  ;;  %v6808_v5 = vcombine.low %v1972_v19, %v1972_v19  ;;  %v2990_v38 = vrot.slane %v6807_v32, 1  ;;  %s7368_s24 = smov 48  }
 0x18a   : > { %v3402_v14 = vsel %vm3388_vm6, %v3360_v33, %v9393_v46  ;;  %v6825_v25 = vcombine.low %v1973_v55, %v1974_v29  ;;  %v6826_v33 = vcombine.low %v2007_v26, %v2007_v26  ;;  %v3363_v46 = vsel %vm3339_vm4, %v6716_v12, %v9380_v18 }
 0x18b   : > { %v3009_v6 = vpop.permute.xlu1 %3008  ;;  %v3119_v4 = vpop.permute.xlu0 %3118  ;;  %v3435_v24 = vsel %vm3421_vm7, %v3402_v14, %v9410_v60  ;;  %v2004_v32 = vmul.bf16 %v9294_v54, %v9424_v9  ;;  %v3404_v31 = vsel %vm3388_vm6, %v3363_v46, %v9406_v23  ;;  %v2992_v35 = vrot.slane %v6808_v5, 1 }
 0x18c   : > { %v3468_v0 = vsel %vm3454_vm8, %v3435_v24, %v2859_v11  ;;  %v2005_v11 = vmul.bf16 %v1973_v55, %v9441_v2  ;;  %v3147_v50 = vshll.u32 %v6825_v25, 16  ;;  %v3437_v18 = vsel %vm3421_vm7, %v3404_v31, %v9420_v57 }
 0x18d   : > { %2517 = vrot.lane.b32.xlu1 %v2486_v47, %s7363_s12  ;;  %2627 = vrot.lane.b32.xlu0 %v6773_v30, %s7362_s26  ;;  %v3501_v62 = vsel %vm3487_vm9, %v3468_v0, %v3007_v34  ;;  %v3151_v19 = vshrl.u32 %v6825_v25, 16  ;;  %v3470_v23 = vsel %vm3454_vm8, %v3437_v18, %v9444_v56  ;;  %v3155_v42 = vshll.u32 %v6826_v33, 16 }
 0x18e   : > { %v3534_v40 = vsel %vm3520_vm11, %v3501_v62, %v3119_v4  ;;  %v3503_v57 = vsel %vm3487_vm9, %v3470_v23, %v3009_v6  ;;  %v2993_v56 = vsel %vm2453_vm0, %v2990_v38, %v2992_v35  ;;  %v3149_v5 = vrot.slane %v3147_v50, 1  ;;  %v829_v50 = vld [vmem:[#allocation2 + $0x44] sm:$0xf]  ;;  %v11630_v23 = vld [vmem:[#allocation59_spill] sm:$0xff] }
 0x18f   : > { %v3121_v36 = vpop.permute.xlu1 %3120  ;;  %v3172_v27 = vpop.permute.xlu0 %3171  ;;  %v2041_v25 = vmul.bf16 %v2007_v26, %v9391_v53  ;;  %v6823_v6 = vcombine.low %v2003_v39, %v2004_v32  ;;  %v11628_v31 = vrot.slane %v9397_v16, 1 }
 0x190   : > { %v3567_v34 = vsel %vm3553_vm13, %v3534_v40, %v3172_v27  ;;  %v3536_v14 = vsel %vm3520_vm11, %v3503_v57, %v3121_v36  ;;  %v3153_v0 = vor.u32 %v3151_v19, %v3149_v5  ;;  %v831_v19 = vld [vmem:[#allocation2 + $0x4c] sm:$0xf]  ;;  %v11631_v57 = vld [vmem:[#allocation60_spill] sm:$0xff] }
 0x191   : > { %2629 = vrot.lane.b32.xlu1 %v6774_v7, %s7362_s26  ;;  %2874 = vrot.lane.b32.xlu0 %v9401_v28, %s7361_s25  ;;  %v11627_v28 = vrot.slane %v9307_v1, 1  ;;  %v2006_v1 = vmul.bf16 %v1974_v29, %v9437_v49  ;;  %v2039_v7 = vmul.bf16 %v1973_v55, %v9389_v10  ;;  %v6843_v26 = vcombine.low %v2041_v25, %v2041_v25  ;;  %s7369_s26 = smov 40  }
 0x193   : > { %v3174_v60 = vpop.permute.xlu1 %3173  ;;  %v3320_v47 = vpop.permute.xlu0 %3319  ;;  %v2991_v54 = vsel %vm2453_vm0, %v11627_v28, %v2990_v38  ;;  %v6842_v29 = vcombine.low %v2039_v7, %v2040_v15  ;;  %v6824_v55 = vcombine.low %v2005_v11, %v2006_v1  ;;  %v3150_v38 = vsel %vm2205_vm12, %v9471_v21, %v3149_v5 }
 0x194   : > { %v3600_v4 = vsel %vm3586_vm14, %v3567_v34, %v3320_v47  ;;  %v3569_v12 = vsel %vm3553_vm13, %v3536_v14, %v3174_v60  ;;  %v3305_v60 = vrot.slane %v6843_v26, 1  ;;  %v828_v34 = vld [vmem:[#allocation2 + $0x40] sm:$0xf]  ;;  %v11629_v47 = vld [vmem:[#allocation58_spill] sm:$0xff]  ;;  %v1247_v1 = vmul.bf16 %v11631_v57, %v831_v19 }
 0x195   : > { %2876 = vrot.lane.b32.xlu1 %v2845_v8, %s7361_s25  ;;  %3022 = vrot.lane.b32.xlu0 %v2991_v54, %s7364_s13  ;;  %v3157_v8 = vrot.slane %v3155_v42, 1  ;;  %v3303_v46 = vrot.slane %v6842_v29, 1  ;;  %v1245_v28 = vmul.bf16 %v11629_v47, %v829_v50  ;;  %v830_v42 = vld [vmem:[#allocation2 + $0x48] sm:$0xf] }
 0x196   : > { %7198 = vmatprep.mubr.msk.bf16.mxu0 %vm3639_vm1, %v3600_v4  ;;  %v1244_v4 = vmul.bf16 %v11630_v23, %v828_v34 }
 0x197   : > { %v2355_v30 = vpop.permute.xlu1 %2354  ;;  %v3322_v24 = vpop.permute.xlu0 %3321  ;;  %v3158_v39 = vsel %vm2205_vm12, %v3153_v0, %v3157_v8  ;;  %v3304_v11 = vsel %vm2453_vm0, %v11628_v31, %v3303_v46  ;;  %v3306_v40 = vsel %vm2453_vm0, %v3303_v46, %v3305_v60 }
 0x198   : > { %v3602_v27 = vsel %vm3586_vm14, %v3569_v12, %v3322_v24  ;;  %v6717_v15 = vcombine.low %v1244_v4, %v1245_v28  ;;  %v832_v4 = vld [vmem:[#allocation2 + $0x50] sm:$0xf] }
 0x199   : > { %3024 = vrot.lane.b32.xlu1 %v2993_v56, %s7364_s13  ;;  %3134 = vrot.lane.b32.xlu0 %v6823_v6, %s7365_s14  ;;  %v11632_v56 = vld [vmem:[#allocation61_spill] sm:$0xff]  ;;  %s7370_s13 = smov 56  }
 0x19a   : > { %7199 = vmatmul.mubr.msk.bf16.gmra.mrb[12].mxu0 %vm3639_vm1, %v3602_v27  ;;  %v3366_v14 = vsel %vm3339_vm4, %v6717_v15, %v2355_v30  ;;  %v1246_v5 = vmul.bf16 %v11632_v56, %v830_v42  ;;  %v835_v15 = vld [vmem:[#allocation2 + $0x5c] sm:$0xf] }
 0x19b   : > { %v2357_v36 = vpop.permute.xlu1 %2356  ;;  %v2504_v33 = vpop.permute.xlu0 %2503 }
 0x19c   : > { %v3406_v12 = vsel %vm3388_vm6, %v3366_v14, %v2504_v33  ;;  %v6718_v24 = vcombine.low %v1246_v5, %v1247_v1  ;;  %v1248_v1 = vmul.bf16 %v9006_v61, %v832_v4  ;;  %v834_v14 = vld [vmem:[#allocation2 + $0x58] sm:$0xf] }
 0x19d   : > { %3136 = vrot.lane.b32.xlu1 %v6824_v55, %s7365_s14  ;;  %3187 = vrot.lane.b32.xlu0 %v3150_v38, %s7366_s15 }
 0x19e   : > { %v3369_v8 = vsel %vm3339_vm4, %v6718_v24, %v2357_v36 }
 0x19f   : > { %v2506_v62 = vpop.permute.xlu1 %2505  ;;  %v2616_v32 = vpop.permute.xlu0 %2615 }
 0x1a0   : > { %v3439_v6 = vsel %vm3421_vm7, %v3406_v12, %v2616_v32  ;;  %v3408_v38 = vsel %vm3388_vm6, %v3369_v8, %v2506_v62 }
 0x1a1   : > { %3189 = vrot.lane.b32.xlu1 %v3158_v39, %s7366_s15  ;;  %3335 = vrot.lane.b32.xlu0 %v3304_v11, %s7367_s16  ;;  %s7371_s15 = smov 64  }
 0x1a3   : > { %v2618_v21 = vpop.permute.xlu1 %2617  ;;  %v2863_v35 = vpop.permute.xlu0 %2862 }
 0x1a4   : > { %v3472_v0 = vsel %vm3454_vm8, %v3439_v6, %v2863_v35  ;;  %v3441_v26 = vsel %vm3421_vm7, %v3408_v38, %v2618_v21  ;;  %v1250_v6 = vmul.bf16 %v9025_v37, %v834_v14 }
 0x1a5   : > { %3337 = vrot.lane.b32.xlu1 %v3306_v40, %s7367_s16 }
 0x1a7   : > { %v2865_v18 = vpop.permute.xlu1 %2864  ;;  %v3011_v54 = vpop.permute.xlu0 %3010 }
 0x1a8   : > { %v3505_v29 = vsel %vm3487_vm9, %v3472_v0, %v3011_v54  ;;  %v3474_v46 = vsel %vm3454_vm8, %v3441_v26, %v2865_v18  ;;  %v833_v54 = vld [vmem:[#allocation2 + $0x54] sm:$0xf] }
 0x1ab   : > { %v3013_v16 = vpop.permute.xlu1 %3012  ;;  %v3123_v7 = vpop.permute.xlu0 %3122 }
 0x1ac   : > { %v3538_v30 = vsel %vm3520_vm11, %v3505_v29, %v3123_v7  ;;  %v3507_v32 = vsel %vm3487_vm9, %v3474_v46, %v3013_v16  ;;  %v1249_v16 = vmul.bf16 %v8985_v3, %v833_v54 }
 0x1ae   : > { %v6719_v5 = vcombine.low %v1248_v1, %v1249_v16  ;;  %v836_v1 = vld [vmem:[#allocation2 + $0x60] sm:$0xf] }
 0x1af   : > { %v3125_v25 = vpop.permute.xlu1 %3124  ;;  %v3176_v27 = vpop.permute.xlu0 %3175 }
 0x1b0   : > { %v3571_v39 = vsel %vm3553_vm13, %v3538_v30, %v3176_v27  ;;  %v3540_v31 = vsel %vm3520_vm11, %v3507_v32, %v3125_v25  ;;  %v1251_v25 = vmul.bf16 %v9012_v44, %v835_v15 }
 0x1b2   : > { %v6720_v8 = vcombine.low %v1250_v6, %v1251_v25  ;;  %v1252_v25 = vmul.bf16 %v9239_v43, %v836_v1 }
 0x1b3   : > { %v3178_v55 = vpop.permute.xlu1 %3177  ;;  %v3324_v33 = vpop.permute.xlu0 %3323 }
 0x1b4   : > { %v3604_v60 = vsel %vm3586_vm14, %v3571_v39, %v3324_v33  ;;  %v3573_v62 = vsel %vm3553_vm13, %v3540_v31, %v3178_v55 }
 0x1b5   : > { %7202 = vmatprep.mubr.msk.bf16.mxu0 %vm3639_vm1, %v3604_v60 }
 0x1b7   : > { %v2359_v36 = vpop.permute.xlu1 %2358  ;;  %v3326_v11 = vpop.permute.xlu0 %3325 }
 0x1b8   : > { %v3606_v40 = vsel %vm3586_vm14, %v3573_v62, %v3326_v11  ;;  %v3372_v24 = vsel %vm3339_vm4, %v6719_v5, %v2359_v36  ;;  %v839_v5 = vld [vmem:[#allocation2 + $0x6c] sm:$0xf] }
 0x1b9   : > { %7203 = vmatmul.mubr.msk.bf16.gmra.mrb[16].mxu0 %vm3639_vm1, %v3606_v40 }
 0x1bb   : > { %v2361_v21 = vpop.permute.xlu1 %2360  ;;  %v2508_v35 = vpop.permute.xlu0 %2507 }
 0x1bc   : > { %v3410_v0 = vsel %vm3388_vm6, %v3372_v24, %v2508_v35  ;;  %v3375_v30 = vsel %vm3339_vm4, %v6720_v8, %v2361_v21  ;;  %v838_v24 = vld [vmem:[#allocation2 + $0x68] sm:$0xf] }
 0x1bf   : > { %v2510_v50 = vpop.permute.xlu1 %2509  ;;  %v2620_v18 = vpop.permute.xlu0 %2619 }
 0x1c0   : > { %v3443_v29 = vsel %vm3421_vm7, %v3410_v0, %v2620_v18  ;;  %v3412_v33 = vsel %vm3388_vm6, %v3375_v30, %v2510_v50 }
 0x1c3   : > { %v2622_v34 = vpop.permute.xlu1 %2621  ;;  %v2867_v28 = vpop.permute.xlu0 %2866 }
 0x1c4   : > { %v3476_v38 = vsel %vm3454_vm8, %v3443_v29, %v2867_v28  ;;  %v3445_v60 = vsel %vm3421_vm7, %v3412_v33, %v2622_v34  ;;  %v1254_v29 = vmul.bf16 %v9254_v48, %v838_v24 }
 0x1c7   : > { %v2869_v19 = vpop.permute.xlu1 %2868  ;;  %v3015_v42 = vpop.permute.xlu0 %3014 }
 0x1c8   : > { %v3509_v26 = vsel %vm3487_vm9, %v3476_v38, %v3015_v42  ;;  %v3478_v31 = vsel %vm3454_vm8, %v3445_v60, %v2869_v19  ;;  %v837_v42 = vld [vmem:[#allocation2 + $0x64] sm:$0xf] }
 0x1cb   : > { %v3017_v7 = vpop.permute.xlu1 %3016  ;;  %v3127_v12 = vpop.permute.xlu0 %3126 }
 0x1cc   : > { %v3542_v46 = vsel %vm3520_vm11, %v3509_v26, %v3127_v12  ;;  %v3511_v11 = vsel %vm3487_vm9, %v3478_v31, %v3017_v7  ;;  %v1253_v7 = vmul.bf16 %v9219_v58, %v837_v42 }
 0x1ce   : > { %v6721_v6 = vcombine.low %v1252_v25, %v1253_v7  ;;  %v840_v7 = vld [vmem:[#allocation2 + $0x70] sm:$0xf]  ;;  %v842_v25 = vld [vmem:[#allocation2 + $0x78] sm:$0xf] }
 0x1cf   : > { %v3129_v27 = vpop.permute.xlu1 %3128  ;;  %v3180_v55 = vpop.permute.xlu0 %3179 }
 0x1d0   : > { %v3575_v32 = vsel %vm3553_vm13, %v3542_v46, %v3180_v55  ;;  %v3544_v21 = vsel %vm3520_vm11, %v3511_v11, %v3129_v27  ;;  %v1255_v27 = vmul.bf16 %v9243_v52, %v839_v5 }
 0x1d2   : > { %v6722_v30 = vcombine.low %v1254_v29, %v1255_v27 }
 0x1d3   : > { %v3182_v39 = vpop.permute.xlu1 %3181  ;;  %v3328_v36 = vpop.permute.xlu0 %3327 }
 0x1d4   : > { %v3608_v62 = vsel %vm3586_vm14, %v3575_v32, %v3328_v36  ;;  %v3577_v35 = vsel %vm3553_vm13, %v3544_v21, %v3182_v39 }
 0x1d5   : > { %7206 = vmatprep.mubr.msk.bf16.mxu0 %vm3639_vm1, %v3608_v62 }
 0x1d7   : > { %v2363_v40 = vpop.permute.xlu1 %2362  ;;  %v3330_v50 = vpop.permute.xlu0 %3329 }
 0x1d8   : > { %v3610_v18 = vsel %vm3586_vm14, %v3577_v35, %v3330_v50  ;;  %v3378_v8 = vsel %vm3339_vm4, %v6721_v6, %v2363_v40  ;;  %v1256_v6 = vmul.bf16 %v9428_v13, %v840_v7 }
 0x1d9   : > { %7207 = vmatmul.mubr.msk.bf16.gmra.mrb[20].mxu0 %vm3639_vm1, %v3610_v18 }
 0x1db   : > { %v2365_v34 = vpop.permute.xlu1 %2364  ;;  %v2512_v28 = vpop.permute.xlu0 %2511 }
 0x1dc   : > { %v3414_v38 = vsel %vm3388_vm6, %v3378_v8, %v2512_v28  ;;  %v3381_v46 = vsel %vm3339_vm4, %v6722_v30, %v2365_v34  ;;  %v9607_v30 = vld [vmem:[%s11310_s4] ss:$0 sm:$0xff] }
 0x1df   : > { %v2514_v54 = vpop.permute.xlu1 %2513  ;;  %v2624_v19 = vpop.permute.xlu0 %2623 }
 0x1e0   : > { %v3447_v26 = vsel %vm3421_vm7, %v3414_v38, %v2624_v19  ;;  %v3416_v36 = vsel %vm3388_vm6, %v3381_v46, %v2514_v54 }
 0x1e3   : > { %v2626_v4 = vpop.permute.xlu1 %2625  ;;  %v2871_v16 = vpop.permute.xlu0 %2870 }
 0x1e4   : > { %v3480_v33 = vsel %vm3454_vm8, %v3447_v26, %v2871_v16  ;;  %v3449_v62 = vsel %vm3421_vm7, %v3416_v36, %v2626_v4 }
 0x1e7   : > { %v2873_v15 = vpop.permute.xlu1 %2872  ;;  %v3019_v14 = vpop.permute.xlu0 %3018 }
 0x1e8   : > { %v3513_v60 = vsel %vm3487_vm9, %v3480_v33, %v3019_v14  ;;  %v3482_v21 = vsel %vm3454_vm8, %v3449_v62, %v2873_v15  ;;  %v841_v14 = vld [vmem:[#allocation2 + $0x74] sm:$0xf] }
 0x1e9   : > { %v1257_v27 = vmul.bf16 %v9424_v9, %v841_v14 }
 0x1eb   : > { %v3021_v12 = vpop.permute.xlu1 %3020  ;;  %v3131_v0 = vpop.permute.xlu0 %3130  ;;  %v6723_v38 = vcombine.low %v1256_v6, %v1257_v27 }
 0x1ec   : > { %v3546_v31 = vsel %vm3520_vm11, %v3513_v60, %v3131_v0  ;;  %v3515_v50 = vsel %vm3487_vm9, %v3482_v21, %v3021_v12  ;;  %v843_v12 = vld [vmem:[#allocation2 + $0x7c] sm:$0xf]  ;;  %v1258_v0 = vmul.bf16 %v9441_v2, %v842_v25  ;;  %v9613_v60 = vld [vmem:[%s11311_s5] ss:$0 sm:$0xff] }
 0x1ed   : > { %v1259_v8 = vmul.bf16 %v9437_v49, %v843_v12 }
 0x1ef   : > { %v3133_v55 = vpop.permute.xlu1 %3132  ;;  %v3184_v39 = vpop.permute.xlu0 %3183  ;;  %v6724_v26 = vcombine.low %v1258_v0, %v1259_v8 }
 0x1f0   : > { %v3579_v11 = vsel %vm3553_vm13, %v3546_v31, %v3184_v39  ;;  %v3548_v34 = vsel %vm3520_vm11, %v3515_v50, %v3133_v55 }
 0x1f3   : > { %v3186_v32 = vpop.permute.xlu1 %3185  ;;  %v3332_v40 = vpop.permute.xlu0 %3331 }
 0x1f4   : > { %v3612_v35 = vsel %vm3586_vm14, %v3579_v11, %v3332_v40  ;;  %v3581_v28 = vsel %vm3553_vm13, %v3548_v34, %v3186_v32 }
 0x1f5   : > { %7210 = vmatprep.mubr.msk.bf16.mxu0 %vm3639_vm1, %v3612_v35 }
 0x1f7   : > { %v2367_v18 = vpop.permute.xlu1 %2366  ;;  %v3334_v54 = vpop.permute.xlu0 %3333 }
 0x1f8   : > { %v3614_v19 = vsel %vm3586_vm14, %v3581_v28, %v3334_v54  ;;  %v3384_v33 = vsel %vm3339_vm4, %v6723_v38, %v2367_v18 }
 0x1f9   : > { %7211 = vmatmul.mubr.msk.bf16.gmra.mrb[24].mxu0 %vm3639_vm1, %v3614_v19 }
 0x1fb   : > { %v2369_v4 = vpop.permute.xlu1 %2368  ;;  %v2516_v16 = vpop.permute.xlu0 %2515 }
 0x1fc   : > { %v3387_v32 = vsel %vm3339_vm4, %v6724_v26, %v2369_v4  ;;  %v3418_v36 = vsel %vm3388_vm6, %v3384_v33, %v2516_v16 }
 0x1ff   : > { %v2518_v42 = vpop.permute.xlu1 %2517  ;;  %v2628_v15 = vpop.permute.xlu0 %2627 }
 0x200   : > { %v3420_v40 = vsel %vm3388_vm6, %v3387_v32, %v2518_v42  ;;  %v3451_v21 = vsel %vm3421_vm7, %v3418_v36, %v2628_v15 }
 0x203   : > { %v2630_v1 = vpop.permute.xlu1 %2629  ;;  %v2875_v5 = vpop.permute.xlu0 %2874 }
 0x204   : > { %v3453_v18 = vsel %vm3421_vm7, %v3420_v40, %v2630_v1  ;;  %v3484_v34 = vsel %vm3454_vm8, %v3451_v21, %v2875_v5 }
 0x207   : > { %v2877_v24 = vpop.permute.xlu1 %2876  ;;  %v3023_v29 = vpop.permute.xlu0 %3022 }
 0x208   : > { %v3486_v16 = vsel %vm3454_vm8, %v3453_v18, %v2877_v24  ;;  %v3517_v7 = vsel %vm3487_vm9, %v3484_v34, %v3023_v29 }
 0x20b   : > { %v3025_v55 = vpop.permute.xlu1 %3024  ;;  %v3135_v39 = vpop.permute.xlu0 %3134 }
 0x20c   : > { %v3519_v14 = vsel %vm3487_vm9, %v3486_v16, %v3025_v55  ;;  %v3550_v12 = vsel %vm3520_vm11, %v3517_v7, %v3135_v39 }
 0x20d   : > { %v7188_v46 = vpop.f32.mrb[0].mxu0 }
 0x20e   : > { %v3846_v31 = vmul.f32 %v7188_v46, %v9607_v30  ;;  %v3710_v62 = vpop.f32.mrb[1].mxu0 }
 0x20f   : > { %v3137_v11 = vpop.permute.xlu1 %3136  ;;  %v3844_v35 = vmul.f32 %v9607_v30, %v3710_v62  ;;  %v7189_v50 = vpop.f32.mrb[2].mxu0 }
 0x210   : > { %v3885_v28 = vadd.f32 %v9613_v60, %v3846_v31  ;;  %v3847_v54 = vmul.f32 %v7189_v50, %v9607_v30  ;;  %v3188_v19 = vpop.permute.xlu0 %3187  ;;  %v3713_v4 = vpop.f32.mrb[3].mxu0  ;;  %v3552_v32 = vsel %vm3520_vm11, %v3519_v14, %v3137_v11 }
 0x211   : > { %v3883_v42 = vadd.f32 %v9613_v60, %v3844_v35  ;;  %v3845_v15 = vmul.f32 %v9607_v30, %v3713_v4  ;;  %v3583_v8 = vsel %vm3553_vm13, %v3550_v12, %v3188_v19 }
 0x212   : > { %vm3917_vm15 = vcmp.ge.f32.partialorder %v3885_v28, 0.0  ;;  %v3949_v1 = vmul.f32 0.01, %v3885_v28  ;;  %v3886_v5 = vadd.f32 %v9613_v60, %v3847_v54 }
 0x213   : > { %v3190_v25 = vpop.permute.xlu1 %3189  ;;  %vm3915_vm4 = vcmp.ge.f32.partialorder %v3883_v42, 0.0  ;;  %v3947_v6 = vmul.f32 0.01, %v3883_v42  ;;  %v3884_v27 = vadd.f32 %v9613_v60, %v3845_v15 }
 0x214   : > { %v3981_v24 = vsel %vm3917_vm15, %v3885_v28, %v3949_v1  ;;  %vm3918_vm7 = vcmp.ge.f32.partialorder %v3886_v5, 0.0  ;;  %v3950_v0 = vmul.f32 0.01, %v3886_v5  ;;  %v3336_v29 = vpop.permute.xlu0 %3335  ;;  %v3585_v21 = vsel %vm3553_vm13, %v3552_v32, %v3190_v25 }
 0x215   : > { %v7078_v38 = vpack.c.bf16 %v3981_v24, %v3981_v24  ;;  %v3979_v26 = vsel %vm3915_vm4, %v3883_v42, %v3947_v6  ;;  %vm3916_vm9 = vcmp.ge.f32.partialorder %v3884_v27, 0.0  ;;  %v3948_v55 = vmul.f32 0.01, %v3884_v27  ;;  %v7345_v6 = vld [vmem:[#allocation2 + $0x8] sm:$0xf] }
 0x216   : > { %v7076_v33 = vpack.c.bf16 %v3979_v26, %v3979_v26  ;;  %v3982_v46 = vsel %vm3918_vm7, %v3886_v5, %v3950_v0  ;;  %v3616_v39 = vsel %vm3586_vm14, %v3583_v8, %v3336_v29  ;;  %v4463_v26 = vld [vmem:[#allocation2] sm:$0xf] }
 0x217   : > { %v3338_v36 = vpop.permute.xlu1 %3337  ;;  %v4125_v31 = vshrl.u32 %v7078_v38, 16  ;;  %v7079_v62 = vpack.c.bf16 %v3982_v46, %v3982_v46  ;;  %v3980_v40 = vsel %vm3916_vm9, %v3884_v27, %v3948_v55  ;;  %7214 = vmatprep.mubr.msk.bf16.mxu0 %vm3639_vm1, %v3616_v39  ;;  %v4128_v4 = vshll.u32 %v7078_v38, 16  ;;  %v4464_v55 = vld [vmem:[#allocation2 + $0x4] sm:$0xf]  ;;  %v4528_v39 = vld [vmem:[#allocation2] sm:$0xe] }
 0x218   : > { %v4108_v35 = vshrl.u32 %v7076_v33, 16  ;;  %v7077_v50 = vpack.c.bf16 %v3980_v40, %v3980_v40  ;;  %v3618_v18 = vsel %vm3586_vm14, %v3585_v21, %v3338_v36  ;;  %v4111_v11 = vshll.u32 %v7076_v33, 16  ;;  %v11635_v36 = vld [vmem:[#allocation12_spill] sm:$0xff]  ;;  %v11636_v40 = vld [vmem:[#allocation11_spill] sm:$0xff] }
 0x219   : > { %v4127_v34 = vrot.slane %v4125_v31, 7  ;;  %v4134_v28 = vshrl.u32 %v7079_v62, 16  ;;  %7215 = vmatmul.mubr.msk.bf16.gmra.mrb[28].mxu0 %vm3639_vm1, %v3618_v18  ;;  %v4137_v7 = vshll.u32 %v7079_v62, 16  ;;  %v6913_v32 = vcombine.low %v4463_v26, %v4464_v55 }
 0x21a   : > { %v4110_v54 = vrot.slane %v4108_v35, 7  ;;  %v4116_v19 = vshrl.u32 %v7077_v50, 16  ;;  %v4119_v14 = vshll.u32 %v7077_v50, 16  ;;  %v4530_v31 = vmul.bf16 %v4464_v55, %v11635_v36 }
 0x21b   : > { %v9640_v16 = vrot.slane %v4134_v28, 7  ;;  %v4130_v1 = vor.u32 %v4128_v4, %v4127_v34  ;;  %v4132_v5 = vrot.slane %v4127_v34, 4  ;;  %v4866_v62 = vshll.u32 %v6913_v32, 16  ;;  %v11638_v4 = vld [vmem:[#allocation8_spill] sm:$0xff] }
 0x21c   : > { %v4113_v42 = vor.u32 %v4111_v11, %v4110_v54  ;;  %v4118_v15 = vrot.slane %v4116_v19, 7  ;;  %v4114_v12 = vrot.slane %v4110_v54, 4  ;;  %v4529_v21 = vmul.bf16 %v4528_v39, %v11636_v40  ;;  %v11637_v54 = vld [vmem:[#allocation9_spill] sm:$0xff] }
 0x21d   : > { %v4139_v25 = vor.u32 %v4137_v7, %v9640_v16  ;;  %v4864_v18 = vshrl.u32 %v6913_v32, 16 }
 0x21e   : > { %v4427_v24 = vsel %vm7450_vm5, %v4113_v42, %v7345_v6  ;;  %v4121_v0 = vor.u32 %v4119_v14, %v4118_v15  ;;  %v4123_v8 = vrot.slane %v4118_v15, 4  ;;  %v9660_v34 = vcombine.low %v4529_v21, %v4530_v31  ;;  %v11639_v42 = vld [vmem:[#allocation16_spill] sm:$0xff]  ;;  %v11642_v6 = vld [vmem:[#allocation13_spill] sm:$0xff] }
 0x21f   : > { %4428 = vst [vmem:[#allocation2 + $0x8] sm:$0xf] %v4427_v24  ;;  %v4140_v38 = vsel %vm7493_vm10, %v4132_v5, %v4139_v25  ;;  %v4868_v14 = vrot.slane %v4866_v62, 1  ;;  %v11641_v25 = vld [vmem:[#allocation10_spill] sm:$0xff] }
 0x220   : > { %4431 = vst.msk [vmem:[#allocation2 + $0x14] sm:$0xf] %vm334_vm3, %v4140_v38  ;;  %v4122_v33 = vsel %vm7493_vm10, %v4114_v12, %v4121_v0  ;;  %v4131_v46 = vsel %vm7493_vm10, %v4123_v8, %v4130_v1  ;;  %v11640_v1 = vld [vmem:[#allocation7_spill] sm:$0xff]  ;;  %v11643_v24 = vld [vmem:[#allocation14_spill] sm:$0xff]  ;;  %v5110_v2 = vrot.slane %v9660_v34, 1 }
 0x221   : > { %4429 = vst.msk [vmem:[#allocation2 + $0xc] sm:$0xf] %vm334_vm3, %v4122_v33  ;;  %4430 = vst.msk [vmem:[#allocation2 + $0x10] sm:$0xf] %vm334_vm3, %v4131_v46  ;;  %v11644_v38 = vld [vmem:[#allocation15_spill] sm:$0xff] }
 0x226   : > { %v9656_v35 = vld [vmem:[#allocation2 + $0x8] sm:$0xf] }
 0x227   : > { %v9658_v50 = vld [vmem:[#allocation2 + $0x14] sm:$0xf]  ;;  %v4564_v7 = vmul.bf16 %v9656_v35, %v11638_v4  ;;  %v4531_v27 = vmul.bf16 %v9656_v35, %v11642_v6  ;;  %v4597_v46 = vld [vmem:[#allocation2 + $0x8] sm:$0xe] }
 0x228   : > { %v9662_v28 = vld [vmem:[#allocation2 + $0x10] sm:$0xf]  ;;  %v4567_v11 = vmul.bf16 %v9658_v50, %v11637_v54  ;;  %v9666_v19 = vld [vmem:[#allocation2 + $0xc] sm:$0xf]  ;;  %v4534_v15 = vmul.bf16 %v9658_v50, %v11639_v42  ;;  %v4634_v8 = vmul.bf16 %v9658_v50, %v11641_v25 }
 0x229   : > { %v4566_v5 = vmul.bf16 %v9662_v28, %v11640_v1  ;;  %v4565_v12 = vmul.bf16 %v9666_v19, %v11641_v25  ;;  %v4532_v0 = vmul.bf16 %v9666_v19, %v11643_v24  ;;  %v4533_v26 = vmul.bf16 %v9662_v28, %v11644_v38 }
 0x22a   : > { %v6914_v55 = vcombine.low %v9656_v35, %v9666_v19  ;;  %v9688_v33 = vcombine.low %v9662_v28, %v9658_v50  ;;  %v4633_v31 = vmul.bf16 %v9662_v28, %v11638_v4  ;;  %v4599_v53 = vmul.bf16 %v9666_v19, %v11635_v36 }
 0x22b   : > { %v6948_v32 = vcombine.low %v4566_v5, %v4567_v11  ;;  %v6947_v39 = vcombine.low %v4564_v7, %v4565_v12  ;;  %v6931_v62 = vcombine.low %v4531_v27, %v4532_v0  ;;  %v9692_v21 = vcombine.low %v4533_v26, %v4534_v15 }
 0x22c   : > { %v4871_v49 = vshll.u32 %v6914_v55, 16  ;;  %v4879_v11 = vshll.u32 %v9688_v33, 16  ;;  %v4598_v7 = vmul.bf16 %v4597_v46, %v11636_v40  ;;  %v4601_v15 = vmul.bf16 %v9658_v50, %v11643_v24 }
 0x22d   : > { %5257 = vrot.lane.b32.xlu1 %v6948_v32, %s7365_s14  ;;  %5255 = vrot.lane.b32.xlu0 %v6947_v39, %s7365_s14  ;;  %v7192_v9 = vpop.f32.mrb[4].mxu0  ;;  %v5111_v13 = vrot.slane %v6931_v62, 1  ;;  %v11458_v34 = vrot.slane %v9692_v21, 1  ;;  %v4600_v0 = vmul.bf16 %v9662_v28, %v11642_v6  ;;  %v6982_v39 = vcombine.low %v4633_v31, %v4634_v8 }
 0x22e   : > { %v3850_v5 = vmul.f32 %v7192_v9, %v9607_v30  ;;  %v3726_v12 = vpop.f32.mrb[5].mxu0  ;;  %v4873_v27 = vrot.slane %v4871_v49, 1  ;;  %v4869_v62 = vor.u32 %v4868_v14, %v4864_v18  ;;  %v4875_v10 = vshrl.u32 %v6914_v55, 16 }
 0x22f   : > { %v3848_v26 = vmul.f32 %v9607_v30, %v3726_v12  ;;  %v7193_v32 = vpop.f32.mrb[6].mxu0  ;;  %v5114_v9 = vsel %vm2453_vm0, %v5111_v13, %v11458_v34  ;;  %v6965_v48 = vcombine.low %v4598_v7, %v4599_v53  ;;  %v9717_v14 = vrot.slane %v4879_v11, 1 }
 0x230   : > { %v3889_v46 = vadd.f32 %v9613_v60, %v3850_v5  ;;  %v3851_v17 = vmul.f32 %v7193_v32, %v9607_v30  ;;  %v3729_v52 = vpop.f32.mrb[7].mxu0  ;;  %v4877_v18 = vor.u32 %v4875_v10, %v4873_v27  ;;  %v9720_v31 = vcombine.low %v4600_v0, %v4601_v15 }
 0x231   : > { %v3887_v49 = vadd.f32 %v9613_v60, %v3848_v26  ;;  %v3849_v43 = vmul.f32 %v9607_v30, %v3729_v52  ;;  %5568 = vrot.lane.b32.xlu0 %v6982_v39, %s7368_s24  ;;  %5145 = vrot.lane.b32.xlu1 %v5114_v9, %s7361_s25  ;;  %v4874_v52 = vsel %vm2205_vm12, %v4869_v62, %v4873_v27  ;;  %v5423_v9 = vrot.slane %v6965_v48, 1 }
 0x232   : > { %vm3921_vm5 = vcmp.ge.f32.partialorder %v3889_v46, 0.0  ;;  %v3953_v8 = vmul.f32 0.01, %v3889_v46  ;;  %v3890_v55 = vadd.f32 %v9613_v60, %v3851_v17  ;;  %v4882_v10 = vsel %vm2205_vm12, %v4877_v18, %v9717_v14 }
 0x233   : > { %vm3919_vm13 = vcmp.ge.f32.partialorder %v3887_v49, 0.0  ;;  %v3951_v53 = vmul.f32 0.01, %v3887_v49  ;;  %v3888_v7 = vadd.f32 %v9613_v60, %v3849_v43  ;;  %v5112_v27 = vsel %vm2453_vm0, %v5110_v2, %v5111_v13 }
 0x234   : > { %v3985_v5 = vsel %vm3921_vm5, %v3889_v46, %v3953_v8  ;;  %vm3922_vm1 = vcmp.ge.f32.partialorder %v3890_v55, 0.0  ;;  %v3954_v12 = vmul.f32 0.01, %v3890_v55  ;;  %v11459_v18 = vrot.slane %v9720_v31, 1 }
 0x235   : > { %v7082_v11 = vpack.c.bf16 %v3985_v5, %v3985_v5  ;;  %v3983_v26 = vsel %vm3919_vm13, %v3887_v49, %v3951_v53  ;;  %vm3920_vm15 = vcmp.ge.f32.partialorder %v3888_v7, 0.0  ;;  %v3952_v32 = vmul.f32 0.01, %v3888_v7  ;;  %4995 = vrot.lane.b32.xlu0 %v4874_v52, %s7363_s12  ;;  %4997 = vrot.lane.b32.xlu1 %v4882_v10, %s7363_s12 }
 0x236   : > { %v7080_v17 = vpack.c.bf16 %v3983_v26, %v3983_v26  ;;  %v3986_v15 = vsel %vm3922_vm1, %v3890_v55, %v3954_v12  ;;  %v4141_v49 = vrot.slane %v9640_v16, 4  ;;  %v4497_v13 = vmul.bf16 %v9656_v35, %v11640_v1 }
 0x237   : > { %v4161_v0 = vshrl.u32 %v7082_v11, 16  ;;  %v7083_v43 = vpack.c.bf16 %v3986_v15, %v3986_v15  ;;  %v3984_v39 = vsel %vm3920_vm15, %v3888_v7, %v3952_v32  ;;  %v4164_v52 = vshll.u32 %v7082_v11, 16 }
 0x238   : > { %v4143_v62 = vshrl.u32 %v7080_v17, 16  ;;  %v7081_v46 = vpack.c.bf16 %v3984_v39, %v3984_v39  ;;  %v4146_v26 = vshll.u32 %v7080_v17, 16  ;;  %v4498_v48 = vmul.bf16 %v9666_v19, %v11637_v54 }
 0x239   : > { %v4163_v8 = vrot.slane %v4161_v0, 7  ;;  %v4170_v53 = vshrl.u32 %v7083_v43, 16  ;;  %5143 = vrot.lane.b32.xlu0 %v5112_v27, %s7361_s25  ;;  %v4173_v7 = vshll.u32 %v7083_v43, 16  ;;  %v5425_v15 = vsel %vm2453_vm0, %v5423_v9, %v11459_v18 }
 0x23a   : > { %v4145_v5 = vrot.slane %v4143_v62, 7  ;;  %v4152_v55 = vshrl.u32 %v7081_v46, 16  ;;  %v4155_v16 = vshll.u32 %v7081_v46, 16  ;;  %v9743_v43 = vcombine.low %v4497_v13, %v4498_v48 }
 0x23b   : > { %v9732_v12 = vrot.slane %v4170_v53, 7  ;;  %v4166_v11 = vor.u32 %v4164_v52, %v4163_v8  ;;  %v4168_v0 = vrot.slane %v4163_v8, 4  ;;  %v4666_v8 = vld [vmem:[#allocation2 + $0x10] sm:$0xe]  ;;  %v4668_v53 = vmul.bf16 %v9658_v50, %v11635_v36 }
 0x23c   : > { %v4148_v2 = vor.u32 %v4146_v26, %v4145_v5  ;;  %v4154_v32 = vrot.slane %v4152_v55, 7  ;;  %v4150_v19 = vrot.slane %v4145_v5, 4  ;;  %v4883_v55 = vshrl.u32 %v9688_v33, 16 }
 0x23d   : > { %v4175_v17 = vor.u32 %v4173_v7, %v9732_v12  ;;  %5456 = vrot.lane.b32.xlu0 %v5425_v15, %s7369_s26  ;;  %v11647_v15 = vld [vmem:[#allocation21_spill] sm:$0xff]  ;;  %vm6146_vm13 = vcmask 1043456  }
 0x23e   : > { %v4149_v35 = vsel %vm7493_vm10, %v4141_v49, %v4148_v2  ;;  %v4157_v39 = vor.u32 %v4155_v16, %v4154_v32  ;;  %v4159_v27 = vrot.slane %v4154_v32, 4  ;;  %v4667_v49 = vmul.bf16 %v4666_v8, %v11636_v40  ;;  %v11645_v40 = vld [vmem:[#allocation22_spill] sm:$0xff]  ;;  %v11646_v2 = vld [vmem:[#allocation23_spill] sm:$0xff] }
 0x23f   : > { %4432 = vst.msk [vmem:[#allocation2 + $0x18] sm:$0xf] %vm334_vm3, %v4149_v35  ;;  %v4176_v62 = vsel %vm7493_vm10, %v4168_v0, %v4175_v17 }
 0x240   : > { %4435 = vst.msk [vmem:[#allocation2 + $0x24] sm:$0xf] %vm334_vm3, %v4176_v62  ;;  %v4158_v46 = vsel %vm7493_vm10, %v4150_v19, %v4157_v39  ;;  %v4167_v9 = vsel %vm7493_vm10, %v4159_v27, %v4166_v11  ;;  %v9768_v7 = vcombine.low %v4667_v49, %v4668_v53 }
 0x241   : > { %4433 = vst.msk [vmem:[#allocation2 + $0x1c] sm:$0xf] %vm334_vm3, %v4158_v46  ;;  %4434 = vst.msk [vmem:[#allocation2 + $0x20] sm:$0xf] %vm334_vm3, %v4167_v9  ;;  %5308 = vrot.lane.b32.xlu0 %v4882_v10, %s7367_s16  ;;  %v7330_v10 = vld [vmem:[%s11312_s6] sm:$0xff]   ;;  %v7331_v9 = vld [vmem:[%s11312_s6 + $0x8] sm:$0xff]  }
 0x242   : > { %7218 = vmatprep.subr.bf16.mxu1 %v7330_v10 }
 0x243   : > { %7219 = vmatpush3.bf16.msra.mxu1 %v7330_v10 }
 0x244   : > { %7220 = vmatprep.subr.bf16.mxu1 %v7331_v9 }
 0x246   : > { %v9761_v52 = vld [vmem:[#allocation2 + $0x18] sm:$0xf] }
 0x247   : > { %v4635_v5 = vmul.bf16 %v9761_v52, %v11640_v1  ;;  %v9765_v26 = vld [vmem:[#allocation2 + $0x24] sm:$0xf]  ;;  %v4568_v36 = vmul.bf16 %v9761_v52, %v11645_v40  ;;  %v4602_v32 = vmul.bf16 %v9761_v52, %v11644_v38  ;;  %v4669_v33 = vmul.bf16 %v9761_v52, %v11642_v6  ;;  %7221 = vmatpush3.bf16.msra.mxu1 %v7331_v9 }
 0x248   : > { %v9773_v13 = vld [vmem:[#allocation2 + $0x1c] sm:$0xf]  ;;  %v9777_v48 = vld [vmem:[#allocation2 + $0x20] sm:$0xf]  ;;  %v4571_v1 = vmul.bf16 %v9765_v26, %v11646_v2  ;;  %v4672_v17 = vmul.bf16 %v9765_v26, %v11639_v42  ;;  %v4638_v46 = vmul.bf16 %v9765_v26, %v11647_v15 }
 0x249   : > { %v4636_v16 = vmul.bf16 %v9773_v13, %v11637_v54  ;;  %v4569_v11 = vmul.bf16 %v9773_v13, %v11647_v15  ;;  %v4570_v0 = vmul.bf16 %v9777_v48, %v11589_v41  ;;  %v9795_v35 = vcombine.low %v9761_v52, %v9773_v13 }
 0x24a   : > { %v4603_v6 = vmul.bf16 %v9773_v13, %v11639_v42  ;;  %v4670_v54 = vmul.bf16 %v9773_v13, %v11643_v24  ;;  %v4671_v19 = vmul.bf16 %v9777_v48, %v11644_v38  ;;  %v4637_v62 = vmul.bf16 %v9777_v48, %v11645_v40 }
 0x24b   : > { %v6983_v39 = vcombine.low %v4635_v5, %v4636_v16  ;;  %v6949_v27 = vcombine.low %v4568_v36, %v4569_v11  ;;  %v4885_v42 = vor.u32 %v4883_v55, %v9717_v14  ;;  %v4887_v24 = vshll.u32 %v9795_v35, 16  ;;  %v11648_v16 = vld [vmem:[#allocation18_spill] sm:$0xff]  ;;  %v11649_v11 = vld [vmem:[#allocation17_spill] sm:$0xff] }
 0x24c   : > { %v9812_v8 = vcombine.low %v4602_v32, %v4603_v6  ;;  %v9817_v53 = vcombine.low %v4669_v33, %v4670_v54  ;;  %v5736_v5 = vrot.slane %v9768_v7, 1  ;;  %v9820_v10 = vcombine.low %v4671_v19, %v4672_v17  ;;  %v11650_v54 = vld [vmem:[#allocation20_spill] sm:$0xff]  ;;  %v11651_v17 = vld [vmem:[#allocation19_spill] sm:$0xff] }
 0x24d   : > { %5570 = vrot.lane.b32.xlu1 %v6983_v39, %s7368_s24  ;;  %5259 = vrot.lane.b32.xlu0 %v6949_v27, %s7365_s14  ;;  %v7196_v49 = vpop.f32.mrb[8].mxu0  ;;  %v6950_v55 = vcombine.low %v4570_v0, %v4571_v1  ;;  %v4535_v32 = vmul.bf16 %v9761_v52, %v11648_v16  ;;  %v4536_v6 = vmul.bf16 %v9773_v13, %v11649_v11  ;;  %v9834_v34 = vrot.slane %v4887_v24, 1 }
 0x24e   : > { %v3854_v36 = vmul.f32 %v7196_v49, %v9607_v30  ;;  %v3742_v14 = vpop.f32.mrb[9].mxu0  ;;  %v6984_v33 = vcombine.low %v4637_v62, %v4638_v46  ;;  %v4537_v7 = vmul.bf16 %v9777_v48, %v11650_v54  ;;  %v4538_v19 = vmul.bf16 %v9765_v26, %v11651_v17 }
 0x24f   : > { %v3852_v39 = vmul.f32 %v9607_v30, %v3742_v14  ;;  %v7197_v27 = vpop.f32.mrb[10].mxu0  ;;  %v5737_v46 = vrot.slane %v9817_v53, 1  ;;  %v6933_v24 = vcombine.low %v4535_v32, %v4536_v6 }
 0x250   : > { %v3893_v1 = vadd.f32 %v9613_v60, %v3854_v36  ;;  %v3855_v0 = vmul.f32 %v7197_v27, %v9607_v30  ;;  %v3745_v49 = vpop.f32.mrb[11].mxu0 }
 0x251   : > { %v3891_v14 = vadd.f32 %v9613_v60, %v3852_v39  ;;  %v3853_v62 = vmul.f32 %v9607_v30, %v3745_v49  ;;  %5261 = vrot.lane.b32.xlu1 %v6950_v55, %s7365_s14  ;;  %5572 = vrot.lane.b32.xlu0 %v6984_v33, %s7368_s24  ;;  %v9845_v39 = vcombine.low %v4537_v7, %v4538_v19  ;;  %v11652_v7 = vrot.slane %v9812_v8, 1 }
 0x252   : > { %vm3925_vm4 = vcmp.ge.f32.partialorder %v3893_v1, 0.0  ;;  %v3957_v36 = vmul.f32 0.01, %v3893_v1  ;;  %v3894_v27 = vadd.f32 %v9613_v60, %v3855_v0  ;;  %v4890_v33 = vsel %vm2205_vm12, %v4885_v42, %v9834_v34 }
 0x253   : > { %vm3923_vm7 = vcmp.ge.f32.partialorder %v3891_v14, 0.0  ;;  %v3955_v18 = vmul.f32 0.01, %v3891_v14  ;;  %v3892_v38 = vadd.f32 %v9613_v60, %v3853_v62  ;;  %v11653_v19 = vrot.slane %v9720_v31, 1 }
 0x254   : > { %v3989_v49 = vsel %vm3925_vm4, %v3893_v1, %v3957_v36  ;;  %vm3926_vm9 = vcmp.ge.f32.partialorder %v3894_v27, 0.0  ;;  %v3958_v55 = vmul.f32 0.01, %v3894_v27  ;;  %v4891_v0 = vshrl.u32 %v9795_v35, 16 }
 0x255   : > { %v7086_v53 = vpack.c.bf16 %v3989_v49, %v3989_v49  ;;  %v3987_v58 = vsel %vm3923_vm7, %v3891_v14, %v3955_v18  ;;  %vm3924_vm5 = vcmp.ge.f32.partialorder %v3892_v38, 0.0  ;;  %v3956_v9 = vmul.f32 0.01, %v3892_v38  ;;  %5310 = vrot.lane.b32.xlu1 %v4890_v33, %s7367_s16  ;;  %5621 = vrot.lane.b32.xlu0 %v4890_v33, %s7370_s13 }
 0x256   : > { %v7084_v32 = vpack.c.bf16 %v3987_v58, %v3987_v58  ;;  %v3990_v6 = vsel %vm3926_vm9, %v3894_v27, %v3958_v55  ;;  %v5427_v1 = vsel %vm2453_vm0, %v11653_v19, %v11652_v7  ;;  %v9859_v14 = vcombine.low %v9777_v48, %v9765_v26 }
 0x257   : > { %v4197_v42 = vshrl.u32 %v7086_v53, 16  ;;  %v7087_v62 = vpack.c.bf16 %v3990_v6, %v3990_v6  ;;  %v3988_v18 = vsel %vm3924_vm5, %v3892_v38, %v3956_v9  ;;  %v5738_v58 = vsel %vm2453_vm0, %v5736_v5, %v5737_v46 }
 0x258   : > { %v4179_v36 = vshrl.u32 %v7084_v32, 16  ;;  %v7085_v49 = vpack.c.bf16 %v3988_v18, %v3988_v18  ;;  %v5115_v27 = vrot.slane %v6933_v24, 1  ;;  %v11654_v31 = vrot.slane %v9820_v10, 1 }
 0x259   : > { %v4199_v55 = vrot.slane %v4197_v42, 7  ;;  %v4206_v37 = vshrl.u32 %v7087_v62, 16  ;;  %5458 = vrot.lane.b32.xlu1 %v5427_v1, %s7369_s26  ;;  %5769 = vrot.lane.b32.xlu0 %v5738_v58, %s7371_s15  ;;  %v4182_v6 = vshll.u32 %v7084_v32, 16  ;;  %v4604_v5 = vmul.bf16 %v9777_v48, %v11648_v16 }
 0x25a   : > { %v5740_v35 = vsel %vm2453_vm0, %v5737_v46, %v11654_v31  ;;  %v4181_v9 = vrot.slane %v4179_v36, 7  ;;  %v4188_v7 = vshrl.u32 %v7085_v49, 16  ;;  %v4200_v24 = vshll.u32 %v7086_v53, 16 }
 0x25b   : > { %v9870_v19 = vrot.slane %v4206_v37, 7  ;;  %v4209_v42 = vshll.u32 %v7087_v62, 16  ;;  %v4895_v1 = vshll.u32 %v9859_v14, 16  ;;  %v4191_v44 = vshll.u32 %v7085_v49, 16 }
 0x25c   : > { %v4184_v18 = vor.u32 %v4182_v6, %v4181_v9  ;;  %v4190_v58 = vrot.slane %v4188_v7, 7  ;;  %v4605_v46 = vmul.bf16 %v9765_v26, %v11649_v11  ;;  %v4202_v31 = vor.u32 %v4200_v24, %v4199_v55 }
 0x25d   : > { %v4204_v38 = vrot.slane %v4199_v55, 4  ;;  %v4186_v36 = vrot.slane %v4181_v9, 4  ;;  %v4211_v32 = vor.u32 %v4209_v42, %v9870_v19  ;;  %4999 = vrot.lane.b32.xlu1 %v4890_v33, %s7363_s12  ;;  %5771 = vrot.lane.b32.xlu0 %v5740_v35, %s7371_s15  ;;  %v11655_v37 = vrot.slane %v9732_v12, 4 }
 0x25e   : > { %v4193_v62 = vor.u32 %v4191_v44, %v4190_v58  ;;  %v4195_v6 = vrot.slane %v4190_v58, 4  ;;  %v9882_v49 = vcombine.low %v4604_v5, %v4605_v46  ;;  %v11656_v9 = vrot.slane %v9845_v39, 1  ;;  %v7332_v44 = vld [vmem:[%s11312_s6 + $0x10] sm:$0xff]  }
 0x25f   : > { %v4185_v53 = vsel %vm7493_vm10, %v11655_v37, %v4184_v18  ;;  %v4212_v55 = vsel %vm7493_vm10, %v4204_v38, %v4211_v32  ;;  %v11657_v35 = vrot.slane %v9692_v21, 1  ;;  %v4893_v5 = vor.u32 %v4891_v0, %v9834_v34  ;;  %7222 = vmatprep.subr.bf16.mxu1 %v7332_v44  ;;  %v7333_v34 = vld [vmem:[%s11312_s6 + $0x18] sm:$0xff]  }
 0x260   : > { %4436 = vst.msk [vmem:[#allocation2 + $0x28] sm:$0xf] %vm334_vm3, %v4185_v53  ;;  %v5118_v33 = vsel %vm2453_vm0, %v5115_v27, %v11656_v9  ;;  %4439 = vst.msk [vmem:[#allocation2 + $0x34] sm:$0xf] %vm334_vm3, %v4212_v55  ;;  %v4194_v7 = vsel %vm7493_vm10, %v4186_v36, %v4193_v62  ;;  %v4203_v38 = vsel %vm7493_vm10, %v4195_v6, %v4202_v31  ;;  %v5428_v24 = vrot.slane %v9882_v49, 1  ;;  %v11659_v53 = vld [vmem:[#allocation29_spill] sm:$0xff] }
 0x261   : > { %v5116_v12 = vsel %vm2453_vm0, %v11657_v35, %v5115_v27  ;;  %4437 = vst.msk [vmem:[#allocation2 + $0x2c] sm:$0xf] %vm334_vm3, %v4194_v7  ;;  %4438 = vst.msk [vmem:[#allocation2 + $0x30] sm:$0xf] %vm334_vm3, %v4203_v38  ;;  %5149 = vrot.lane.b32.xlu1 %v5118_v33, %s7361_s25  ;;  %v4499_v21 = vmul.bf16 %v9662_v28, %v11645_v40  ;;  %v4500_v27 = vmul.bf16 %v9658_v50, %v11647_v15  ;;  %v7334_v28 = vld [vmem:[%s11312_s6 + $0x20] ss:$0 sps:$4 sm:$0xff]  }
 0x262   : > { %5147 = vrot.lane.b32.xlu0 %v5116_v12, %s7361_s25  ;;  %v4897_v42 = vrot.slane %v4895_v1, 1  ;;  %v4501_v0 = vmul.bf16 %v9761_v52, %v11589_v41  ;;  %v4502_v18 = vmul.bf16 %v9773_v13, %v11646_v2  ;;  %7223 = vmatpush3.bf16.msra.mxu1 %v7332_v44  ;;  %v11658_v40 = vrot.slane %v9812_v8, 1 }
 0x263   : > { %v9918_v58 = vcombine.low %v4499_v21, %v4500_v27  ;;  %7224 = vmatprep.subr.bf16.mxu1 %v7333_v34  ;;  %v6148_v8 = vsel %vm6146_vm13, %v7334_v28, 0  ;;  %v4899_v21 = vshrl.u32 %v9859_v14, 16 }
 0x264   : > { %v4898_v50 = vsel %vm2205_vm12, %v4893_v5, %v4897_v42  ;;  %v5429_v15 = vsel %vm2453_vm0, %v11658_v40, %v5428_v24  ;;  %v9929_v52 = vcombine.low %v4501_v0, %v4502_v18 }
 0x265   : > { %5623 = vrot.lane.b32.xlu1 %v4898_v50, %s7370_s13 }
 0x266   : > { %5460 = vrot.lane.b32.xlu0 %v5429_v15, %s7369_s26  ;;  %7225 = vmatpush3.bf16.msra.mxu1 %v7333_v34  ;;  %v4901_v15 = vor.u32 %v4899_v21, %v4897_v42 }
 0x267   : > { %v9933_v13 = vld [vmem:[#allocation2 + $0x28] sm:$0xf]  ;;  %v9939_v31 = vld [vmem:[#allocation2 + $0x34] sm:$0xf]  ;;  %7261 = vmatprep.subr.msk.bf16.mxu1 %vm6146_vm13, %v7334_v28 }
 0x268   : > { %v4639_v1 = vmul.bf16 %v9933_v13, %v11589_v41  ;;  %v4572_v46 = vmul.bf16 %v9933_v13, %v11603_v59  ;;  %v9942_v36 = vld [vmem:[#allocation2 + $0x2c] sm:$0xf]  ;;  %v9944_v32 = vld [vmem:[#allocation2 + $0x30] sm:$0xf]  ;;  %v4575_v37 = vmul.bf16 %v9939_v31, %v11605_v51  ;;  %v4642_v62 = vmul.bf16 %v9939_v31, %v11659_v53  ;;  %v11660_v28 = vld [vmem:[#allocation25_spill] sm:$0xff] }
 0x269   : > { %v4606_v41 = vmul.bf16 %v9933_v13, %v11650_v54  ;;  %v4673_v6 = vmul.bf16 %v9933_v13, %v11648_v16  ;;  %5001 = vrot.lane.b32.xlu1 %v4898_v50, %s7363_s12  ;;  %v4640_v55 = vmul.bf16 %v9942_v36, %v11646_v2  ;;  %v4573_v9 = vmul.bf16 %v9942_v36, %v11659_v53 }
 0x26a   : > { %5312 = vrot.lane.b32.xlu0 %v4898_v50, %s7367_s16  ;;  %v4676_v33 = vmul.bf16 %v9939_v31, %v11651_v17  ;;  %v4574_v35 = vmul.bf16 %v9944_v32, %v11606_v63  ;;  %v9967_v16 = vcombine.low %v9933_v13, %v9942_v36  ;;  %v4607_v12 = vmul.bf16 %v9942_v36, %v11651_v17 }
 0x26b   : > { %v4674_v44 = vmul.bf16 %v9942_v36, %v11649_v11  ;;  %v6985_v2 = vcombine.low %v4639_v1, %v4640_v55  ;;  %v6951_v7 = vcombine.low %v4572_v46, %v4573_v9  ;;  %v4641_v38 = vmul.bf16 %v9944_v32, %v11603_v59  ;;  %7227 = vmatpush3.bf16.msra.mxu1 %v6148_v8  ;;  %v11661_v1 = vld [vmem:[#allocation26_spill] sm:$0xff] }
 0x26c   : > { %v4675_v5 = vmul.bf16 %v9944_v32, %v11650_v54  ;;  %v4903_v27 = vshll.u32 %v9967_v16, 16  ;;  %v9979_v34 = vcombine.low %v4606_v41, %v4607_v12  ;;  %v4213_v17 = vrot.slane %v9870_v19, 4 }
 0x26d   : > { %5574 = vrot.lane.b32.xlu1 %v6985_v2, %s7368_s24  ;;  %v7200_v11 = vpop.f32.mrb[12].mxu0  ;;  %v7003_v0 = vcombine.low %v4673_v6, %v4674_v44  ;;  %v4540_v54 = vmul.bf16 %v9942_v36, %v11660_v28  ;;  %v6952_v40 = vcombine.low %v4574_v35, %v4575_v37  ;;  %v4539_v46 = vmul.bf16 %v9933_v13, %v11661_v1  ;;  %v11662_v6 = vld [vmem:[#allocation28_spill] sm:$0xff] }
 0x26e   : > { %5263 = vrot.lane.b32.xlu0 %v6951_v7, %s7365_s14  ;;  %v9984_v18 = vcombine.low %v4675_v5, %v4676_v33  ;;  %v3858_v50 = vmul.f32 %v7200_v11, %v9607_v30  ;;  %v3758_v14 = vpop.f32.mrb[13].mxu0  ;;  %v6986_v55 = vcombine.low %v4641_v38, %v4642_v62  ;;  %v9992_v9 = vrot.slane %v4903_v27, 1  ;;  %v11663_v27 = vld [vmem:[#allocation27_spill] sm:$0xff] }
 0x26f   : > { %v3856_v8 = vmul.f32 %v9607_v30, %v3758_v14  ;;  %v7201_v41 = vpop.f32.mrb[14].mxu0  ;;  %v4541_v33 = vmul.bf16 %v9944_v32, %v11662_v6  ;;  %v5430_v37 = vrot.slane %v9979_v34, 1  ;;  %v9999_v42 = vcombine.low %v4539_v46, %v4540_v54 }
 0x270   : > { %v3897_v12 = vadd.f32 %v9613_v60, %v3858_v50  ;;  %v3859_v44 = vmul.f32 %v7201_v41, %v9607_v30  ;;  %v3761_v2 = vpop.f32.mrb[15].mxu0  ;;  %v5741_v62 = vrot.slane %v7003_v0, 1  ;;  %v11466_v38 = vrot.slane %v9984_v18, 1 }
 0x271   : > { %v3895_v35 = vadd.f32 %v9613_v60, %v3856_v8  ;;  %v3857_v7 = vmul.f32 %v9607_v30, %v3761_v2  ;;  %5265 = vrot.lane.b32.xlu1 %v6952_v40, %s7365_s14  ;;  %v4542_v11 = vmul.bf16 %v9939_v31, %v11663_v27  ;;  %v4906_v30 = vsel %vm2205_vm12, %v4901_v15, %v9992_v9 }
 0x272   : > { %5576 = vrot.lane.b32.xlu0 %v6986_v55, %s7368_s24  ;;  %vm3929_vm1 = vcmp.ge.f32.partialorder %v3897_v12, 0.0  ;;  %v3961_v5 = vmul.f32 0.01, %v3897_v12  ;;  %v3898_v21 = vadd.f32 %v9613_v60, %v3859_v44  ;;  %v5119_v0 = vrot.slane %v9999_v42, 1 }
 0x273   : > { %vm3927_vm15 = vcmp.ge.f32.partialorder %v3895_v35, 0.0  ;;  %v3959_v54 = vmul.f32 0.01, %v3895_v35  ;;  %v3896_v50 = vadd.f32 %v9613_v60, %v3857_v7  ;;  %v10015_v2 = vcombine.low %v4541_v33, %v4542_v11 }
 0x274   : > { %v3993_v14 = vsel %vm3929_vm1, %v3897_v12, %v3961_v5  ;;  %vm3930_vm4 = vcmp.ge.f32.partialorder %v3898_v21, 0.0  ;;  %v3962_v40 = vmul.f32 0.01, %v3898_v21  ;;  %v4907_v60 = vshrl.u32 %v9967_v16, 16 }
 0x275   : > { %v7090_v46 = vpack.c.bf16 %v3993_v14, %v3993_v14  ;;  %v3991_v8 = vsel %vm3927_vm15, %v3895_v35, %v3959_v54  ;;  %vm3928_vm7 = vcmp.ge.f32.partialorder %v3896_v50, 0.0  ;;  %v3960_v41 = vmul.f32 0.01, %v3896_v50  ;;  %5314 = vrot.lane.b32.xlu1 %v4906_v30, %s7367_s16 }
 0x276   : > { %5625 = vrot.lane.b32.xlu0 %v4906_v30, %s7370_s13  ;;  %v7088_v55 = vpack.c.bf16 %v3991_v8, %v3991_v8  ;;  %v3994_v44 = vsel %vm3930_vm4, %v3898_v21, %v3962_v40  ;;  %v5431_v42 = vsel %vm2453_vm0, %v5428_v24, %v5430_v37  ;;  %v11664_v54 = vrot.slane %v9820_v10, 1 }
 0x277   : > { %v4233_v15 = vshrl.u32 %v7090_v46, 16  ;;  %v7091_v12 = vpack.c.bf16 %v3994_v44, %v3994_v44  ;;  %v3992_v7 = vsel %vm3928_vm7, %v3896_v50, %v3960_v41  ;;  %v10028_v33 = vcombine.low %v9944_v32, %v9939_v31 }
 0x278   : > { %v4215_v35 = vshrl.u32 %v7088_v55, 16  ;;  %v7089_v5 = vpack.c.bf16 %v3992_v7, %v3992_v7  ;;  %v5742_v14 = vsel %vm2453_vm0, %v11664_v54, %v5741_v62  ;;  %v5744_v49 = vsel %vm2453_vm0, %v5741_v62, %v11466_v38 }
 0x279   : > { %v4235_v16 = vrot.slane %v4233_v15, 7  ;;  %v4242_v21 = vshrl.u32 %v7091_v12, 16  ;;  %5462 = vrot.lane.b32.xlu1 %v5431_v42, %s7369_s26  ;;  %v11665_v24 = vrot.slane %v9845_v39, 1  ;;  %v4218_v50 = vshll.u32 %v7088_v55, 16 }
 0x27a   : > { %5773 = vrot.lane.b32.xlu0 %v5742_v14, %s7371_s15  ;;  %v4217_v11 = vrot.slane %v4215_v35, 7  ;;  %v4224_v40 = vshrl.u32 %v7089_v5, 16  ;;  %v5121_v8 = vrot.slane %v10015_v2, 1  ;;  %v4236_v41 = vshll.u32 %v7090_v46, 16 }
 0x27b   : > { %v5120_v10 = vsel %vm2453_vm0, %v11665_v24, %v5119_v0  ;;  %v10039_v44 = vrot.slane %v4242_v21, 7  ;;  %v4245_v15 = vshll.u32 %v7091_v12, 16  ;;  %v4608_v7 = vmul.bf16 %v9944_v32, %v11661_v1 }
 0x27c   : > { %v4220_v42 = vor.u32 %v4218_v50, %v4217_v11  ;;  %v4226_v54 = vrot.slane %v4224_v40, 7  ;;  %v4227_v14 = vshll.u32 %v7089_v5, 16  ;;  %v4911_v62 = vshll.u32 %v10028_v33, 16 }
 0x27d   : > { %v4238_v39 = vor.u32 %v4236_v41, %v4235_v16  ;;  %v4240_v38 = vrot.slane %v4235_v16, 4  ;;  %v4247_v35 = vor.u32 %v4245_v15, %v10039_v44  ;;  %5003 = vrot.lane.b32.xlu1 %v4906_v30, %s7363_s12  ;;  %v4609_v46 = vmul.bf16 %v9939_v31, %v11660_v28 }
 0x27e   : > { %5775 = vrot.lane.b32.xlu0 %v5744_v49, %s7371_s15  ;;  %v4221_v55 = vsel %vm7493_vm10, %v4213_v17, %v4220_v42  ;;  %v4222_v12 = vrot.slane %v4217_v11, 4  ;;  %v4229_v5 = vor.u32 %v4227_v14, %v4226_v54  ;;  %v4231_v21 = vrot.slane %v4226_v54, 4 }
 0x27f   : > { %4440 = vst.msk [vmem:[#allocation2 + $0x38] sm:$0xf] %vm334_vm3, %v4221_v55  ;;  %v4248_v16 = vsel %vm7493_vm10, %v4240_v38, %v4247_v35  ;;  %v5122_v30 = vsel %vm2453_vm0, %v5119_v0, %v5121_v8  ;;  %v10059_v49 = vcombine.low %v4608_v7, %v4609_v46  ;;  %v4503_v19 = vmul.bf16 %v9777_v48, %v11603_v59 }
 0x280   : > { %4443 = vst.msk [vmem:[#allocation2 + $0x44] sm:$0xf] %vm334_vm3, %v4248_v16  ;;  %v4230_v17 = vsel %vm7493_vm10, %v4222_v12, %v4229_v5  ;;  %v4239_v24 = vsel %vm7493_vm10, %v4231_v21, %v4238_v39  ;;  %v4909_v11 = vor.u32 %v4907_v60, %v9992_v9  ;;  %v4504_v38 = vmul.bf16 %v9765_v26, %v11659_v53 }
 0x281   : > { %4441 = vst.msk [vmem:[#allocation2 + $0x3c] sm:$0xf] %vm334_vm3, %v4230_v17  ;;  %4442 = vst.msk [vmem:[#allocation2 + $0x40] sm:$0xf] %vm334_vm3, %v4239_v24  ;;  %5153 = vrot.lane.b32.xlu1 %v5122_v30, %s7361_s25  ;;  %v5432_v59 = vrot.slane %v10059_v49, 1  ;;  %v4505_v48 = vmul.bf16 %v9933_v13, %v11606_v63  ;;  %v4506_v0 = vmul.bf16 %v9942_v36, %v11605_v51  ;;  %v4913_v9 = vrot.slane %v4911_v62, 1 }
 0x282   : > { %5151 = vrot.lane.b32.xlu0 %v5120_v10, %s7361_s25  ;;  %v10080_v60 = vcombine.low %v4503_v19, %v4504_v38  ;;  %v4915_v21 = vshrl.u32 %v10028_v33, 16  ;;  %v11667_v24 = vld [vmem:[#allocation41_spill] sm:$0xff] }
 0x283   : > { %v10082_v26 = vcombine.low %v4505_v48, %v4506_v0  ;;  %v4914_v53 = vsel %vm2205_vm12, %v4909_v11, %v4913_v9  ;;  %v5433_v10 = vsel %vm2453_vm0, %v5430_v37, %v5432_v59  ;;  %v11666_v37 = vld [vmem:[#allocation46_spill] sm:$0xff] }
 0x284   : > { %v4917_v0 = vor.u32 %v4915_v21, %v4913_v9 }
 0x285   : > { %5627 = vrot.lane.b32.xlu1 %v4914_v53, %s7370_s13 }
 0x286   : > { %5464 = vrot.lane.b32.xlu0 %v5433_v10, %s7369_s26  ;;  %v10092_v13 = vld [vmem:[#allocation2 + $0x38] sm:$0xf] }
 0x287   : > { %v4643_v36 = vmul.bf16 %v10092_v13, %v11606_v63  ;;  %v4576_v50 = vmul.bf16 %v10092_v13, %v11624_v22  ;;  %v10098_v40 = vld [vmem:[#allocation2 + $0x44] sm:$0xf]  ;;  %v4610_v42 = vmul.bf16 %v10092_v13, %v11662_v6  ;;  %v4677_v63 = vmul.bf16 %v10092_v13, %v11661_v1 }
 0x288   : > { %v10100_v41 = vld [vmem:[#allocation2 + $0x3c] sm:$0xf]  ;;  %v10102_v15 = vld [vmem:[#allocation2 + $0x40] sm:$0xf]  ;;  %v4579_v34 = vmul.bf16 %v10098_v40, %v11625_v20  ;;  %v4646_v7 = vmul.bf16 %v10098_v40, %v11666_v37  ;;  %v4680_v62 = vmul.bf16 %v10098_v40, %v11663_v27 }
 0x289   : > { %5005 = vrot.lane.b32.xlu1 %v4914_v53, %s7363_s12  ;;  %v4644_v54 = vmul.bf16 %v10100_v41, %v11605_v51  ;;  %v4577_v14 = vmul.bf16 %v10100_v41, %v11666_v37  ;;  %v4578_v39 = vmul.bf16 %v10102_v15, %v11626_v45  ;;  %v10124_v35 = vcombine.low %v10092_v13, %v10100_v41 }
 0x28a   : > { %5316 = vrot.lane.b32.xlu0 %v4914_v53, %s7367_s16  ;;  %v4611_v1 = vmul.bf16 %v10100_v41, %v11663_v27  ;;  %v4678_v46 = vmul.bf16 %v10100_v41, %v11660_v28  ;;  %v4645_v12 = vmul.bf16 %v10102_v15, %v11624_v22  ;;  %v4679_v5 = vmul.bf16 %v10102_v15, %v11662_v6  ;;  %v10148_v6 = vld [vmem:[%s11310_s4] ss:$0 sm:$0xff]  ;;  %v11668_v53 = vld [vmem:[#allocation42_spill] sm:$0xff] }
 0x28b   : > { %v6987_v51 = vcombine.low %v4643_v36, %v4644_v54  ;;  %v6953_v55 = vcombine.low %v4576_v50, %v4577_v14  ;;  %v4919_v16 = vshll.u32 %v10124_v35, 16  ;;  %v4544_v11 = vmul.bf16 %v10100_v41, %v11667_v24  ;;  %v11669_v54 = vld [vmem:[#allocation44_spill] sm:$0xff] }
 0x28c   : > { %v10136_v30 = vcombine.low %v4610_v42, %v4611_v1  ;;  %v7204_v28 = vpop.f32.mrb[16].mxu0  ;;  %v7005_v27 = vcombine.low %v4677_v63, %v4678_v46  ;;  %v10141_v17 = vcombine.low %v4679_v5, %v4680_v62  ;;  %v6954_v48 = vcombine.low %v4578_v39, %v4579_v34  ;;  %v10161_v62 = vld [vmem:[%s11311_s5] ss:$0 sm:$0xff] }
 0x28d   : > { %5578 = vrot.lane.b32.xlu1 %v6987_v51, %s7368_s24  ;;  %v3862_v33 = vmul.f32 %v10148_v6, %v7204_v28  ;;  %v3774_v38 = vpop.f32.mrb[17].mxu0  ;;  %v4543_v10 = vmul.bf16 %v10092_v13, %v11668_v53  ;;  %v6988_v42 = vcombine.low %v4645_v12, %v4646_v7  ;;  %v10154_v63 = vrot.slane %v4919_v16, 1  ;;  %v11670_v16 = vld [vmem:[#allocation43_spill] sm:$0xff] }
 0x28e   : > { %5267 = vrot.lane.b32.xlu0 %v6953_v55, %s7365_s14  ;;  %v3860_v36 = vmul.f32 %v10148_v6, %v3774_v38  ;;  %v7205_v50 = vpop.f32.mrb[18].mxu0  ;;  %v4545_v14 = vmul.bf16 %v10102_v15, %v11669_v54  ;;  %v5434_v1 = vrot.slane %v10136_v30, 1  ;;  %v5745_v55 = vrot.slane %v7005_v27, 1 }
 0x28f   : > { %v3901_v34 = vadd.f32 %v10161_v62, %v3862_v33  ;;  %v3863_v9 = vmul.f32 %v10148_v6, %v7205_v50  ;;  %v3777_v39 = vpop.f32.mrb[19].mxu0  ;;  %v10166_v46 = vcombine.low %v4543_v10, %v4544_v11  ;;  %v11467_v12 = vrot.slane %v10141_v17, 1 }
 0x290   : > { %v3899_v7 = vadd.f32 %v10161_v62, %v3860_v36  ;;  %v3861_v51 = vmul.f32 %v10148_v6, %v3777_v39  ;;  %v4546_v28 = vmul.bf16 %v10098_v40, %v11670_v16  ;;  %v4922_v38 = vsel %vm2205_vm12, %v4917_v0, %v10154_v63 }
 0x291   : > { %5269 = vrot.lane.b32.xlu1 %v6954_v48, %s7365_s14  ;;  %vm3933_vm9 = vcmp.ge.f32.partialorder %v3901_v34, 0.0  ;;  %v3965_v5 = vmul.f32 0.01, %v3901_v34  ;;  %v3902_v21 = vadd.f32 %v10161_v62, %v3863_v9  ;;  %v5123_v27 = vrot.slane %v10166_v46, 1 }
 0x292   : > { %5580 = vrot.lane.b32.xlu0 %v6988_v42, %s7368_s24  ;;  %vm3931_vm5 = vcmp.ge.f32.partialorder %v3899_v7, 0.0  ;;  %v3963_v11 = vmul.f32 0.01, %v3899_v7  ;;  %v3900_v33 = vadd.f32 %v10161_v62, %v3861_v51  ;;  %v10182_v19 = vcombine.low %v4545_v14, %v4546_v28 }
 0x293   : > { %v3997_v48 = vsel %vm3933_vm9, %v3901_v34, %v3965_v5  ;;  %vm3934_vm13 = vcmp.ge.f32.partialorder %v3902_v21, 0.0  ;;  %v3966_v10 = vmul.f32 0.01, %v3902_v21  ;;  %v4923_v51 = vshrl.u32 %v10124_v35, 16 }
 0x294   : > { %v7094_v36 = vpack.c.bf16 %v3997_v48, %v3997_v48  ;;  %v3995_v50 = vsel %vm3931_vm5, %v3899_v7, %v3963_v11  ;;  %vm3932_vm1 = vcmp.ge.f32.partialorder %v3900_v33, 0.0  ;;  %v3964_v42 = vmul.f32 0.01, %v3900_v33 }
 0x295   : > { %5318 = vrot.lane.b32.xlu1 %v4922_v38, %s7367_s16  ;;  %v7092_v9 = vpack.c.bf16 %v3995_v50, %v3995_v50  ;;  %v3998_v39 = vsel %vm3934_vm13, %v3902_v21, %v3966_v10  ;;  %v5435_v46 = vsel %vm2453_vm0, %v5432_v59, %v5434_v1  ;;  %v11671_v48 = vrot.slane %v9984_v18, 1 }
 0x296   : > { %5629 = vrot.lane.b32.xlu0 %v4922_v38, %s7370_s13  ;;  %v4269_v0 = vshrl.u32 %v7094_v36, 16  ;;  %v7095_v34 = vpack.c.bf16 %v3998_v39, %v3998_v39  ;;  %v3996_v5 = vsel %vm3932_vm1, %v3900_v33, %v3964_v42  ;;  %v10195_v14 = vcombine.low %v10102_v15, %v10098_v40 }
 0x297   : > { %v4251_v7 = vshrl.u32 %v7092_v9, 16  ;;  %v7093_v11 = vpack.c.bf16 %v3996_v5, %v3996_v5  ;;  %v5746_v50 = vsel %vm2453_vm0, %v11671_v48, %v5745_v55  ;;  %v5748_v49 = vsel %vm2453_vm0, %v5745_v55, %v11467_v12 }
 0x298   : > { %v4271_v35 = vrot.slane %v4269_v0, 7  ;;  %v4278_v21 = vshrl.u32 %v7095_v34, 16  ;;  %v5124_v18 = vsel %vm2453_vm0, %v5121_v8, %v5123_v27  ;;  %v4254_v28 = vshll.u32 %v7092_v9, 16 }
 0x299   : > { %5466 = vrot.lane.b32.xlu1 %v5435_v46, %s7369_s26  ;;  %v4253_v59 = vrot.slane %v4251_v7, 7  ;;  %v4260_v33 = vshrl.u32 %v7093_v11, 16  ;;  %v11470_v10 = vrot.slane %v10182_v19, 1  ;;  %v4272_v42 = vshll.u32 %v7094_v36, 16 }
 0x29a   : > { %5777 = vrot.lane.b32.xlu0 %v5746_v50, %s7371_s15  ;;  %v10206_v39 = vrot.slane %v4278_v21, 7  ;;  %v4281_v0 = vshll.u32 %v7095_v34, 16  ;;  %v4612_v5 = vmul.bf16 %v10102_v15, %v11668_v53  ;;  %v4263_v50 = vshll.u32 %v7093_v11, 16 }
 0x29b   : > { %v4256_v46 = vor.u32 %v4254_v28, %v4253_v59  ;;  %v4262_v48 = vrot.slane %v4260_v33, 7  ;;  %v4927_v55 = vshll.u32 %v10195_v14, 16  ;;  %v4274_v2 = vor.u32 %v4272_v42, %v4271_v35 }
 0x29c   : > { %v4276_v12 = vrot.slane %v4271_v35, 4  ;;  %v4283_v8 = vor.u32 %v4281_v0, %v10206_v39  ;;  %v4613_v36 = vmul.bf16 %v10098_v40, %v11667_v24  ;;  %v11672_v9 = vrot.slane %v10039_v44, 4 }
 0x29d   : > { %5007 = vrot.lane.b32.xlu1 %v4922_v38, %s7363_s12  ;;  %v4258_v7 = vrot.slane %v4253_v59, 4  ;;  %v4265_v11 = vor.u32 %v4263_v50, %v4262_v48  ;;  %v4267_v21 = vrot.slane %v4262_v48, 4  ;;  %v4507_v59 = vmul.bf16 %v9944_v32, %v11624_v22 }
 0x29e   : > { %5779 = vrot.lane.b32.xlu0 %v5748_v49, %s7371_s15  ;;  %v4257_v34 = vsel %vm7493_vm10, %v11672_v9, %v4256_v46  ;;  %v4284_v35 = vsel %vm7493_vm10, %v4276_v12, %v4283_v8  ;;  %v5126_v49 = vsel %vm2453_vm0, %v5123_v27, %v11470_v10  ;;  %v10230_v44 = vcombine.low %v4612_v5, %v4613_v36 }
 0x29f   : > { %4444 = vst.msk [vmem:[#allocation2 + $0x48] sm:$0xf] %vm334_vm3, %v4257_v34  ;;  %v10223_v28 = vpop.permute.xlu1 %5257  ;;  %v10225_v38 = vpop.permute.xlu0 %5255  ;;  %4447 = vst.msk [vmem:[#allocation2 + $0x54] sm:$0xf] %vm334_vm3, %v4284_v35  ;;  %v4266_v33 = vsel %vm7493_vm10, %v4258_v7, %v4265_v11  ;;  %v4275_v12 = vsel %vm7493_vm10, %v4267_v21, %v4274_v2  ;;  %v4925_v42 = vor.u32 %v4923_v51, %v10154_v63  ;;  %v4929_v63 = vrot.slane %v4927_v55, 1 }
 0x2a0   : > { %v4508_v0 = vmul.bf16 %v9939_v31, %v11666_v37  ;;  %4445 = vst.msk [vmem:[#allocation2 + $0x4c] sm:$0xf] %vm334_vm3, %v4266_v33  ;;  %4446 = vst.msk [vmem:[#allocation2 + $0x50] sm:$0xf] %vm334_vm3, %v4275_v12  ;;  %v5436_v22 = vrot.slane %v10230_v44, 1  ;;  %v4509_v32 = vmul.bf16 %v10092_v13, %v11626_v45  ;;  %v4510_v27 = vmul.bf16 %v10100_v41, %v11625_v20 }
 0x2a1   : > { %5157 = vrot.lane.b32.xlu1 %v5126_v49, %s7361_s25  ;;  %v7348_v37 = vld [vmem:[#allocation2 + $0x4] sm:$0xf]  ;;  %v7349_v41 = vld [vmem:[#allocation2] sm:$0xf]  ;;  %v4931_v35 = vshrl.u32 %v10195_v14, 16  ;;  %vm11472_vm5 = vcmask 326656  }
 0x2a2   : > { %5155 = vrot.lane.b32.xlu0 %v5124_v18, %s7361_s25  ;;  %v10251_v51 = vcombine.low %v4507_v59, %v4508_v0  ;;  %v4496_v5 = vmul.bf16 %v7348_v37, %v11641_v25  ;;  %v10256_v46 = vcombine.low %v4509_v32, %v4510_v27  ;;  %v4930_v18 = vsel %vm2205_vm12, %v4925_v42, %v4929_v63 }
 0x2a3   : > { %v10253_v31 = vpop.permute.xlu0 %5568  ;;  %v10258_v48 = vpop.permute.xlu1 %5145  ;;  %v5437_v13 = vsel %vm2453_vm0, %v5434_v1, %v5436_v22  ;;  %v4495_v50 = vmul.bf16 %v7349_v41, %v11638_v4  ;;  %v4933_v37 = vor.u32 %v4931_v35, %v4929_v63  ;;  %vm11471_vm13 = vcmask 392192  }
 0x2a4   : > { %11673 = vst [vmem:[#allocation53_spill] sm:$0xff] %v10256_v46  ;;  %vm6011_vm1 = vcmask 457728  }
 0x2a5   : > { %5631 = vrot.lane.b32.xlu1 %v4930_v18, %s7370_s13  ;;  %v6897_v55 = vcombine.low %v4495_v50, %v4496_v5 }
 0x2a6   : > { %5468 = vrot.lane.b32.xlu0 %v5437_v13, %s7369_s26  ;;  %v10269_v25 = vld [vmem:[#allocation2 + $0x48] sm:$0xf]  ;;  %v10273_v36 = vld [vmem:[#allocation2 + $0x54] sm:$0xf] }
 0x2a7   : > { %v4996_v2 = vpop.permute.xlu0 %4995  ;;  %v4647_v8 = vmul.bf16 %v10269_v25, %v11626_v45  ;;  %v10275_v9 = vld [vmem:[#allocation2 + $0x4c] sm:$0xf]  ;;  %v4580_v30 = vmul.bf16 %v10269_v25, %v11630_v23  ;;  %v10279_v1 = vld [vmem:[#allocation2 + $0x50] sm:$0xf]  ;;  %v4583_v34 = vmul.bf16 %v10273_v36, %v11631_v57  ;;  %v4614_v4 = vmul.bf16 %v10269_v25, %v11669_v54  ;;  %v4998_v49 = vpop.permute.xlu1 %4997 }
 0x2a8   : > { %v4681_v7 = vmul.bf16 %v10269_v25, %v11668_v53  ;;  %v4648_v45 = vmul.bf16 %v10275_v9, %v11625_v20  ;;  %v4581_v11 = vmul.bf16 %v10275_v9, %v11629_v47  ;;  %v4650_v21 = vmul.bf16 %v10273_v36, %v11629_v47 }
 0x2a9   : > { %5009 = vrot.lane.b32.xlu1 %v4930_v18, %s7363_s12  ;;  %v4582_v59 = vmul.bf16 %v10279_v1, %v11632_v56  ;;  %v4649_v53 = vmul.bf16 %v10279_v1, %v11630_v23  ;;  %v10302_v33 = vcombine.low %v10269_v25, %v10275_v9  ;;  %v4615_v20 = vmul.bf16 %v10275_v9, %v11670_v16 }
 0x2aa   : > { %5320 = vrot.lane.b32.xlu0 %v4930_v18, %s7367_s16  ;;  %v5803_v12 = vsel %vm3388_vm6, %v6897_v55, %v4996_v2  ;;  %v6989_v0 = vcombine.low %v4647_v8, %v4648_v45  ;;  %v6955_v32 = vcombine.low %v4580_v30, %v4581_v11  ;;  %v4682_v14 = vmul.bf16 %v10275_v9, %v11667_v24 }
 0x2ab   : > { %v5144_v42 = vpop.permute.xlu0 %5143  ;;  %v4935_v5 = vshll.u32 %v10302_v33, 16  ;;  %v4683_v18 = vmul.bf16 %v10279_v1, %v11669_v54  ;;  %v10316_v41 = vsel %vm3388_vm6, %v9743_v43, %v4998_v49  ;;  %v10320_v24 = vcombine.low %v4614_v4, %v4615_v20 }
 0x2ac   : > { %v5850_v27 = vsel %vm3454_vm8, %v5803_v12, %v5144_v42  ;;  %v7208_v50 = vpop.f32.mrb[20].mxu0  ;;  %v7007_v55 = vcombine.low %v4681_v7, %v4682_v14  ;;  %v6956_v8 = vcombine.low %v4582_v59, %v4583_v34  ;;  %v6990_v30 = vcombine.low %v4649_v53, %v4650_v21  ;;  %v11674_v59 = vld [vmem:[#allocation55_spill] sm:$0xff] }
 0x2ad   : > { %5582 = vrot.lane.b32.xlu1 %v6989_v0, %s7368_s24  ;;  %v3866_v63 = vmul.f32 %v10148_v6, %v7208_v50  ;;  %v3790_v2 = vpop.f32.mrb[21].mxu0  ;;  %v4684_v54 = vmul.bf16 %v10273_v36, %v11670_v16  ;;  %v10328_v11 = vsel %vm3520_vm11, %v5850_v27, %v10225_v38  ;;  %v10330_v35 = vrot.slane %v4935_v5, 1 }
 0x2ae   : > { %5271 = vrot.lane.b32.xlu0 %v6955_v32, %s7365_s14  ;;  %v3864_v45 = vmul.f32 %v10148_v6, %v3790_v2  ;;  %v7209_v43 = vpop.f32.mrb[22].mxu0  ;;  %v4547_v16 = vmul.bf16 %v10269_v25, %v11674_v59  ;;  %v11469_v38 = vrot.slane %v10320_v24, 1  ;;  %v5749_v12 = vrot.slane %v7007_v55, 1  ;;  %v11675_v32 = vld [vmem:[#allocation56_spill] sm:$0xff] }
 0x2af   : > { %v3905_v7 = vadd.f32 %v10161_v62, %v3866_v63  ;;  %v3867_v49 = vmul.f32 %v10148_v6, %v7209_v43  ;;  %v3793_v34 = vpop.f32.mrb[23].mxu0  ;;  %v10335_v21 = vcombine.low %v4683_v18, %v4684_v54  ;;  %v4548_v14 = vmul.bf16 %v10275_v9, %v11675_v32 }
 0x2b0   : > { %v3903_v53 = vadd.f32 %v10161_v62, %v3864_v45  ;;  %v3865_v20 = vmul.f32 %v10148_v6, %v3793_v34  ;;  %v4938_v2 = vsel %vm2205_vm12, %v4933_v37, %v10330_v35  ;;  %v11676_v37 = vrot.slane %v10141_v17, 1  ;;  %v11678_v17 = vld [vmem:[#allocation57_spill] sm:$0xff] }
 0x2b1   : > { %5273 = vrot.lane.b32.xlu1 %v6956_v8, %s7365_s14  ;;  %vm3937_vm15 = vcmp.ge.f32.partialorder %v3905_v7, 0.0  ;;  %v3969_v42 = vmul.f32 0.01, %v3905_v7  ;;  %v3906_v0 = vadd.f32 %v10161_v62, %v3867_v49  ;;  %v11468_v18 = vrot.slane %v10335_v21, 1 }
 0x2b2   : > { %5584 = vrot.lane.b32.xlu0 %v6990_v30, %s7368_s24  ;;  %vm3935_vm4 = vcmp.ge.f32.partialorder %v3903_v53, 0.0  ;;  %v3967_v27 = vmul.f32 0.01, %v3903_v53  ;;  %v3904_v5 = vadd.f32 %v10161_v62, %v3865_v20  ;;  %v10351_v30 = vpop.permute.xlu0 %5456  ;;  %v5750_v49 = vsel %vm2453_vm0, %v11676_v37, %v5749_v12 }
 0x2b3   : > { %v4001_v50 = vsel %vm3937_vm15, %v3905_v7, %v3969_v42  ;;  %vm3938_vm7 = vcmp.ge.f32.partialorder %v3906_v0, 0.0  ;;  %v3970_v63 = vmul.f32 0.01, %v3906_v0  ;;  %v5439_v7 = vsel %vm2453_vm0, %v5436_v22, %v11469_v38 }
 0x2b4   : > { %v7098_v55 = vpack.c.bf16 %v4001_v50, %v4001_v50  ;;  %v3999_v8 = vsel %vm3935_vm4, %v3903_v53, %v3967_v27  ;;  %vm3936_vm9 = vcmp.ge.f32.partialorder %v3904_v5, 0.0  ;;  %v3968_v54 = vmul.f32 0.01, %v3904_v5 }
 0x2b5   : > { %5322 = vrot.lane.b32.xlu1 %v4938_v2, %s7367_s16  ;;  %v7096_v45 = vpack.c.bf16 %v3999_v8, %v3999_v8  ;;  %v4002_v43 = vsel %vm3938_vm7, %v3906_v0, %v3970_v63  ;;  %v5752_v42 = vsel %vm2453_vm0, %v5749_v12, %v11468_v18  ;;  %v11677_v63 = vld [vmem:[#allocation5_spill] sm:$0xff]  ;;  %v6939_v12 = vcombine.low %v4547_v16, %v4548_v14 }
 0x2b6   : > { %5633 = vrot.lane.b32.xlu0 %v4938_v2, %s7370_s13  ;;  %v4305_v34 = vshrl.u32 %v7098_v55, 16  ;;  %v7099_v53 = vpack.c.bf16 %v4002_v43, %v4002_v43  ;;  %v4000_v20 = vsel %vm3936_vm9, %v3904_v5, %v3968_v54  ;;  %v4308_v27 = vshll.u32 %v7098_v55, 16  ;;  %v5309_v38 = vpop.permute.xlu0 %5308 }
 0x2b7   : > { %v4287_v50 = vshrl.u32 %v7096_v45, 16  ;;  %v7097_v0 = vpack.c.bf16 %v4000_v20, %v4000_v20  ;;  %v4549_v8 = vmul.bf16 %v10279_v1, %v11677_v63  ;;  %v4290_v4 = vshll.u32 %v7096_v45, 16 }
 0x2b8   : > { %v4307_v44 = vrot.slane %v4305_v34, 7  ;;  %v4314_v22 = vshrl.u32 %v7099_v53, 16  ;;  %v4550_v5 = vmul.bf16 %v10273_v36, %v11678_v17  ;;  %v4317_v43 = vshll.u32 %v7099_v53, 16 }
 0x2b9   : > { %5470 = vrot.lane.b32.xlu1 %v5439_v7, %s7369_s26  ;;  %v4289_v54 = vrot.slane %v4287_v50, 7  ;;  %v4296_v37 = vshrl.u32 %v7097_v0, 16  ;;  %v4299_v20 = vshll.u32 %v7097_v0, 16  ;;  %v5127_v7 = vrot.slane %v6939_v12, 1 }
 0x2ba   : > { %5781 = vrot.lane.b32.xlu0 %v5750_v49, %s7371_s15  ;;  %v4310_v55 = vor.u32 %v4308_v27, %v4307_v44  ;;  %v10372_v18 = vrot.slane %v4314_v22, 7  ;;  %v10374_v10 = vcombine.low %v4549_v8, %v4550_v5  ;;  %v4312_v45 = vrot.slane %v4307_v44, 4 }
 0x2bb   : > { %v4292_v34 = vor.u32 %v4290_v4, %v4289_v54  ;;  %v4298_v13 = vrot.slane %v4296_v37, 7  ;;  %v4294_v46 = vrot.slane %v4289_v54, 4  ;;  %v10382_v14 = vcombine.low %v10279_v1, %v10273_v36 }
 0x2bc   : > { %v4319_v49 = vor.u32 %v4317_v43, %v10372_v18  ;;  %v11473_v16 = vrot.slane %v10374_v10, 1  ;;  %v11679_v53 = vrot.slane %v10206_v39, 4  ;;  %v11680_v0 = vrot.slane %v10182_v19, 1 }
 0x2bd   : > { %5011 = vrot.lane.b32.xlu1 %v4938_v2, %s7363_s12  ;;  %v4301_v27 = vor.u32 %v4299_v20, %v4298_v13  ;;  %v4303_v50 = vrot.slane %v4298_v13, 4  ;;  %v11681_v13 = vshrl.u32 %v10302_v33, 16  ;;  %v4943_v19 = vshll.u32 %v10382_v14, 16 }
 0x2be   : > { %5783 = vrot.lane.b32.xlu0 %v5752_v42, %s7371_s15  ;;  %v4293_v4 = vsel %vm7493_vm10, %v11679_v53, %v4292_v34  ;;  %v5128_v8 = vsel %vm2453_vm0, %v11680_v0, %v5127_v7  ;;  %v4320_v2 = vsel %vm7493_vm10, %v4312_v45, %v4319_v49  ;;  %v5130_v39 = vsel %vm2453_vm0, %v5127_v7, %v11473_v16 }
 0x2bf   : > { %4448 = vst.msk [vmem:[#allocation2 + $0x58] sm:$0xf] %vm334_vm3, %v4293_v4  ;;  %v10394_v42 = vpop.permute.xlu1 %5570  ;;  %v10396_v44 = vpop.permute.xlu0 %5259  ;;  %v4941_v22 = vor.u32 %v11681_v13, %v10330_v35  ;;  %4451 = vst.msk [vmem:[#allocation2 + $0x64] sm:$0xf] %vm334_vm3, %v4320_v2  ;;  %v4302_v5 = vsel %vm7493_vm10, %v4294_v46, %v4301_v27  ;;  %v4311_v54 = vsel %vm7493_vm10, %v4303_v50, %v4310_v55  ;;  %v10420_v46 = vrot.slane %v4943_v19, 1  ;;  %v11683_v19 = vld [vmem:[#allocation34_spill] sm:$0xff] }
 0x2c0   : > { %v4616_v43 = vmul.bf16 %v10279_v1, %v11674_v59  ;;  %v4617_v37 = vmul.bf16 %v10273_v36, %v11675_v32  ;;  %4449 = vst.msk [vmem:[#allocation2 + $0x5c] sm:$0xf] %vm334_vm3, %v4302_v5  ;;  %4450 = vst.msk [vmem:[#allocation2 + $0x60] sm:$0xf] %vm334_vm3, %v4311_v54  ;;  %v5914_v33 = vsel %vm3586_vm14, %v10328_v11, %v5309_v38  ;;  %vm6044_vm15 = vcmask 523264  }
 0x2c1   : > { %5161 = vrot.lane.b32.xlu1 %v5130_v39, %s7361_s25  ;;  %v4511_v12 = vmul.bf16 %v10102_v15, %v11630_v23  ;;  %v4512_v55 = vmul.bf16 %v10098_v40, %v11629_v47  ;;  %v5852_v20 = vsel %vm3454_vm8, %v10316_v41, %v10258_v48  ;;  %v4513_v38 = vmul.bf16 %v10269_v25, %v11632_v56 }
 0x2c2   : > { %5159 = vrot.lane.b32.xlu0 %v5128_v8, %s7361_s25  ;;  %v10422_v35 = vcombine.low %v4616_v43, %v4617_v37  ;;  %v4514_v34 = vmul.bf16 %v10275_v9, %v11631_v57  ;;  %v5947_v23 = vsel %vm11472_vm5, %v5914_v33, %v10351_v30  ;;  %v4946_v47 = vsel %vm2205_vm12, %v4941_v22, %v10420_v46 }
 0x2c3   : > { %v10431_v45 = vpop.permute.xlu1 %5261  ;;  %v10433_v11 = vpop.permute.xlu0 %5572  ;;  %v10444_v15 = vcombine.low %v4511_v12, %v4512_v55  ;;  %v11682_v25 = vrot.slane %v10320_v24, 1  ;;  %v5884_v41 = vsel %vm3520_vm11, %v5852_v20, %v10223_v28  ;;  %vm6113_vm4 = vcmask 588800   ;;  %v11684_v55 = vld [vmem:[#allocation36_spill] sm:$0xff] }
 0x2c4   : > { %v5440_v40 = vrot.slane %v10422_v35, 1  ;;  %v10447_v48 = vcombine.low %v4513_v38, %v4514_v34  ;;  %v5980_v49 = vsel %vm11471_vm13, %v5947_v23, %v10253_v31  ;;  %v4947_v28 = vshrl.u32 %v10382_v14, 16 }
 0x2c5   : > { %5635 = vrot.lane.b32.xlu1 %v4946_v47, %s7370_s13 }
 0x2c6   : > { %v5441_v9 = vsel %vm2453_vm0, %v11682_v25, %v5440_v40  ;;  %v10456_v30 = vld [vmem:[#allocation2 + $0x58] sm:$0xf]  ;;  %v10465_v27 = vld [vmem:[#allocation2 + $0x64] sm:$0xf] }
 0x2c7   : > { %5472 = vrot.lane.b32.xlu0 %v5441_v9, %s7369_s26  ;;  %v5311_v7 = vpop.permute.xlu1 %5310  ;;  %v5622_v53 = vpop.permute.xlu0 %5621  ;;  %v4651_v4 = vmul.bf16 %v10456_v30, %v11632_v56  ;;  %v4584_v24 = vmul.bf16 %v10456_v30, %v9006_v61  ;;  %v10470_v8 = vld [vmem:[#allocation2 + $0x5c] sm:$0xf]  ;;  %v10472_v2 = vld [vmem:[#allocation2 + $0x60] sm:$0xf]  ;;  %v4685_v31 = vmul.bf16 %v10456_v30, %v11674_v59  ;;  %v4618_v56 = vmul.bf16 %v10456_v30, %v11677_v63 }
 0x2c8   : > { %v5916_v50 = vsel %vm3586_vm14, %v5884_v41, %v5311_v7  ;;  %v6013_v0 = vsel %vm6011_vm1, %v5980_v49, %v5622_v53  ;;  %v4652_v39 = vmul.bf16 %v10470_v8, %v11631_v57  ;;  %v4585_v14 = vmul.bf16 %v10470_v8, %v8985_v3  ;;  %v11685_v53 = vld [vmem:[#allocation62_spill] sm:$0xff] }
 0x2c9   : > { %5013 = vrot.lane.b32.xlu1 %v4946_v47, %s7363_s12  ;;  %v10485_v13 = vcombine.low %v10456_v30, %v10470_v8  ;;  %v4688_v22 = vmul.bf16 %v10465_v27, %v11678_v17  ;;  %v4587_v59 = vmul.bf16 %v10465_v27, %v11683_v19  ;;  %v4686_v5 = vmul.bf16 %v10470_v8, %v11675_v32 }
 0x2ca   : > { %v4619_v54 = vmul.bf16 %v10470_v8, %v11678_v17  ;;  %v4687_v57 = vmul.bf16 %v10472_v2, %v11677_v63  ;;  %v6991_v33 = vcombine.low %v4651_v4, %v4652_v39  ;;  %v6957_v12 = vcombine.low %v4584_v24, %v4585_v14  ;;  %v11686_v39 = vld [vmem:[#allocation63_spill] sm:$0xff] }
 0x2cb   : > { %5324 = vrot.lane.b32.xlu0 %v4946_v47, %s7367_s16  ;;  %v5459_v43 = vpop.permute.xlu1 %5458  ;;  %v5770_v37 = vpop.permute.xlu0 %5769  ;;  %v4586_v20 = vmul.bf16 %v10472_v2, %v11684_v55  ;;  %v4951_v38 = vshll.u32 %v10485_v13, 16  ;;  %v10503_v23 = vcombine.low %v4685_v31, %v4686_v5  ;;  %v4949_v49 = vor.u32 %v4947_v28, %v10420_v46 }
 0x2cc   : > { %v5949_v34 = vsel %vm11472_vm5, %v5916_v50, %v5459_v43  ;;  %v6046_v32 = vsel %vm6044_vm15, %v6013_v0, %v5770_v37  ;;  %v10505_v17 = vcombine.low %v4618_v56, %v4619_v54  ;;  %v7212_v63 = vpop.f32.mrb[24].mxu0  ;;  %v10511_v25 = vcombine.low %v4687_v57, %v4688_v22  ;;  %v11687_v37 = vld [vmem:[#allocation64_spill] sm:$0xff] }
 0x2cd   : > { %7228 = vmatprep.mubr.msk.bf16.mxu1 %vm6113_vm4, %v6046_v32  ;;  %5586 = vrot.lane.b32.xlu1 %v6991_v33, %s7368_s24  ;;  %v10509_v47 = vrot.slane %v4951_v38, 1  ;;  %v3870_v41 = vmul.f32 %v10148_v6, %v7212_v63  ;;  %v3806_v7 = vpop.f32.mrb[25].mxu0  ;;  %v4552_v4 = vmul.bf16 %v10470_v8, %v11685_v53  ;;  %v6958_v31 = vcombine.low %v4586_v20, %v4587_v59 }
 0x2ce   : > { %v3868_v24 = vmul.f32 %v10148_v6, %v3806_v7  ;;  %v5982_v56 = vsel %vm11471_vm13, %v5949_v34, %v10394_v42  ;;  %v4551_v14 = vmul.bf16 %v10456_v30, %v11686_v39  ;;  %v7213_v5 = vpop.f32.mrb[26].mxu0  ;;  %v5753_v28 = vrot.slane %v10503_v23, 1 }
 0x2cf   : > { %5275 = vrot.lane.b32.xlu0 %v6957_v12, %s7365_s14  ;;  %v5000_v50 = vpop.permute.xlu1 %4999  ;;  %v5772_v0 = vpop.permute.xlu0 %5771  ;;  %v3909_v22 = vadd.f32 %v10161_v62, %v3870_v41  ;;  %v10527_v46 = vsel %vm2205_vm12, %v4949_v49, %v10509_v47  ;;  %v11474_v54 = vrot.slane %v10505_v17, 1  ;;  %v3871_v59 = vmul.f32 %v10148_v6, %v7213_v5 }
 0x2d0   : > { %v3907_v57 = vadd.f32 %v10161_v62, %v3868_v24  ;;  %v3809_v43 = vpop.f32.mrb[27].mxu0  ;;  %v4553_v33 = vmul.bf16 %v10472_v2, %v11687_v37  ;;  %v10538_v38 = vcombine.low %v4551_v14, %v4552_v4  ;;  %v5809_v32 = vsel %vm3388_vm6, %v9918_v58, %v5000_v50 }
 0x2d1   : > { %5277 = vrot.lane.b32.xlu1 %v6958_v31, %s7365_s14  ;;  %vm3941_vm7 = vcmp.ge.f32.partialorder %v3909_v22, 0.0  ;;  %v3973_v12 = vmul.f32 0.01, %v3909_v22  ;;  %v3869_v20 = vmul.f32 %v10148_v6, %v3809_v43  ;;  %v3910_v23 = vadd.f32 %v10161_v62, %v3871_v59  ;;  %v11689_v31 = vld [vmem:[#allocation65_spill] sm:$0xff] }
 0x2d2   : > { %vm3939_vm9 = vcmp.ge.f32.partialorder %v3907_v57, 0.0  ;;  %v3971_v34 = vmul.f32 0.01, %v3907_v57  ;;  %v11688_v24 = vrot.slane %v10335_v21, 1  ;;  %v4554_v14 = vmul.bf16 %v10465_v27, %v11689_v31 }
 0x2d3   : > { %5637 = vrot.lane.b32.xlu0 %v10527_v46, %s7370_s13  ;;  %v10545_v63 = vpop.permute.xlu1 %5149  ;;  %v4005_v7 = vsel %vm3941_vm7, %v3909_v22, %v3973_v12  ;;  %v3908_v49 = vadd.f32 %v10161_v62, %v3869_v20  ;;  %vm3942_vm13 = vcmp.ge.f32.partialorder %v3910_v23, 0.0  ;;  %v3974_v50 = vmul.f32 0.01, %v3910_v23 }
 0x2d4   : > { %v5148_v41 = vpop.permute.xlu0 %5147  ;;  %v5754_v4 = vsel %vm2453_vm0, %v11688_v24, %v5753_v28  ;;  %v7102_v5 = vpack.c.bf16 %v4005_v7, %v4005_v7  ;;  %v4003_v58 = vsel %vm3939_vm9, %v3907_v57, %v3971_v34  ;;  %v5443_v21 = vsel %vm2453_vm0, %v5440_v40, %v11474_v54 }
 0x2d5   : > { %5326 = vrot.lane.b32.xlu1 %v10527_v46, %s7367_s16  ;;  %v7100_v59 = vpack.c.bf16 %v4003_v58, %v4003_v58  ;;  %vm3940_vm5 = vcmp.ge.f32.partialorder %v3908_v49, 0.0  ;;  %v3972_v43 = vmul.f32 0.01, %v3908_v49  ;;  %v4006_v12 = vsel %vm3942_vm13, %v3910_v23, %v3974_v50 }
 0x2d6   : > { %v4341_v22 = vshrl.u32 %v7102_v5, 16  ;;  %v5854_v20 = vsel %vm3454_vm8, %v5809_v32, %v5148_v41  ;;  %v5131_v7 = vrot.slane %v10538_v38, 1  ;;  %v7103_v58 = vpack.c.bf16 %v4006_v12, %v4006_v12 }
 0x2d7   : > { %5785 = vrot.lane.b32.xlu0 %v5754_v4, %s7371_s15  ;;  %v5624_v57 = vpop.permute.xlu1 %5623  ;;  %v4323_v24 = vshrl.u32 %v7100_v59, 16  ;;  %v4004_v9 = vsel %vm3940_vm5, %v3908_v49, %v3972_v43  ;;  %v10565_v16 = vcombine.low %v4553_v33, %v4554_v14  ;;  %v11690_v32 = vrot.slane %v10511_v25, 1 }
 0x2d8   : > { %v10562_v34 = vpop.permute.xlu0 %5460  ;;  %v4343_v42 = vrot.slane %v4341_v22, 7  ;;  %v7101_v35 = vpack.c.bf16 %v4004_v9, %v4004_v9  ;;  %v6015_v40 = vsel %vm6011_vm1, %v5982_v56, %v5624_v57  ;;  %v4326_v4 = vshll.u32 %v7100_v59, 16 }
 0x2d9   : > { %5474 = vrot.lane.b32.xlu1 %v5443_v21, %s7369_s26  ;;  %v5756_v23 = vsel %vm2453_vm0, %v5753_v28, %v11690_v32  ;;  %v4325_v41 = vrot.slane %v4323_v24, 7  ;;  %v4350_v50 = vshrl.u32 %v7103_v58, 16  ;;  %v6048_v38 = vsel %vm6044_vm15, %v6015_v40, %v5772_v0 }
 0x2da   : > { %v4344_v54 = vshll.u32 %v7102_v5, 16  ;;  %v4332_v12 = vshrl.u32 %v7101_v35, 16  ;;  %7229 = vmatmul.mubr.msk.bf16.vlgmr.msra.gmra.mrb[0].mxu1 %vm6113_vm4, %v6048_v38  ;;  %v5886_v56 = vsel %vm3520_vm11, %v5854_v20, %v10396_v44  ;;  %v11691_v49 = vrot.slane %v10374_v10, 1 }
 0x2db   : > { %5787 = vrot.lane.b32.xlu0 %v5756_v23, %s7371_s15  ;;  %v5002_v9 = vpop.permute.xlu1 %5001  ;;  %v4328_v14 = vor.u32 %v4326_v4, %v4325_v41  ;;  %v10580_v59 = vrot.slane %v4350_v50, 7  ;;  %v4353_v43 = vshll.u32 %v7103_v58, 16  ;;  %v5133_v0 = vrot.slane %v10565_v16, 1 }
 0x2dc   : > { %v5313_v33 = vpop.permute.xlu0 %5312  ;;  %v5132_v28 = vsel %vm2453_vm0, %v11691_v49, %v5131_v7  ;;  %v4346_v5 = vor.u32 %v4344_v54, %v4343_v42  ;;  %v4334_v21 = vrot.slane %v4332_v12, 7  ;;  %v4335_v22 = vshll.u32 %v7101_v35, 16 }
 0x2dd   : > { %5015 = vrot.lane.b32.xlu1 %v10527_v46, %s7363_s12  ;;  %v10587_v44 = vcombine.low %v10472_v2, %v10465_v27  ;;  %v4348_v20 = vrot.slane %v4343_v42, 4  ;;  %v11692_v10 = vrot.slane %v10372_v18, 4  ;;  %v4330_v24 = vrot.slane %v4325_v41, 4 }
 0x2de   : > { %v4355_v58 = vor.u32 %v4353_v43, %v10580_v59  ;;  %v4337_v54 = vor.u32 %v4335_v22, %v4334_v21  ;;  %v4339_v35 = vrot.slane %v4334_v21, 4  ;;  %v4955_v42 = vshrl.u32 %v10485_v13, 16 }
 0x2df   : > { %v4329_v57 = vsel %vm7493_vm10, %v11692_v10, %v4328_v14  ;;  %5163 = vrot.lane.b32.xlu0 %v5132_v28, %s7361_s25  ;;  %v10596_v46 = vpop.permute.xlu1 %5574  ;;  %v4959_v18 = vshll.u32 %v10587_v44, 16  ;;  %v5134_v23 = vsel %vm2453_vm0, %v5131_v7, %v5133_v0  ;;  %v4620_v41 = vmul.bf16 %v10472_v2, %v11686_v39 }
 0x2e0   : > { %4452 = vst.msk [vmem:[#allocation2 + $0x68] sm:$0xf] %vm334_vm3, %v4329_v57  ;;  %v10598_v40 = vpop.permute.xlu0 %5263  ;;  %v4356_v32 = vsel %vm7493_vm10, %v4348_v20, %v4355_v58  ;;  %v4621_v4 = vmul.bf16 %v10465_v27, %v11685_v53  ;;  %v4338_v13 = vsel %vm7493_vm10, %v4330_v24, %v4337_v54  ;;  %v4347_v50 = vsel %vm7493_vm10, %v4339_v35, %v4346_v5 }
 0x2e1   : > { %4455 = vst.msk [vmem:[#allocation2 + $0x74] sm:$0xf] %vm334_vm3, %v4356_v32  ;;  %5165 = vrot.lane.b32.xlu1 %v5134_v23, %s7361_s25  ;;  %v4957_v38 = vor.u32 %v4955_v42, %v10509_v47  ;;  %v4961_v12 = vrot.slane %v4959_v18, 1  ;;  %4453 = vst.msk [vmem:[#allocation2 + $0x6c] sm:$0xf] %vm334_vm3, %v4338_v13  ;;  %v5918_v7 = vsel %vm3586_vm14, %v5886_v56, %v5313_v33  ;;  %vm11693_vm5 = vcmask 326656  }
 0x2e2   : > { %4454 = vst.msk [vmem:[#allocation2 + $0x70] sm:$0xf] %vm334_vm3, %v4347_v50  ;;  %v10621_v49 = vcombine.low %v4620_v41, %v4621_v4  ;;  %v4515_v5 = vmul.bf16 %v10279_v1, %v9006_v61  ;;  %v5812_v47 = vsel %vm3388_vm6, %v9929_v52, %v5002_v9  ;;  %v4516_v56 = vmul.bf16 %v10273_v36, %v8985_v3  ;;  %vm11698_vm9 = vmmov %vm11693_vm5 }
 0x2e3   : > { %v4962_v28 = vsel %vm2205_vm12, %v4957_v38, %v4961_v12  ;;  %v10624_v14 = vpop.permute.xlu1 %5265  ;;  %v5951_v33 = vsel %vm11693_vm5, %v5918_v7, %v10562_v34  ;;  %v4653_v22 = vmul.bf16 %v10472_v2, %v9006_v61  ;;  %v4654_v1 = vmul.bf16 %v10465_v27, %v8985_v3 }
 0x2e4   : > { %v10626_v43 = vpop.permute.xlu0 %5576  ;;  %5328 = vrot.lane.b32.xlu0 %v4962_v28, %s7367_s16  ;;  %v5444_v21 = vrot.slane %v10621_v49, 1  ;;  %v4518_v52 = vmul.bf16 %v10470_v8, %v11683_v19  ;;  %v10647_v20 = vcombine.low %v4515_v5, %v4516_v56  ;;  %v4517_v36 = vmul.bf16 %v10456_v30, %v11684_v55 }
 0x2e5   : > { %5639 = vrot.lane.b32.xlu1 %v4962_v28, %s7370_s13  ;;  %v11694_v34 = vrot.slane %v10505_v17, 1  ;;  %v4357_v3 = vrot.slane %v10580_v59, 4  ;;  %v5856_v8 = vsel %vm3454_vm8, %v5812_v47, %v10545_v63  ;;  %vm11695_vm13 = vcmask 392192  }
 0x2e6   : > { %v5984_v24 = vsel %vm11695_vm13, %v5951_v33, %v10433_v11  ;;  %v10664_v30 = vcombine.low %v4517_v36, %v4518_v52  ;;  %v6992_v17 = vcombine.low %v4653_v22, %v4654_v1  ;;  %v4963_v35 = vshrl.u32 %v10587_v44, 16 }
 0x2e7   : > { %v10645_v9 = vld [vmem:[#allocation2 + $0x68] sm:$0xf]  ;;  %v5445_v10 = vsel %vm2453_vm0, %v11694_v34, %v5444_v21  ;;  %v5315_v61 = vpop.permute.xlu1 %5314 }
 0x2e8   : > { %v5626_v57 = vpop.permute.xlu0 %5625  ;;  %5476 = vrot.lane.b32.xlu0 %v5445_v10, %s7369_s26  ;;  %v10662_v58 = vld [vmem:[#allocation2 + $0x74] sm:$0xf]  ;;  %v10667_v54 = vld [vmem:[#allocation2 + $0x6c] sm:$0xf]  ;;  %v4689_v42 = vmul.bf16 %v10645_v9, %v11686_v39  ;;  %v5888_v39 = vsel %vm3520_vm11, %v5856_v8, %v10431_v45  ;;  %v4965_v50 = vor.u32 %v4963_v35, %v4961_v12  ;;  %v4622_v38 = vmul.bf16 %v10645_v9, %v11687_v37 }
 0x2e9   : > { %5017 = vrot.lane.b32.xlu1 %v4962_v28, %s7363_s12  ;;  %v10672_v63 = vld [vmem:[#allocation2 + $0x70] sm:$0xf]  ;;  %v4692_v18 = vmul.bf16 %v10662_v58, %v11689_v31  ;;  %v10678_v11 = vcombine.low %v10645_v9, %v10667_v54  ;;  %v4690_v32 = vmul.bf16 %v10667_v54, %v11685_v53  ;;  %v4623_v23 = vmul.bf16 %v10667_v54, %v11689_v31 }
 0x2ea   : > { %v4691_v44 = vmul.bf16 %v10672_v63, %v11687_v37  ;;  %v6017_v41 = vsel %vm6011_vm1, %v5984_v24, %v5626_v57  ;;  %v4655_v5 = vmul.bf16 %v10645_v9, %v11684_v55  ;;  %v5920_v45 = vsel %vm3586_vm14, %v5888_v39, %v5315_v61  ;;  %v11696_v37 = vld [vmem:[#allocation35_spill] sm:$0xff]  ;;  %v11697_v24 = vld [vmem:[#allocation33_spill] sm:$0xff] }
 0x2eb   : > { %v5463_v4 = vpop.permute.xlu1 %5462  ;;  %v4967_v31 = vshll.u32 %v10678_v11, 16  ;;  %v7011_v28 = vcombine.low %v4689_v42, %v4690_v32  ;;  %v10699_v56 = vcombine.low %v4622_v38, %v4623_v23  ;;  %v4555_v33 = vmul.bf16 %v10645_v9, %v11696_v37 }
 0x2ec   : > { %v5774_v13 = vpop.permute.xlu0 %5773  ;;  %5588 = vrot.lane.b32.xlu0 %v6992_v17, %s7368_s24  ;;  %v7216_v7 = vpop.f32.mrb[28].mxu0  ;;  %v10706_v36 = vcombine.low %v4691_v44, %v4692_v18  ;;  %v4656_v55 = vmul.bf16 %v10667_v54, %v11683_v19  ;;  %v10718_v8 = vcombine.low %v10672_v63, %v10662_v58  ;;  %v4556_v17 = vmul.bf16 %v10667_v54, %v11697_v24 }
 0x2ed   : > { %v6050_v53 = vsel %vm6044_vm15, %v6017_v41, %v5774_v13  ;;  %v3874_v47 = vmul.f32 %v10148_v6, %v7216_v7  ;;  %v3822_v12 = vpop.f32.mrb[29].mxu0  ;;  %v10704_v52 = vrot.slane %v4967_v31, 1  ;;  %v5757_v18 = vrot.slane %v7011_v28, 1 }
 0x2ee   : > { %7232 = vmatprep.mubr.msk.bf16.mxu1 %vm6113_vm4, %v6050_v53  ;;  %v3872_v22 = vmul.f32 %v10148_v6, %v3822_v12  ;;  %v7217_v1 = vpop.f32.mrb[30].mxu0  ;;  %v5446_v32 = vrot.slane %v10699_v56, 1  ;;  %v5953_v41 = vsel %vm11698_vm9, %v5920_v45, %v5463_v4  ;;  %vm11700_vm9 = vcmask 392192  }
 0x2ef   : > { %v3913_v34 = vadd.f32 %v10161_v62, %v3874_v47  ;;  %v10711_v10 = vpop.permute.xlu1 %5003  ;;  %v3875_v57 = vmul.f32 %v10148_v6, %v7217_v1  ;;  %v10725_v19 = vsel %vm2205_vm12, %v4965_v50, %v10704_v52  ;;  %v3825_v42 = vpop.f32.mrb[31].mxu0  ;;  %v5759_v50 = vrot.slane %v10706_v36, 1  ;;  %v11714_v36 = vld [vmem:[#allocation52_spill] sm:$0xff] }
 0x2f0   : > { %v10713_v61 = vpop.permute.xlu0 %5775  ;;  %v3911_v35 = vadd.f32 %v10161_v62, %v3872_v22  ;;  %5641 = vrot.lane.b32.xlu0 %v10725_v19, %s7370_s13  ;;  %5330 = vrot.lane.b32.xlu1 %v10725_v19, %s7367_s16  ;;  %v3873_v39 = vmul.f32 %v10148_v6, %v3825_v42  ;;  %v11699_v22 = vrot.slane %v10511_v25, 1  ;;  %v5447_v4 = vsel %vm2453_vm0, %v5444_v21, %v5446_v32 }
 0x2f1   : > { %vm3945_vm7 = vcmp.ge.f32.partialorder %v3913_v34, 0.0  ;;  %v3977_v23 = vmul.f32 0.01, %v3913_v34  ;;  %v3914_v44 = vadd.f32 %v10161_v62, %v3875_v57  ;;  %v5986_v25 = vsel %vm11700_vm9, %v5953_v41, %v10596_v46 }
 0x2f2   : > { %vm3943_vm5 = vcmp.ge.f32.partialorder %v3911_v35, 0.0  ;;  %v3975_v13 = vmul.f32 0.01, %v3911_v35  ;;  %v3912_v7 = vadd.f32 %v10161_v62, %v3873_v39  ;;  %v5758_v6 = vsel %vm2453_vm0, %v11699_v22, %v5757_v18 }
 0x2f3   : > { %v4009_v38 = vsel %vm3945_vm7, %v3913_v34, %v3977_v23  ;;  %vm3946_vm13 = vcmp.ge.f32.partialorder %v3914_v44, 0.0  ;;  %v3978_v53 = vmul.f32 0.01, %v3914_v44  ;;  %v10737_v31 = vpop.permute.xlu1 %5153  ;;  %v5760_v21 = vsel %vm2453_vm0, %v5757_v18, %v5759_v50 }
 0x2f4   : > { %v10739_v28 = vpop.permute.xlu0 %5151  ;;  %v7106_v47 = vpack.c.bf16 %v4009_v38, %v4009_v38  ;;  %v4007_v12 = vsel %vm3943_vm5, %v3911_v35, %v3975_v13  ;;  %vm3944_vm7 = vcmp.ge.f32.partialorder %v3912_v7, 0.0  ;;  %v3976_v62 = vmul.f32 0.01, %v3912_v7  ;;  %5789 = vrot.lane.b32.xlu0 %v5758_v6, %s7371_s15  ;;  %5478 = vrot.lane.b32.xlu1 %v5447_v4, %s7369_s26 }
 0x2f5   : > { %v7104_v45 = vpack.c.bf16 %v4007_v12, %v4007_v12  ;;  %v4010_v1 = vsel %vm3946_vm13, %v3914_v44, %v3978_v53  ;;  %v6993_v35 = vcombine.low %v4655_v5, %v4656_v55  ;;  %v4971_v44 = vshrl.u32 %v10678_v11, 16  ;;  %vm11712_vm13 = vmmov %vm11700_vm9 }
 0x2f6   : > { %v4377_v34 = vshrl.u32 %v7106_v47, 16  ;;  %v7107_v57 = vpack.c.bf16 %v4010_v1, %v4010_v1  ;;  %v4008_v23 = vsel %vm3944_vm7, %v3912_v7, %v3976_v62  ;;  %v4380_v38 = vshll.u32 %v7106_v47, 16  ;;  %v4460_v47 = vld [vmem:[#allocation2 + $0x88] sm:$0x1] }
 0x2f7   : > { %v4359_v42 = vshrl.u32 %v7104_v45, 16  ;;  %v5628_v39 = vpop.permute.xlu1 %5627  ;;  %v7105_v12 = vpack.c.bf16 %v4008_v23, %v4008_v23  ;;  %v4362_v6 = vshll.u32 %v7104_v45, 16  ;;  %v4975_v5 = vshll.u32 %v10718_v8, 16 }
 0x2f8   : > { %v10753_v49 = vpop.permute.xlu0 %5464  ;;  %v4379_v13 = vrot.slane %v4377_v34, 7  ;;  %v4386_v53 = vshrl.u32 %v7107_v57, 16  ;;  %v6019_v46 = vsel %vm6011_vm1, %v5986_v25, %v5628_v39  ;;  %5791 = vrot.lane.b32.xlu0 %v5760_v21, %s7371_s15  ;;  %5590 = vrot.lane.b32.xlu1 %v6993_v35, %s7368_s24  ;;  %v4389_v41 = vshll.u32 %v7107_v57, 16 }
 0x2f9   : > { %v4361_v22 = vrot.slane %v4359_v42, 7  ;;  %v4368_v7 = vshrl.u32 %v7105_v12, 16  ;;  %v4973_v18 = vor.u32 %v4971_v44, %v10704_v52  ;;  %v6052_v1 = vsel %vm6044_vm15, %v6019_v46, %v10713_v61 }
 0x2fa   : > { %v4388_v55 = vrot.slane %v4386_v53, 7  ;;  %v4384_v11 = vrot.slane %v4379_v13, 4  ;;  %v10769_v34 = vcombine.low %v4555_v33, %v4556_v17  ;;  %v4371_v57 = vshll.u32 %v7105_v12, 16  ;;  %7233 = vmatmul.mubr.msk.bf16.gmra.mrb[4].mxu1 %vm6113_vm4, %v6052_v1 }
 0x2fb   : > { %v4364_v4 = vor.u32 %v4362_v6, %v4361_v22  ;;  %v5006_v45 = vpop.permute.xlu1 %5005  ;;  %v4370_v42 = vrot.slane %v4368_v7, 7  ;;  %v4382_v52 = vor.u32 %v4380_v38, %v4379_v13  ;;  %v4366_v61 = vrot.slane %v4361_v22, 4  ;;  %v11702_v22 = vld [vmem:[#allocation40_spill] sm:$0xff]  ;;  %v11704_v7 = vld [vmem:[#allocation38_spill] sm:$0xff] }
 0x2fc   : > { %v5317_v62 = vpop.permute.xlu0 %5316  ;;  %v4391_v25 = vor.u32 %v4389_v41, %v4388_v55  ;;  %v4393_v35 = vrot.slane %v4388_v55, 4  ;;  %v10776_v39 = vrot.slane %v4975_v5, 1  ;;  %v5815_v59 = vsel %vm3388_vm6, %v10080_v60, %v10711_v10  ;;  %v11703_v5 = vld [vmem:[#allocation37_spill] sm:$0xff] }
 0x2fd   : > { %v4365_v23 = vsel %vm7493_vm10, %v4357_v3, %v4364_v4  ;;  %v4373_v44 = vor.u32 %v4371_v57, %v4370_v42  ;;  %v4375_v53 = vrot.slane %v4370_v42, 4  ;;  %v5135_v13 = vrot.slane %v10769_v34, 1 }
 0x2fe   : > { %4456 = vst.msk [vmem:[#allocation2 + $0x78] sm:$0xf] %vm334_vm3, %v4365_v23  ;;  %v4392_v33 = vsel %vm7493_vm10, %v4384_v11, %v4391_v25  ;;  %v4461_v21 = vsel %vm7431_vm2, %v4393_v35, %v4460_v47  ;;  %v4978_v3 = vsel %vm2205_vm12, %v4973_v18, %v10776_v39  ;;  %v4558_v6 = vmul.bf16 %v10662_v58, %v11702_v22  ;;  %v11705_v11 = vld [vmem:[#allocation24_spill] sm:$0xff] }
 0x2ff   : > { %4459 = vst.msk [vmem:[#allocation2 + $0x84] sm:$0xf] %vm334_vm3, %v4392_v33  ;;  %4462 = vst [vmem:[#allocation2 + $0x88] sm:$0x1] %v4461_v21  ;;  %v10790_v38 = vpop.permute.xlu1 %5578  ;;  %v4374_v46 = vsel %vm7493_vm10, %v4366_v61, %v4373_v44  ;;  %v4383_v60 = vsel %vm7493_vm10, %v4375_v53, %v4382_v52  ;;  %v5858_v10 = vsel %vm3454_vm8, %v5815_v59, %v10739_v28  ;;  %5643 = vrot.lane.b32.xlu1 %v4978_v3, %s7370_s13  ;;  %vm11706_vm2 = vcmask 326656   ;;  %v11708_v21 = vld [vmem:[#allocation45_spill] sm:$0xff] }
 0x300   : > { %v10792_v12 = vpop.permute.xlu0 %5267  ;;  %v4589_v55 = vmul.bf16 %v10667_v54, %v11703_v5  ;;  %4457 = vst.msk [vmem:[#allocation2 + $0x7c] sm:$0xf] %vm334_vm3, %v4374_v46  ;;  %4458 = vst.msk [vmem:[#allocation2 + $0x80] sm:$0xf] %vm334_vm3, %v4383_v60  ;;  %v5136_v41 = vsel %vm2453_vm0, %v5133_v0, %v5135_v13  ;;  %v4557_v29 = vmul.bf16 %v10672_v63, %v11704_v7  ;;  %v11709_v53 = vld [vmem:[#allocation39_spill] sm:$0xff] }
 0x301   : > { %v4624_v18 = vmul.bf16 %v10672_v63, %v11696_v37  ;;  %v4625_v28 = vmul.bf16 %v10662_v58, %v11697_v24  ;;  %5167 = vrot.lane.b32.xlu0 %v5136_v41, %s7361_s25  ;;  %v4588_v4 = vmul.bf16 %v10645_v9, %v11705_v11  ;;  %v4519_v47 = vmul.bf16 %v10472_v2, %v11705_v11  ;;  %vm11707_vm10 = vmmov %vm11700_vm9 }
 0x302   : > { %v5890_v16 = vsel %vm3520_vm11, %v5858_v10, %v10598_v40  ;;  %v10827_v34 = vcombine.low %v4557_v29, %v4558_v6  ;;  %v4520_v25 = vmul.bf16 %v10465_v27, %v11703_v5  ;;  %v5818_v17 = vsel %vm3388_vm6, %v10082_v26, %v5006_v45  ;;  %vm11710_vm5 = vmmov %vm11706_vm2 }
 0x303   : > { %v10823_v0 = vpop.permute.xlu1 %5269  ;;  %v5922_v35 = vsel %vm3586_vm14, %v5890_v16, %v5317_v62  ;;  %5019 = vrot.lane.b32.xlu1 %v10725_v19, %s7363_s12  ;;  %v6959_v42 = vcombine.low %v4588_v4, %v4589_v55  ;;  %v10834_v57 = vcombine.low %v4624_v18, %v4625_v28  ;;  %v4590_v44 = vmul.bf16 %v10672_v63, %v11708_v21  ;;  %vm11719_vm7 = vmmov %vm11706_vm2 }
 0x304   : > { %v10825_v1 = vpop.permute.xlu0 %5580  ;;  %v10836_v2 = vcombine.low %v4519_v47, %v4520_v25  ;;  %v5955_v40 = vsel %vm11706_vm2, %v5922_v35, %v10753_v49  ;;  %v5137_v61 = vrot.slane %v10827_v34, 1  ;;  %v4591_v59 = vmul.bf16 %v10662_v58, %v11709_v53 }
 0x305   : > { %5279 = vrot.lane.b32.xlu0 %v6959_v42, %s7365_s14  ;;  %v10843_v27 = vld [vmem:[#allocation2 + $0x78] sm:$0xf]  ;;  %v5448_v19 = vrot.slane %v10834_v57, 1  ;;  %v5988_v49 = vsel %vm11707_vm10, %v5955_v40, %v10626_v43  ;;  %v4658_v55 = vmul.bf16 %v10662_v58, %v11703_v5  ;;  %v4979_v41 = vshrl.u32 %v10718_v8, 16  ;;  %vm11721_vm10 = vmmov %vm11700_vm9 }
 0x306   : > { %v5138_v46 = vsel %vm2453_vm0, %v5135_v13, %v5137_v61  ;;  %v4626_v28 = vmul.bf16 %v10843_v27, %v11704_v7  ;;  %v6960_v8 = vcombine.low %v4590_v44, %v4591_v59  ;;  %v5860_v56 = vsel %vm3454_vm8, %v5818_v17, %v10737_v31  ;;  %v11711_v44 = vld [vmem:[#allocation30_spill] sm:$0xff] }
 0x307   : > { %v5319_v52 = vpop.permute.xlu1 %5318  ;;  %5021 = vrot.lane.b32.xlu1 %v4978_v3, %s7363_s12  ;;  %v10845_v62 = vld [vmem:[#allocation2 + $0x7c] sm:$0xf]  ;;  %v5449_v13 = vsel %vm2453_vm0, %v5446_v32, %v5448_v19  ;;  %v10883_v4 = vld [vmem:[#allocation2 + $0x80] sm:$0xf]  ;;  %v4981_v47 = vor.u32 %v4979_v41, %v10776_v39  ;;  %v5892_v39 = vsel %vm3520_vm11, %v5860_v56, %v10624_v14 }
 0x308   : > { %v5630_v23 = vpop.permute.xlu0 %5629  ;;  %v10850_v33 = vcombine.low %v10843_v27, %v10845_v62  ;;  %v4627_v45 = vmul.bf16 %v10845_v62, %v11702_v22  ;;  %v4694_v18 = vmul.bf16 %v10845_v62, %v11697_v24  ;;  %v4693_v24 = vmul.bf16 %v10843_v27, %v11696_v37 }
 0x309   : > { %5332 = vrot.lane.b32.xlu0 %v4978_v3, %s7367_s16  ;;  %v6021_v6 = vsel %vm6011_vm1, %v5988_v49, %v5630_v23  ;;  %v4657_v3 = vmul.bf16 %v10672_v63, %v11705_v11  ;;  %v10885_v11 = vld [vmem:[#allocation2 + $0x84] sm:$0xf]  ;;  %v4695_v35 = vmul.bf16 %v10883_v4, %v11704_v7  ;;  %v5924_v37 = vsel %vm3586_vm14, %v5892_v39, %v5319_v52 }
 0x30a   : > { %v4983_v26 = vshll.u32 %v10850_v33, 16  ;;  %v10893_v16 = vcombine.low %v4626_v28, %v4627_v45  ;;  %v4696_v42 = vmul.bf16 %v10885_v11, %v11702_v22  ;;  %v7013_v57 = vcombine.low %v4693_v24, %v4694_v18  ;;  %v11713_v45 = vld [vmem:[#allocation31_spill] sm:$0xff]  ;;  %v4527_v28 = vld [vmem:[#allocation2 + $0x80] sm:$0x1] }
 0x30b   : > { %v5467_v60 = vpop.permute.xlu1 %5466  ;;  %5169 = vrot.lane.b32.xlu1 %v5138_v46, %s7361_s25  ;;  %v6994_v25 = vcombine.low %v4657_v3, %v4658_v55  ;;  %v10917_v14 = vcombine.low %v10883_v4, %v10885_v11  ;;  %v4560_v52 = vmul.bf16 %v10845_v62, %v11711_v44  ;;  %v4660_v59 = vmul.bf16 %v10845_v62, %v11709_v53 }
 0x30c   : > { %v5778_v10 = vpop.permute.xlu0 %5777  ;;  %v4985_v29 = vrot.slane %v4983_v26, 1  ;;  %v5450_v17 = vrot.slane %v10893_v16, 1  ;;  %v5957_v7 = vsel %vm11710_vm5, %v5924_v37, %v5467_v60  ;;  %v10913_v22 = vcombine.low %v4695_v35, %v4696_v42  ;;  %v11716_v37 = vld [vmem:[#allocation32_spill] sm:$0xff]  ;;  %vm11722_vm5 = vmmov %vm11706_vm2 }
 0x30d   : > { %v6054_v43 = vsel %vm6044_vm15, %v6021_v6, %v5778_v10  ;;  %5480 = vrot.lane.b32.xlu0 %v5449_v13, %s7369_s26  ;;  %v5761_v49 = vrot.slane %v7013_v57, 1  ;;  %v4522_v6 = vmul.bf16 %v10667_v54, %v11709_v53  ;;  %v5990_v60 = vsel %vm11712_vm13, %v5957_v7, %v10790_v38  ;;  %vm11725_vm13 = vmmov %vm11700_vm9 }
 0x30e   : > { %7236 = vmatprep.mubr.msk.bf16.mxu1 %vm6113_vm4, %v6054_v43  ;;  %v10901_v31 = vsel %vm2205_vm12, %v4981_v47, %v4985_v29  ;;  %v5451_v46 = vsel %vm2453_vm0, %v5448_v19, %v5450_v17  ;;  %v4559_v43 = vmul.bf16 %v10843_v27, %v11713_v45  ;;  %v4521_v3 = vmul.bf16 %v10645_v9, %v11708_v21  ;;  %v11715_v47 = vld [vmem:[#allocation47_spill] sm:$0xff] }
 0x30f   : > { %v5008_v32 = vpop.permute.xlu1 %5007  ;;  %5281 = vrot.lane.b32.xlu1 %v6960_v8, %s7365_s14  ;;  %v5763_v54 = vrot.slane %v10913_v22, 1  ;;  %v4659_v19 = vmul.bf16 %v10843_v27, %v11708_v21  ;;  %v4987_v53 = vshrl.u32 %v10850_v33, 16  ;;  %v5762_v38 = vsel %vm2453_vm0, %v5759_v50, %v5761_v49 }
 0x310   : > { %v5780_v5 = vpop.permute.xlu0 %5779  ;;  %v5296_v13 = vshll.u32 %v10917_v14, 16  ;;  %v10947_v9 = vcombine.low %v4559_v43, %v4560_v52  ;;  %v10951_v8 = vcombine.low %v4521_v3, %v4522_v6  ;;  %v4523_v50 = vmul.bf16 %v10672_v63, %v11714_v36 }
 0x311   : > { %5592 = vrot.lane.b32.xlu0 %v6994_v25, %s7368_s24  ;;  %v6995_v18 = vcombine.low %v4659_v19, %v4660_v59  ;;  %v4989_v56 = vor.u32 %v4987_v53, %v4985_v29  ;;  %v5764_v24 = vsel %vm2453_vm0, %v5761_v49, %v5763_v54  ;;  %v6929_v42 = vcombine.low %v4527_v28, %v4527_v28  ;;  %v11717_v49 = vld [vmem:[#allocation54_spill] sm:$0xff]  ;;  %v11718_v59 = vld [vmem:[#allocation51_spill] sm:$0xff] }
 0x312   : > { %v10961_v25 = vrot.slane %v5296_v13, 1  ;;  %v5139_v35 = vrot.slane %v10947_v9, 1  ;;  %v5821_v29 = vsel %vm3388_vm6, %v10251_v51, %v5008_v32  ;;  %v4561_v7 = vmul.bf16 %v4527_v28, %v11716_v37 }
 0x313   : > { %v10907_v40 = vpop.permute.xlu1 %5157  ;;  %5334 = vrot.lane.b32.xlu1 %v10901_v31, %s7367_s16  ;;  %v4525_v52 = vmul.bf16 %v10843_v27, %v11717_v49  ;;  %v4526_v6 = vmul.bf16 %v10845_v62, %v11718_v59  ;;  %v4593_v32 = vmul.bf16 %v10845_v62, %v11715_v47  ;;  %v4628_v43 = vmul.bf16 %v10883_v4, %v11713_v45 }
 0x314   : > { %v5156_v23 = vpop.permute.xlu0 %5155  ;;  %v6946_v34 = vcombine.low %v4561_v7, %v4561_v7 }
 0x315   : > { %5645 = vrot.lane.b32.xlu0 %v10901_v31, %s7370_s13  ;;  %v5862_v51 = vsel %vm3454_vm8, %v5821_v29, %v5156_v23  ;;  %v10991_v3 = vcombine.low %v4525_v52, %v4526_v6  ;;  %v4592_v23 = vmul.bf16 %v10843_v27, %v11714_v36  ;;  %v4596_v27 = vld [vmem:[#allocation2 + $0x88] sm:$0x1] }
 0x316   : > { %v5894_v62 = vsel %vm3520_vm11, %v5862_v51, %v10792_v12  ;;  %v5141_v28 = vrot.slane %v6946_v34, 1  ;;  %v11720_v51 = vld [vmem:[#allocation53_spill] sm:$0xff] }
 0x317   : > { %v5632_v10 = vpop.permute.xlu1 %5631  ;;  %5482 = vrot.lane.b32.xlu1 %v5451_v46, %s7369_s26  ;;  %v4629_v46 = vmul.bf16 %v10885_v11, %v11711_v44  ;;  %v6961_v53 = vcombine.low %v4592_v23, %v4593_v32 }
 0x318   : > { %v5469_v26 = vpop.permute.xlu0 %5468  ;;  %v6023_v55 = vsel %vm6011_vm1, %v5990_v60, %v5632_v10  ;;  %v5140_v60 = vsel %vm2453_vm0, %v5137_v61, %v5139_v35  ;;  %v4991_v10 = vshll.u32 %v6929_v42, 16  ;;  %v5142_v29 = vsel %vm2453_vm0, %v5139_v35, %v5141_v28 }
 0x319   : > { %v6056_v41 = vsel %vm6044_vm15, %v6023_v55, %v5780_v5  ;;  %5793 = vrot.lane.b32.xlu0 %v5762_v38, %s7371_s15  ;;  %v4524_v5 = vmul.bf16 %v10662_v58, %v11715_v47  ;;  %v5299_v58 = vsel %vm2205_vm12, %v4989_v56, %v10961_v25 }
 0x31a   : > { %7237 = vmatmul.mubr.msk.bf16.gmra.mrb[8].mxu1 %vm6113_vm4, %v6056_v41  ;;  %v4993_v38 = vrot.slane %v4991_v10, 1  ;;  %v11005_v41 = vcombine.low %v4628_v43, %v4629_v46  ;;  %v4661_v46 = vmul.bf16 %v10883_v4, %v11714_v36  ;;  %v5300_v10 = vshrl.u32 %v10917_v14, 16 }
 0x31b   : > { %v5010_v21 = vpop.permute.xlu1 %5009  ;;  %5594 = vrot.lane.b32.xlu1 %v6995_v18, %s7368_s24  ;;  %v10967_v63 = vcombine.low %v4523_v50, %v4524_v5  ;;  %v6964_v50 = vcombine.low %v4596_v27, %v4596_v27 }
 0x31c   : > { %v5321_v33 = vpop.permute.xlu0 %5320  ;;  %v4994_v12 = vsel %vm2205_vm12, %v4989_v56, %v4993_v38  ;;  %v4595_v56 = vmul.bf16 %v10885_v11, %v11718_v59 }
 0x31d   : > { %5795 = vrot.lane.b32.xlu0 %v5764_v24, %s7371_s15  ;;  %v5926_v61 = vsel %vm3586_vm14, %v5894_v62, %v5321_v33  ;;  %v11011_v33 = vld [vmem:[#allocation2 + $0x88] sm:$0xf]  ;;  %v4632_v24 = vld [vmem:[#allocation2 + $0x8c] sm:$0xf]  ;;  %v5304_v43 = vshll.u32 %v6964_v50, 16 }
 0x31e   : > { %v5959_v13 = vsel %vm11719_vm7, %v5926_v61, %v5469_v26  ;;  %v4594_v26 = vmul.bf16 %v10883_v4, %v11717_v49  ;;  %v6998_v6 = vcombine.low %v11011_v33, %v4632_v24  ;;  %v4698_v4 = vmul.bf16 %v4632_v24, %v11711_v44 }
 0x31f   : > { %v10971_v57 = vpop.permute.xlu1 %5582  ;;  %5647 = vrot.lane.b32.xlu1 %v5299_v58, %s7370_s13  ;;  %v5992_v5 = vsel %vm11700_vm9, %v5959_v13, %v10825_v1  ;;  %v5824_v1 = vsel %vm3388_vm6, %v11720_v51, %v5010_v21  ;;  %v4697_v21 = vmul.bf16 %v11011_v33, %v11713_v45  ;;  %v5306_v34 = vrot.slane %v5304_v43, 1  ;;  %v4665_v45 = vld [vmem:[#allocation2 + $0x90] sm:$0x1] }
 0x320   : > { %v10973_v39 = vpop.permute.xlu0 %5271  ;;  %v6962_v23 = vcombine.low %v4594_v26, %v4595_v56  ;;  %v6999_v44 = vcombine.low %v4665_v45, %v4665_v45 }
 0x321   : > { %5171 = vrot.lane.b32.xlu0 %v5140_v60, %s7361_s25  ;;  %v4662_v60 = vmul.bf16 %v10885_v11, %v11715_v47  ;;  %v5864_v11 = vsel %vm3454_vm8, %v5824_v1, %v10907_v40  ;;  %v5609_v47 = vshll.u32 %v6998_v6, 16  ;;  %v7015_v61 = vcombine.low %v4697_v21, %v4698_v4 }
 0x322   : > { %v5617_v26 = vshll.u32 %v6999_v44, 16 }
 0x323   : > { %v10998_v55 = vpop.permute.xlu1 %5273  ;;  %5023 = vrot.lane.b32.xlu1 %v10901_v31, %s7363_s12  ;;  %v5452_v31 = vrot.slane %v11005_v41, 1  ;;  %v6996_v14 = vcombine.low %v4661_v46, %v4662_v60  ;;  %v5611_v41 = vrot.slane %v5609_v47, 1  ;;  %v5765_v28 = vrot.slane %v7015_v61, 1 }
 0x324   : > { %v11000_v19 = vpop.permute.xlu0 %5584  ;;  %v5619_v51 = vrot.slane %v5617_v26, 1 }
 0x325   : > { %5283 = vrot.lane.b32.xlu0 %v6961_v53, %s7365_s14  ;;  %v5453_v35 = vsel %vm2453_vm0, %v5450_v17, %v5452_v31  ;;  %v5302_v17 = vor.u32 %v5300_v10, %v10961_v25  ;;  %v5896_v53 = vsel %vm3520_vm11, %v5864_v11, %v10823_v0  ;;  %v4663_v0 = vmul.bf16 %v11011_v33, %v11717_v49 }
 0x326   : > { %v5613_v33 = vshrl.u32 %v6998_v6, 16 }
 0x327   : > { %v5323_v9 = vpop.permute.xlu1 %5322  ;;  %5025 = vrot.lane.b32.xlu1 %v4994_v12, %s7363_s12  ;;  %v5307_v38 = vsel %vm2205_vm12, %v5302_v17, %v5306_v34 }
 0x328   : > { %v5634_v18 = vpop.permute.xlu0 %5633  ;;  %v5928_v40 = vsel %vm3586_vm14, %v5896_v53, %v5323_v9 }
 0x329   : > { %5336 = vrot.lane.b32.xlu0 %v5299_v58, %s7367_s16  ;;  %v6025_v42 = vsel %vm6011_vm1, %v5992_v5, %v5634_v18  ;;  %v4630_v58 = vmul.bf16 %v4596_v27, %v11716_v37  ;;  %v5612_v18 = vsel %vm2205_vm12, %v5302_v17, %v5611_v41 }
 0x32b   : > { %v5471_v7 = vpop.permute.xlu1 %5470  ;;  %5173 = vrot.lane.b32.xlu1 %v5142_v29, %s7361_s25  ;;  %v6981_v62 = vcombine.low %v4630_v58, %v4630_v58  ;;  %v5766_v29 = vsel %vm2453_vm0, %v5763_v54, %v5765_v28  ;;  %v5615_v58 = vor.u32 %v5613_v33, %v5611_v41 }
 0x32c   : > { %v5782_v52 = vpop.permute.xlu0 %5781  ;;  %v5961_v12 = vsel %vm11706_vm2, %v5928_v40, %v5471_v7 }
 0x32d   : > { %v6058_v32 = vsel %vm6044_vm15, %v6025_v42, %v5782_v52  ;;  %5484 = vrot.lane.b32.xlu0 %v5453_v35, %s7369_s26  ;;  %v5454_v13 = vrot.slane %v6981_v62, 1  ;;  %v5994_v50 = vsel %vm11721_vm10, %v5961_v12, %v10971_v57  ;;  %v4664_v42 = vmul.bf16 %v4632_v24, %v11718_v59  ;;  %vm11728_vm10 = vmmov %vm11700_vm9 }
 0x32e   : > { %7240 = vmatprep.mubr.msk.bf16.mxu1 %vm6113_vm4, %v6058_v32  ;;  %v5620_v6 = vsel %vm2205_vm12, %v5615_v58, %v5619_v51  ;;  %vm11723_vm12 = vmmov %vm11700_vm9 }
 0x32f   : > { %v5012_v36 = vpop.permute.xlu1 %5011  ;;  %5285 = vrot.lane.b32.xlu1 %v6962_v23, %s7365_s14  ;;  %v5455_v9 = vsel %vm2453_vm0, %v5452_v31, %v5454_v13  ;;  %v4699_v31 = vmul.bf16 %v4665_v45, %v11716_v37  ;;  %v6997_v57 = vcombine.low %v4663_v0, %v4664_v42 }
 0x330   : > { %v5784_v16 = vpop.permute.xlu0 %5783  ;;  %v5827_v22 = vsel %vm3388_vm6, %v10444_v15, %v5012_v36 }
 0x331   : > { %5596 = vrot.lane.b32.xlu0 %v6996_v14, %s7368_s24  ;;  %v7016_v59 = vcombine.low %v4699_v31, %v4699_v31 }
 0x333   : > { %v5162_v25 = vpop.permute.xlu1 %5161  ;;  %5338 = vrot.lane.b32.xlu1 %v5307_v38, %s7367_s16  ;;  %v5767_v46 = vrot.slane %v7016_v59, 1 }
 0x334   : > { %v5160_v27 = vpop.permute.xlu0 %5159 }
 0x335   : > { %5649 = vrot.lane.b32.xlu0 %v5612_v18, %s7370_s13  ;;  %v5866_v24 = vsel %vm3454_vm8, %v5827_v22, %v5160_v27  ;;  %v5768_v35 = vsel %vm2453_vm0, %v5765_v28, %v5767_v46  ;;  %vm11724_vm0 = vmmov %vm11706_vm2 }
 0x336   : > { %v5898_v1 = vsel %vm3520_vm11, %v5866_v24, %v10973_v39  ;;  %vm11726_vm7 = vmmov %vm11724_vm0 }
 0x337   : > { %v5636_v5 = vpop.permute.xlu1 %5635  ;;  %5486 = vrot.lane.b32.xlu1 %v5455_v9, %s7369_s26  ;;  %vm11727_vm2 = vmmov %vm11724_vm0 }
 0x338   : > { %v6027_v56 = vsel %vm6011_vm1, %v5994_v50, %v5636_v5 }
 0x339   : > { %v5473_v7 = vpop.permute.xlu0 %5472  ;;  %v6060_v49 = vsel %vm6044_vm15, %v6027_v56, %v5784_v16  ;;  %5797 = vrot.lane.b32.xlu0 %v5766_v29, %s7371_s15 }
 0x33a   : > { %7241 = vmatmul.mubr.msk.bf16.gmra.mrb[12].mxu1 %vm6113_vm4, %v6060_v49 }
 0x33b   : > { %v5014_v52 = vpop.permute.xlu1 %5013  ;;  %5598 = vrot.lane.b32.xlu1 %v6997_v57, %s7368_s24 }
 0x33c   : > { %v5830_v16 = vsel %vm3388_vm6, %v10447_v48, %v5014_v52 }
 0x33d   : > { %v5325_v54 = vpop.permute.xlu0 %5324  ;;  %v5868_v47 = vsel %vm3454_vm8, %v5830_v16, %v5162_v25 }
 0x33e   : > { %v5930_v60 = vsel %vm3586_vm14, %v5898_v1, %v5325_v54  ;;  %v5900_v34 = vsel %vm3520_vm11, %v5868_v47, %v10998_v55 }
 0x33f   : > { %v5587_v37 = vpop.permute.xlu1 %5586  ;;  %5651 = vrot.lane.b32.xlu1 %v5620_v6, %s7370_s13  ;;  %v5963_v15 = vsel %vm11722_vm5, %v5930_v60, %v5473_v7  ;;  %vm11729_vm5 = vmmov %vm11724_vm0  ;;  %s11178_s13 = scalar_lea.vmem %s11315_s9, %s7074_s19 }
 0x340   : > { %v5996_v23 = vsel %vm11723_vm12, %v5963_v15, %v11000_v19  ;;  %vm11730_vm12 = vmmov %vm11700_vm9 }
 0x341   : > { %v5276_v32 = vpop.permute.xlu0 %5275 }
 0x343   : > { %v5278_v10 = vpop.permute.xlu1 %5277  ;;  %5799 = vrot.lane.b32.xlu1 %v5768_v35, %s7371_s15 }
 0x345   : > { %v5638_v43 = vpop.permute.xlu0 %5637 }
 0x346   : > { %v6029_v4 = vsel %vm6011_vm1, %v5996_v23, %v5638_v43 }
 0x347   : > { %v5327_v21 = vpop.permute.xlu1 %5326 }
 0x348   : > { %v5932_v19 = vsel %vm3586_vm14, %v5900_v34, %v5327_v21 }
 0x349   : > { %v5786_v11 = vpop.permute.xlu0 %5785 }
 0x34a   : > { %v6062_v39 = vsel %vm6044_vm15, %v6029_v4, %v5786_v11 }
 0x34b   : > { %7244 = vmatprep.mubr.msk.bf16.mxu1 %vm6113_vm4, %v6062_v39  ;;  %v5475_v36 = vpop.permute.xlu1 %5474 }
 0x34c   : > { %v5965_v45 = vsel %vm11724_vm0, %v5932_v19, %v5475_v36 }
 0x34d   : > { %v5788_v17 = vpop.permute.xlu0 %5787  ;;  %v5998_v44 = vsel %vm11725_vm13, %v5965_v45, %v5587_v37  ;;  %vm11731_vm13 = vmmov %vm11700_vm9 }
 0x34f   : > { %v5016_v62 = vpop.permute.xlu1 %5015 }
 0x350   : > { %v5833_v25 = vsel %vm3388_vm6, %v10647_v20, %v5016_v62 }
 0x351   : > { %v5164_v14 = vpop.permute.xlu0 %5163 }
 0x352   : > { %v5870_v55 = vsel %vm3454_vm8, %v5833_v25, %v5164_v14 }
 0x353   : > { %v5166_v61 = vpop.permute.xlu1 %5165  ;;  %v5902_v12 = vsel %vm3520_vm11, %v5870_v55, %v5276_v32 }
 0x356   : > { %v5329_v53 = vpop.permute.xlu0 %5328 }
 0x357   : > { %v5640_v40 = vpop.permute.xlu1 %5639  ;;  %v5934_v0 = vsel %vm3586_vm14, %v5902_v12, %v5329_v53 }
 0x358   : > { %v6031_v38 = vsel %vm6011_vm1, %v5998_v44, %v5640_v40 }
 0x359   : > { %v6064_v48 = vsel %vm6044_vm15, %v6031_v38, %v5788_v17 }
 0x35a   : > { %v5477_v41 = vpop.permute.xlu0 %5476  ;;  %7245 = vmatmul.mubr.msk.bf16.gmra.mrb[16].mxu1 %vm6113_vm4, %v6064_v48 }
 0x35b   : > { %v5018_v27 = vpop.permute.xlu1 %5017  ;;  %v5967_v9 = vsel %vm11726_vm7, %v5934_v0, %v5477_v41  ;;  %vm11732_vm7 = vmmov %vm11724_vm0 }
 0x35c   : > { %v5836_v42 = vsel %vm3388_vm6, %v10664_v30, %v5018_v27 }
 0x35d   : > { %v5872_v29 = vsel %vm3454_vm8, %v5836_v42, %v5166_v61 }
 0x35e   : > { %v5589_v13 = vpop.permute.xlu0 %5588  ;;  %v5904_v33 = vsel %vm3520_vm11, %v5872_v29, %v5278_v10 }
 0x35f   : > { %v6000_v50 = vsel %vm11700_vm9, %v5967_v9, %v5589_v13 }
 0x362   : > { %v5642_v18 = vpop.permute.xlu0 %5641  ;;  %v5331_v28 = vpop.permute.xlu1 %5330 }
 0x363   : > { %v6033_v5 = vsel %vm6011_vm1, %v6000_v50, %v5642_v18  ;;  %v5936_v31 = vsel %vm3586_vm14, %v5904_v33, %v5331_v28  ;;  %v11156_v33 = vld [vmem:[%s11314_s8] ss:$0 sm:$0xff] }
 0x366   : > { %v5790_v26 = vpop.permute.xlu0 %5789  ;;  %v5479_v56 = vpop.permute.xlu1 %5478 }
 0x367   : > { %v6066_v20 = vsel %vm6044_vm15, %v6033_v5, %v5790_v26  ;;  %v5969_v57 = vsel %vm11727_vm2, %v5936_v31, %v5479_v56 }
 0x368   : > { %7248 = vmatprep.mubr.msk.bf16.mxu1 %vm6113_vm4, %v6066_v20 }
 0x36a   : > { %v5591_v7 = vpop.permute.xlu1 %5590  ;;  %v5792_v49 = vpop.permute.xlu0 %5791 }
 0x36b   : > { %v6002_v52 = vsel %vm11728_vm10, %v5969_v57, %v5591_v7 }
 0x371   : > { %v5644_v58 = vpop.permute.xlu1 %5643 }
 0x372   : > { %v6035_v51 = vsel %vm6011_vm1, %v6002_v52, %v5644_v58 }
 0x373   : > { %v5168_v22 = vpop.permute.xlu0 %5167  ;;  %v6068_v30 = vsel %vm6044_vm15, %v6035_v51, %v5792_v49 }
 0x374   : > { %7249 = vmatmul.mubr.msk.bf16.gmra.mrb[20].mxu1 %vm6113_vm4, %v6068_v30 }
 0x375   : > { %v5020_v54 = vpop.permute.xlu1 %5019 }
 0x376   : > { %v5839_v1 = vsel %vm3388_vm6, %v10836_v2, %v5020_v54 }
 0x377   : > { %v5280_v59 = vpop.permute.xlu0 %5279  ;;  %v5874_v60 = vsel %vm3454_vm8, %v5839_v1, %v5168_v22 }
 0x378   : > { %v5906_v10 = vsel %vm3520_vm11, %v5874_v60, %v5280_v59 }
 0x379   : > { %v5022_v24 = vpop.permute.xlu1 %5021 }
 0x37a   : > { %v5842_v2 = vsel %vm3388_vm6, %v10951_v8, %v5022_v24 }
 0x37b   : > { %v5333_v6 = vpop.permute.xlu0 %5332 }
 0x37c   : > { %v5938_v21 = vsel %vm3586_vm14, %v5906_v10, %v5333_v6 }
 0x37d   : > { %v5170_v37 = vpop.permute.xlu1 %5169 }
 0x37e   : > { %v5876_v17 = vsel %vm3454_vm8, %v5842_v2, %v5170_v37 }
 0x37f   : > { %v5481_v32 = vpop.permute.xlu0 %5480 }
 0x380   : > { %v5971_v23 = vsel %vm11729_vm5, %v5938_v21, %v5481_v32 }
 0x381   : > { %v5282_v46 = vpop.permute.xlu1 %5281 }
 0x382   : > { %v5908_v62 = vsel %vm3520_vm11, %v5876_v17, %v5282_v46 }
 0x383   : > { %v5593_v35 = vpop.permute.xlu0 %5592 }
 0x384   : > { %v6004_v11 = vsel %vm11730_vm12, %v5971_v23, %v5593_v35 }
 0x385   : > { %v5335_v15 = vpop.permute.xlu1 %5334 }
 0x386   : > { %v5940_v14 = vsel %vm3586_vm14, %v5908_v62, %v5335_v15 }
 0x387   : > { %v5646_v43 = vpop.permute.xlu0 %5645 }
 0x388   : > { %v6037_v39 = vsel %vm6011_vm1, %v6004_v11, %v5646_v43 }
 0x389   : > { %v5483_v4 = vpop.permute.xlu1 %5482 }
 0x38a   : > { %v5973_v19 = vsel %vm11724_vm0, %v5940_v14, %v5483_v4 }
 0x38b   : > { %v5794_v36 = vpop.permute.xlu0 %5793 }
 0x38c   : > { %v6070_v16 = vsel %vm6044_vm15, %v6037_v39, %v5794_v36 }
 0x38d   : > { %7252 = vmatprep.mubr.msk.bf16.mxu1 %vm6113_vm4, %v6070_v16  ;;  %v5595_v47 = vpop.permute.xlu1 %5594 }
 0x38e   : > { %v6006_v61 = vsel %vm11731_vm13, %v5973_v19, %v5595_v47 }
 0x38f   : > { %v5796_v34 = vpop.permute.xlu0 %5795 }
 0x391   : > { %v5648_v45 = vpop.permute.xlu1 %5647 }
 0x392   : > { %v6039_v53 = vsel %vm6011_vm1, %v6006_v61, %v5648_v45 }
 0x393   : > { %v5172_v8 = vpop.permute.xlu0 %5171  ;;  %v6072_v44 = vsel %vm6044_vm15, %v6039_v53, %v5796_v34 }
 0x394   : > { %7253 = vmatmul.mubr.msk.bf16.gmra.mrb[24].mxu1 %vm6113_vm4, %v6072_v44 }
 0x395   : > { %v5024_v40 = vpop.permute.xlu1 %5023 }
 0x396   : > { %v5845_v55 = vsel %vm3388_vm6, %v10967_v63, %v5024_v40  ;;  %v11149_v63 = vld [vmem:[%s11313_s7] ss:$0 sm:$0xff] }
 0x397   : > { %v5284_v38 = vpop.permute.xlu0 %5283  ;;  %v5878_v12 = vsel %vm3454_vm8, %v5845_v55, %v5172_v8 }
 0x398   : > { %v5910_v28 = vsel %vm3520_vm11, %v5878_v12, %v5284_v38 }
 0x399   : > { %v5026_v48 = vpop.permute.xlu1 %5025 }
 0x39a   : > { %v5848_v31 = vsel %vm3388_vm6, %v10991_v3, %v5026_v48  ;;  %vm11733_vm6 = vmmov %vm11724_vm0 }
 0x39b   : > { %v5337_v41 = vpop.permute.xlu0 %5336 }
 0x39c   : > { %v5942_v50 = vsel %vm3586_vm14, %v5910_v28, %v5337_v41 }
 0x39d   : > { %v5174_v25 = vpop.permute.xlu1 %5173 }
 0x39e   : > { %v5880_v58 = vsel %vm3454_vm8, %v5848_v31, %v5174_v25 }
 0x39f   : > { %v5485_v27 = vpop.permute.xlu0 %5484 }
 0x3a0   : > { %v5975_v5 = vsel %vm11732_vm7, %v5942_v50, %v5485_v27 }
 0x3a1   : > { %v5286_v13 = vpop.permute.xlu1 %5285 }
 0x3a2   : > { %v5912_v30 = vsel %vm3520_vm11, %v5880_v58, %v5286_v13  ;;  %vm11734_vm11 = vmmov %vm11700_vm9 }
 0x3a3   : > { %v5597_v18 = vpop.permute.xlu0 %5596 }
 0x3a4   : > { %v6008_v56 = vsel %vm11700_vm9, %v5975_v5, %v5597_v18 }
 0x3a5   : > { %v5339_v0 = vpop.permute.xlu1 %5338 }
 0x3a6   : > { %v5944_v6 = vsel %vm3586_vm14, %v5912_v30, %v5339_v0 }
 0x3a7   : > { %v5650_v9 = vpop.permute.xlu0 %5649 }
 0x3a8   : > { %v6041_v20 = vsel %vm6011_vm1, %v6008_v56, %v5650_v9 }
 0x3a9   : > { %v5487_v26 = vpop.permute.xlu1 %5486 }
 0x3aa   : > { %v5977_v32 = vsel %vm11733_vm6, %v5944_v6, %v5487_v26 }
 0x3ab   : > { %v5798_v42 = vpop.permute.xlu0 %5797 }
 0x3ac   : > { %v6074_v29 = vsel %vm6044_vm15, %v6041_v20, %v5798_v42 }
 0x3ad   : > { %7256 = vmatprep.mubr.msk.bf16.mxu1 %vm6113_vm4, %v6074_v29  ;;  %v5599_v7 = vpop.permute.xlu1 %5598  ;;  %v7230_v49 = vpop.f32.mrb[0].mxu1 }
 0x3ae   : > { %v6320_v57 = vmul.f32 %v7230_v49, %v11149_v63  ;;  %v6184_v52 = vpop.f32.mrb[1].mxu1  ;;  %v6010_v35 = vsel %vm11734_vm11, %v5977_v32, %v5599_v7 }
 0x3af   : > { %v6318_v51 = vmul.f32 %v11149_v63, %v6184_v52  ;;  %v7231_v22 = vpop.f32.mrb[2].mxu1 }
 0x3b0   : > { %v6359_v54 = vadd.f32 %v11156_v33, %v6320_v57  ;;  %v6321_v59 = vmul.f32 %v7231_v22, %v11149_v63  ;;  %v6187_v24 = vpop.f32.mrb[3].mxu1 }
 0x3b1   : > { %v6357_v3 = vadd.f32 %v11156_v33, %v6318_v51  ;;  %v5652_v37 = vpop.permute.xlu1 %5651  ;;  %v6319_v1 = vmul.f32 %v11149_v63, %v6187_v24 }
 0x3b2   : > { %vm6391_vm8 = vcmp.ge.f32.partialorder %v6359_v54, 0.0  ;;  %v6423_v46 = vmul.f32 0.01, %v6359_v54  ;;  %v6360_v60 = vadd.f32 %v11156_v33, %v6321_v59  ;;  %v6043_v21 = vsel %vm6011_vm1, %v6010_v35, %v5652_v37 }
 0x3b3   : > { %vm6389_vm2 = vcmp.ge.f32.partialorder %v6357_v3, 0.0  ;;  %v6421_v10 = vmul.f32 0.01, %v6357_v3  ;;  %v6358_v15 = vadd.f32 %v11156_v33, %v6319_v1 }
 0x3b4   : > { %v6455_v43 = vsel %vm6391_vm8, %v6359_v54, %v6423_v46  ;;  %vm6392_vm14 = vcmp.ge.f32.partialorder %v6360_v60, 0.0  ;;  %v6424_v23 = vmul.f32 0.01, %v6360_v60 }
 0x3b5   : > { %v7110_v4 = vpack.c.bf16 %v6455_v43, %v6455_v43  ;;  %v6453_v11 = vsel %vm6389_vm2, %v6357_v3, %v6421_v10  ;;  %vm6390_vm10 = vcmp.ge.f32.partialorder %v6358_v15, 0.0  ;;  %v6422_v39 = vmul.f32 0.01, %v6358_v15  ;;  %v5800_v36 = vpop.permute.xlu1 %5799 }
 0x3b6   : > { %v7108_v2 = vpack.c.bf16 %v6453_v11, %v6453_v11  ;;  %v6456_v16 = vsel %vm6392_vm14, %v6360_v60, %v6424_v23  ;;  %v6076_v17 = vsel %vm6044_vm15, %v6043_v21, %v5800_v36 }
 0x3b7   : > { %6615 = vst.msk [vmem:[%s11178_s13 + $0x8] sm:$0xf] %vm334_vm3, %v7110_v4  ;;  %v7111_v47 = vpack.c.bf16 %v6456_v16, %v6456_v16  ;;  %v6454_v62 = vsel %vm6390_vm10, %v6358_v15, %v6422_v39  ;;  %7257 = vmatmul.mubr.msk.bf16.gmra.mrb[28].mxu1 %vm6113_vm4, %v6076_v17 }
 0x3b8   : > { %6613 = vst.msk [vmem:[%s11178_s13] sm:$0xf] %vm334_vm3, %v7108_v2  ;;  %v7109_v14 = vpack.c.bf16 %v6454_v62, %v6454_v62 }
 0x3b9   : > { %6616 = vst.msk [vmem:[%s11178_s13 + $0xc] sm:$0xf] %vm334_vm3, %v7111_v47 }
 0x3ba   : > { %6614 = vst.msk [vmem:[%s11178_s13 + $0x4] sm:$0xf] %vm334_vm3, %v7109_v14 }
 0x3cd   : > { %v7234_v34 = vpop.f32.mrb[4].mxu1 }
 0x3ce   : > { %v6324_v19 = vmul.f32 %v7234_v34, %v11149_v63  ;;  %v6200_v61 = vpop.f32.mrb[5].mxu1 }
 0x3cf   : > { %v6322_v45 = vmul.f32 %v11149_v63, %v6200_v61  ;;  %v7235_v53 = vpop.f32.mrb[6].mxu1 }
 0x3d0   : > { %v6363_v8 = vadd.f32 %v11156_v33, %v6324_v19  ;;  %v6325_v44 = vmul.f32 %v7235_v53, %v11149_v63  ;;  %v6203_v40 = vpop.f32.mrb[7].mxu1 }
 0x3d1   : > { %v6361_v38 = vadd.f32 %v11156_v33, %v6322_v45  ;;  %v6323_v48 = vmul.f32 %v11149_v63, %v6203_v40 }
 0x3d2   : > { %vm6395_vm1 = vcmp.ge.f32.partialorder %v6363_v8, 0.0  ;;  %v6427_v41 = vmul.f32 0.01, %v6363_v8  ;;  %v6364_v25 = vadd.f32 %v11156_v33, %v6325_v44 }
 0x3d3   : > { %vm6393_vm15 = vcmp.ge.f32.partialorder %v6361_v38, 0.0  ;;  %v6425_v55 = vmul.f32 0.01, %v6361_v38  ;;  %v6362_v27 = vadd.f32 %v11156_v33, %v6323_v48 }
 0x3d4   : > { %v6459_v13 = vsel %vm6395_vm1, %v6363_v8, %v6427_v41  ;;  %vm6396_vm4 = vcmp.ge.f32.partialorder %v6364_v25, 0.0  ;;  %v6428_v12 = vmul.f32 0.01, %v6364_v25 }
 0x3d5   : > { %v7114_v18 = vpack.c.bf16 %v6459_v13, %v6459_v13  ;;  %v6457_v28 = vsel %vm6393_vm15, %v6361_v38, %v6425_v55  ;;  %vm6394_vm5 = vcmp.ge.f32.partialorder %v6362_v27, 0.0  ;;  %v6426_v0 = vmul.f32 0.01, %v6362_v27 }
 0x3d6   : > { %v7112_v9 = vpack.c.bf16 %v6457_v28, %v6457_v28  ;;  %v6460_v50 = vsel %vm6396_vm4, %v6364_v25, %v6428_v12 }
 0x3d7   : > { %6619 = vst.msk [vmem:[%s11178_s13 + $0x18] sm:$0xf] %vm334_vm3, %v7114_v18  ;;  %v7115_v5 = vpack.c.bf16 %v6460_v50, %v6460_v50  ;;  %v6458_v26 = vsel %vm6394_vm5, %v6362_v27, %v6426_v0 }
 0x3d8   : > { %6617 = vst.msk [vmem:[%s11178_s13 + $0x10] sm:$0xf] %vm334_vm3, %v7112_v9  ;;  %v7113_v56 = vpack.c.bf16 %v6458_v26, %v6458_v26 }
 0x3d9   : > { %6620 = vst.msk [vmem:[%s11178_s13 + $0x1c] sm:$0xf] %vm334_vm3, %v7115_v5 }
 0x3da   : > { %6618 = vst.msk [vmem:[%s11178_s13 + $0x14] sm:$0xf] %vm334_vm3, %v7113_v56 }
 0x3ed   : > { %v7238_v20 = vpop.f32.mrb[8].mxu1 }
 0x3ee   : > { %v6328_v42 = vmul.f32 %v7238_v20, %v11149_v63  ;;  %v6216_v29 = vpop.f32.mrb[9].mxu1 }
 0x3ef   : > { %v6326_v7 = vmul.f32 %v11149_v63, %v6216_v29  ;;  %v7239_v49 = vpop.f32.mrb[10].mxu1 }
 0x3f0   : > { %v6367_v31 = vadd.f32 %v11156_v33, %v6328_v42  ;;  %v6329_v57 = vmul.f32 %v7239_v49, %v11149_v63  ;;  %v6219_v52 = vpop.f32.mrb[11].mxu1 }
 0x3f1   : > { %v6365_v58 = vadd.f32 %v11156_v33, %v6326_v7  ;;  %v6327_v51 = vmul.f32 %v11149_v63, %v6219_v52 }
 0x3f2   : > { %vm6399_vm12 = vcmp.ge.f32.partialorder %v6367_v31, 0.0  ;;  %v6431_v22 = vmul.f32 0.01, %v6367_v31  ;;  %v6368_v30 = vadd.f32 %v11156_v33, %v6329_v57 }
 0x3f3   : > { %vm6397_vm0 = vcmp.ge.f32.partialorder %v6365_v58, 0.0  ;;  %v6429_v54 = vmul.f32 0.01, %v6365_v58  ;;  %v6366_v59 = vadd.f32 %v11156_v33, %v6327_v51 }
 0x3f4   : > { %v6463_v24 = vsel %vm6399_vm12, %v6367_v31, %v6431_v22  ;;  %vm6400_vm13 = vcmp.ge.f32.partialorder %v6368_v30, 0.0  ;;  %v6432_v6 = vmul.f32 0.01, %v6368_v30 }
 0x3f5   : > { %v7118_v3 = vpack.c.bf16 %v6463_v24, %v6463_v24  ;;  %v6461_v37 = vsel %vm6397_vm0, %v6365_v58, %v6429_v54  ;;  %vm6398_vm7 = vcmp.ge.f32.partialorder %v6366_v59, 0.0  ;;  %v6430_v1 = vmul.f32 0.01, %v6366_v59 }
 0x3f6   : > { %v7116_v32 = vpack.c.bf16 %v6461_v37, %v6461_v37  ;;  %v6464_v46 = vsel %vm6400_vm13, %v6368_v30, %v6432_v6 }
 0x3f7   : > { %6623 = vst.msk [vmem:[%s11178_s13 + $0x28] sm:$0xf] %vm334_vm3, %v7118_v3  ;;  %v7119_v60 = vpack.c.bf16 %v6464_v46, %v6464_v46  ;;  %v6462_v35 = vsel %vm6398_vm7, %v6366_v59, %v6430_v1 }
 0x3f8   : > { %6621 = vst.msk [vmem:[%s11178_s13 + $0x20] sm:$0xf] %vm334_vm3, %v7116_v32  ;;  %v7117_v10 = vpack.c.bf16 %v6462_v35, %v6462_v35 }
 0x3f9   : > { %6624 = vst.msk [vmem:[%s11178_s13 + $0x2c] sm:$0xf] %vm334_vm3, %v7119_v60 }
 0x3fa   : > { %6622 = vst.msk [vmem:[%s11178_s13 + $0x24] sm:$0xf] %vm334_vm3, %v7117_v10 }
 0x40d   : > { %v7242_v15 = vpop.f32.mrb[12].mxu1 }
 0x40e   : > { %v6332_v43 = vmul.f32 %v7242_v15, %v11149_v63  ;;  %v6232_v21 = vpop.f32.mrb[13].mxu1 }
 0x40f   : > { %v6330_v23 = vmul.f32 %v11149_v63, %v6232_v21  ;;  %v7243_v4 = vpop.f32.mrb[14].mxu1 }
 0x410   : > { %v6371_v11 = vadd.f32 %v11156_v33, %v6332_v43  ;;  %v6333_v39 = vmul.f32 %v7243_v4, %v11149_v63  ;;  %v6235_v36 = vpop.f32.mrb[15].mxu1 }
 0x411   : > { %v6369_v2 = vadd.f32 %v11156_v33, %v6330_v23  ;;  %v6331_v16 = vmul.f32 %v11149_v63, %v6235_v36 }
 0x412   : > { %vm6403_vm9 = vcmp.ge.f32.partialorder %v6371_v11, 0.0  ;;  %v6435_v17 = vmul.f32 0.01, %v6371_v11  ;;  %v6372_v47 = vadd.f32 %v11156_v33, %v6333_v39 }
 0x413   : > { %vm6401_vm6 = vcmp.ge.f32.partialorder %v6369_v2, 0.0  ;;  %v6433_v62 = vmul.f32 0.01, %v6369_v2  ;;  %v6370_v14 = vadd.f32 %v11156_v33, %v6331_v16 }
 0x414   : > { %v6467_v34 = vsel %vm6403_vm9, %v6371_v11, %v6435_v17  ;;  %vm6404_vm8 = vcmp.ge.f32.partialorder %v6372_v47, 0.0  ;;  %v6436_v19 = vmul.f32 0.01, %v6372_v47 }
 0x415   : > { %v7122_v61 = vpack.c.bf16 %v6467_v34, %v6467_v34  ;;  %v6465_v45 = vsel %vm6401_vm6, %v6369_v2, %v6433_v62  ;;  %vm6402_vm11 = vcmp.ge.f32.partialorder %v6370_v14, 0.0  ;;  %v6434_v53 = vmul.f32 0.01, %v6370_v14 }
 0x416   : > { %v7120_v8 = vpack.c.bf16 %v6465_v45, %v6465_v45  ;;  %v6468_v44 = vsel %vm6404_vm8, %v6372_v47, %v6436_v19 }
 0x417   : > { %6627 = vst.msk [vmem:[%s11178_s13 + $0x38] sm:$0xf] %vm334_vm3, %v7122_v61  ;;  %v7123_v40 = vpack.c.bf16 %v6468_v44, %v6468_v44  ;;  %v6466_v38 = vsel %vm6402_vm11, %v6370_v14, %v6434_v53 }
 0x418   : > { %6625 = vst.msk [vmem:[%s11178_s13 + $0x30] sm:$0xf] %vm334_vm3, %v7120_v8  ;;  %v7121_v48 = vpack.c.bf16 %v6466_v38, %v6466_v38 }
 0x419   : > { %6628 = vst.msk [vmem:[%s11178_s13 + $0x3c] sm:$0xf] %vm334_vm3, %v7123_v40 }
 0x41a   : > { %6626 = vst.msk [vmem:[%s11178_s13 + $0x34] sm:$0xf] %vm334_vm3, %v7121_v48 }
 0x42d   : > { %v7246_v41 = vpop.f32.mrb[16].mxu1 }
 0x42e   : > { %v6336_v25 = vmul.f32 %v7246_v41, %v11149_v63  ;;  %v6248_v55 = vpop.f32.mrb[17].mxu1 }
 0x42f   : > { %v6334_v27 = vmul.f32 %v11149_v63, %v6248_v55  ;;  %v7247_v13 = vpop.f32.mrb[18].mxu1 }
 0x430   : > { %v6375_v12 = vadd.f32 %v11156_v33, %v6336_v25  ;;  %v6337_v18 = vmul.f32 %v7247_v13, %v11149_v63  ;;  %v6251_v28 = vpop.f32.mrb[19].mxu1 }
 0x431   : > { %v6373_v0 = vadd.f32 %v11156_v33, %v6334_v27  ;;  %v6335_v9 = vmul.f32 %v11149_v63, %v6251_v28 }
 0x432   : > { %vm6407_vm2 = vcmp.ge.f32.partialorder %v6375_v12, 0.0  ;;  %v6439_v50 = vmul.f32 0.01, %v6375_v12  ;;  %v6376_v5 = vadd.f32 %v11156_v33, %v6337_v18 }
 0x433   : > { %vm6405_vm14 = vcmp.ge.f32.partialorder %v6373_v0, 0.0  ;;  %v6437_v26 = vmul.f32 0.01, %v6373_v0  ;;  %v6374_v56 = vadd.f32 %v11156_v33, %v6335_v9 }
 0x434   : > { %v6471_v20 = vsel %vm6407_vm2, %v6375_v12, %v6439_v50  ;;  %vm6408_vm10 = vcmp.ge.f32.partialorder %v6376_v5, 0.0  ;;  %v6440_v42 = vmul.f32 0.01, %v6376_v5 }
 0x435   : > { %v7126_v29 = vpack.c.bf16 %v6471_v20, %v6471_v20  ;;  %v6469_v7 = vsel %vm6405_vm14, %v6373_v0, %v6437_v26  ;;  %vm6406_vm1 = vcmp.ge.f32.partialorder %v6374_v56, 0.0  ;;  %v6438_v49 = vmul.f32 0.01, %v6374_v56 }
 0x436   : > { %v7124_v31 = vpack.c.bf16 %v6469_v7, %v6469_v7  ;;  %v6472_v57 = vsel %vm6408_vm10, %v6376_v5, %v6440_v42 }
 0x437   : > { %6631 = vst.msk [vmem:[%s11178_s13 + $0x48] sm:$0xf] %vm334_vm3, %v7126_v29  ;;  %v7127_v52 = vpack.c.bf16 %v6472_v57, %v6472_v57  ;;  %v6470_v58 = vsel %vm6406_vm1, %v6374_v56, %v6438_v49 }
 0x438   : > { %6629 = vst.msk [vmem:[%s11178_s13 + $0x40] sm:$0xf] %vm334_vm3, %v7124_v31  ;;  %v7125_v51 = vpack.c.bf16 %v6470_v58, %v6470_v58 }
 0x439   : > { %6632 = vst.msk [vmem:[%s11178_s13 + $0x4c] sm:$0xf] %vm334_vm3, %v7127_v52 }
 0x43a   : > { %6630 = vst.msk [vmem:[%s11178_s13 + $0x44] sm:$0xf] %vm334_vm3, %v7125_v51 }
 0x447   : > { %v7250_v22 = vpop.f32.mrb[20].mxu1 }
 0x448   : > { %v6340_v30 = vmul.f32 %v7250_v22, %v11149_v63  ;;  %v6264_v54 = vpop.f32.mrb[21].mxu1 }
 0x449   : > { %v6338_v59 = vmul.f32 %v11149_v63, %v6264_v54  ;;  %v7251_v24 = vpop.f32.mrb[22].mxu1 }
 0x44a   : > { %v6379_v6 = vadd.f32 %v11156_v33, %v6340_v30  ;;  %v6341_v3 = vmul.f32 %v7251_v24, %v11149_v63  ;;  %v6267_v37 = vpop.f32.mrb[23].mxu1 }
 0x44b   : > { %v6377_v1 = vadd.f32 %v11156_v33, %v6338_v59  ;;  %v6339_v32 = vmul.f32 %v11149_v63, %v6267_v37 }
 0x44c   : > { %vm6411_vm15 = vcmp.ge.f32.partialorder %v6379_v6, 0.0  ;;  %v6443_v46 = vmul.f32 0.01, %v6379_v6  ;;  %v6380_v60 = vadd.f32 %v11156_v33, %v6341_v3 }
 0x44d   : > { %vm6409_vm4 = vcmp.ge.f32.partialorder %v6377_v1, 0.0  ;;  %v6441_v35 = vmul.f32 0.01, %v6377_v1  ;;  %v6378_v10 = vadd.f32 %v11156_v33, %v6339_v32 }
 0x44e   : > { %v6475_v15 = vsel %vm6411_vm15, %v6379_v6, %v6443_v46  ;;  %vm6412_vm5 = vcmp.ge.f32.partialorder %v6380_v60, 0.0  ;;  %v6444_v43 = vmul.f32 0.01, %v6380_v60 }
 0x44f   : > { %v7130_v21 = vpack.c.bf16 %v6475_v15, %v6475_v15  ;;  %v6473_v23 = vsel %vm6409_vm4, %v6377_v1, %v6441_v35  ;;  %vm6410_vm12 = vcmp.ge.f32.partialorder %v6378_v10, 0.0  ;;  %v6442_v4 = vmul.f32 0.01, %v6378_v10 }
 0x450   : > { %v7128_v11 = vpack.c.bf16 %v6473_v23, %v6473_v23  ;;  %v6476_v39 = vsel %vm6412_vm5, %v6380_v60, %v6444_v43 }
 0x451   : > { %6635 = vst.msk [vmem:[%s11178_s13 + $0x58] sm:$0xf] %vm334_vm3, %v7130_v21  ;;  %v7131_v36 = vpack.c.bf16 %v6476_v39, %v6476_v39  ;;  %v6474_v2 = vsel %vm6410_vm12, %v6378_v10, %v6442_v4 }
 0x452   : > { %6633 = vst.msk [vmem:[%s11178_s13 + $0x50] sm:$0xf] %vm334_vm3, %v7128_v11  ;;  %v7129_v16 = vpack.c.bf16 %v6474_v2, %v6474_v2 }
 0x453   : > { %6636 = vst.msk [vmem:[%s11178_s13 + $0x5c] sm:$0xf] %vm334_vm3, %v7131_v36 }
 0x454   : > { %6634 = vst.msk [vmem:[%s11178_s13 + $0x54] sm:$0xf] %vm334_vm3, %v7129_v16 }
 0x467   : > { %v7254_v17 = vpop.f32.mrb[24].mxu1 }
 0x468   : > { %v6344_v47 = vmul.f32 %v7254_v17, %v11149_v63  ;;  %v6280_v62 = vpop.f32.mrb[25].mxu1 }
 0x469   : > { %v6342_v14 = vmul.f32 %v11149_v63, %v6280_v62  ;;  %v7255_v34 = vpop.f32.mrb[26].mxu1 }
 0x46a   : > { %v6383_v19 = vadd.f32 %v11156_v33, %v6344_v47  ;;  %v6345_v61 = vmul.f32 %v7255_v34, %v11149_v63  ;;  %v6283_v45 = vpop.f32.mrb[27].mxu1 }
 0x46b   : > { %v6381_v53 = vadd.f32 %v11156_v33, %v6342_v14  ;;  %v6343_v8 = vmul.f32 %v11149_v63, %v6283_v45 }
 0x46c   : > { %vm6415_vm0 = vcmp.ge.f32.partialorder %v6383_v19, 0.0  ;;  %v6447_v44 = vmul.f32 0.01, %v6383_v19  ;;  %v6384_v40 = vadd.f32 %v11156_v33, %v6345_v61 }
 0x46d   : > { %vm6413_vm13 = vcmp.ge.f32.partialorder %v6381_v53, 0.0  ;;  %v6445_v38 = vmul.f32 0.01, %v6381_v53  ;;  %v6382_v48 = vadd.f32 %v11156_v33, %v6343_v8 }
 0x46e   : > { %v6479_v41 = vsel %vm6415_vm0, %v6383_v19, %v6447_v44  ;;  %vm6416_vm7 = vcmp.ge.f32.partialorder %v6384_v40, 0.0  ;;  %v6448_v25 = vmul.f32 0.01, %v6384_v40 }
 0x46f   : > { %v7134_v55 = vpack.c.bf16 %v6479_v41, %v6479_v41  ;;  %v6477_v27 = vsel %vm6413_vm13, %v6381_v53, %v6445_v38  ;;  %vm6414_vm9 = vcmp.ge.f32.partialorder %v6382_v48, 0.0  ;;  %v6446_v13 = vmul.f32 0.01, %v6382_v48 }
 0x470   : > { %v7132_v12 = vpack.c.bf16 %v6477_v27, %v6477_v27  ;;  %v6480_v18 = vsel %vm6416_vm7, %v6384_v40, %v6448_v25 }
 0x471   : > { %6639 = vst.msk [vmem:[%s11178_s13 + $0x68] sm:$0xf] %vm334_vm3, %v7134_v55  ;;  %v7135_v28 = vpack.c.bf16 %v6480_v18, %v6480_v18  ;;  %v6478_v0 = vsel %vm6414_vm9, %v6382_v48, %v6446_v13 }
 0x472   : > { %6637 = vst.msk [vmem:[%s11178_s13 + $0x60] sm:$0xf] %vm334_vm3, %v7132_v12  ;;  %v7133_v9 = vpack.c.bf16 %v6478_v0, %v6478_v0 }
 0x473   : > { %6640 = vst.msk [vmem:[%s11178_s13 + $0x6c] sm:$0xf] %vm334_vm3, %v7135_v28 }
 0x474   : > { %6638 = vst.msk [vmem:[%s11178_s13 + $0x64] sm:$0xf] %vm334_vm3, %v7133_v9 }
 0x48a   : > { %v7258_v50 = vpop.f32.mrb[28].mxu1 }
 0x48b   : > { %v6348_v5 = vmul.f32 %v7258_v50, %v11149_v63  ;;  %v6296_v26 = vpop.f32.mrb[29].mxu1 }
 0x48c   : > { %v6346_v56 = vmul.f32 %v11149_v63, %v6296_v26  ;;  %v7259_v20 = vpop.f32.mrb[30].mxu1 }
 0x48d   : > { %v6387_v42 = vadd.f32 %v11156_v33, %v6348_v5  ;;  %v6349_v29 = vmul.f32 %v7259_v20, %v11149_v63  ;;  %v6299_v7 = vpop.f32.mrb[31].mxu1 }
 0x48e   : > { %v6385_v49 = vadd.f32 %v11156_v33, %v6346_v56  ;;  %v6347_v31 = vmul.f32 %v11149_v63, %v6299_v7 }
 0x48f   : > { %vm6419_vm6 = vcmp.ge.f32.partialorder %v6387_v42, 0.0  ;;  %v6451_v57 = vmul.f32 0.01, %v6387_v42  ;;  %v6388_v52 = vadd.f32 %v11156_v33, %v6349_v29 }
 0x490   : > { %vm6417_vm8 = vcmp.ge.f32.partialorder %v6385_v49, 0.0  ;;  %v6449_v58 = vmul.f32 0.01, %v6385_v49  ;;  %v6386_v51 = vadd.f32 %v11156_v33, %v6347_v31 }
 0x491   : > { %v6483_v22 = vsel %vm6419_vm6, %v6387_v42, %v6451_v57  ;;  %vm6420_vm11 = vcmp.ge.f32.partialorder %v6388_v52, 0.0  ;;  %v6452_v30 = vmul.f32 0.01, %v6388_v52 }
 0x492   : > { %v7138_v54 = vpack.c.bf16 %v6483_v22, %v6483_v22  ;;  %v6481_v59 = vsel %vm6417_vm8, %v6385_v49, %v6449_v58  ;;  %vm6418_vm2 = vcmp.ge.f32.partialorder %v6386_v51, 0.0  ;;  %v6450_v24 = vmul.f32 0.01, %v6386_v51 }
 0x493   : > { %v7136_v63 = vpack.c.bf16 %v6481_v59, %v6481_v59  ;;  %v6484_v6 = vsel %vm6420_vm11, %v6388_v52, %v6452_v30 }
 0x494   : > { %6643 = vst.msk [vmem:[%s11178_s13 + $0x78] sm:$0xf] %vm334_vm3, %v7138_v54  ;;  %v7139_v3 = vpack.c.bf16 %v6484_v6, %v6484_v6  ;;  %v6482_v37 = vsel %vm6418_vm2, %v6386_v51, %v6450_v24 }
 0x495   : > { %6641 = vst.msk [vmem:[%s11178_s13 + $0x70] sm:$0xf] %vm334_vm3, %v7136_v63  ;;  %v7137_v1 = vpack.c.bf16 %v6482_v37, %v6482_v37 }
 0x496   : > { %6644 = vst.msk [vmem:[%s11178_s13 + $0x7c] sm:$0xf] %vm334_vm3, %v7139_v3 }
 0x497   : > { %6642 = vst.msk [vmem:[%s11178_s13 + $0x74] sm:$0xf] %vm334_vm3, %v7137_v1 }
 0x498 PF: > { %s19_s30 = sadd.s32 1, %s7356_s30  }
 0x499   : > { %p16_p4 = scmp.ge.s32.totalorder %s19_s30, 4  }
 0x49b   :  { %18 = sbr.rel (!%p16_p4) target bundleno = 1 (0x1), region = 86 }

</bundles_post_ra>
